<compile_context>
chip_gen: v6e
topology: v6e:2x2x1
jax: 0.10.0
libtpu: 0.0.40
codegen_flags: <defaults>
</compile_context>

<pallas_src>
import jax
import jax.numpy as jnp
from jax.experimental import pallas as pl
from jax.experimental.pallas import tpu as pltpu


def _round_up(x, m):
    return ((x + m - 1) // m) * m


def _vmem_budget_bytes(frac=0.85):
    """Per-generation usable VMEM budget (85% of physical capacity)."""
    try:
        cap = int(pltpu.get_tpu_info().vmem_capacity_bytes)
    except Exception:
        cap = 64 << 20  # conservative fallback (v7x per-TensorCore VMEM)
    return int(cap * frac)


_TM_LADDER = (1024, 768, 512, 384, 256, 192, 128, 96, 64, 48, 32, 16, 8)


def _choose_tile_m(M, tile_m_cap, sub, fits_fn, waste_cap=0.15):
    """Pick the row-tile size.

    Preference order: (a) fits VMEM, (b) padding waste <= waste_cap,
    (c) >=2 row tiles (so the 'parallel' grid axis can shard across both
    TensorCores on v7x), (d) largest tm.  Returns None if nothing fits.
    """
    cap = _round_up(max(min(tile_m_cap, _round_up(M, sub)), sub), sub)
    cands = sorted({t for t in _TM_LADDER if t % sub == 0 and t <= cap} | {cap},
                   reverse=True)
    best = None
    for tm in cands:
        if not fits_fn(tm):
            continue
        m_pad = _round_up(M, tm)
        waste = (m_pad - M) / m_pad
        key = (waste <= waste_cap, (m_pad // tm) >= 2, tm)
        if best is None or key > best[0]:
            best = (key, tm)
    return None if best is None else best[1]


# ----------------------------------------------------------------------------
# Fused chained-matmul kernel (weights VMEM-resident).
# ----------------------------------------------------------------------------
def _chained_matmul_kernel(x_ref, *refs):
    """refs = (w0_ref, ..., wN_ref, o_ref): o = (((x @ w0) @ w1) ... @ wN).

    Operands stay in the narrow compute dtype (bf16) so the MXU runs at full
    rate; every matmul accumulates in f32; intermediates are rounded back to
    the compute dtype; the final result is stored in o_ref.dtype.
    """
    w_refs = refs[:-1]
    o_ref = refs[-1]
    n = len(w_refs)

    acc = x_ref[...]
    for idx, w_ref in enumerate(w_refs):  # statically unrolled MXU chain
        out = jnp.dot(acc, w_ref[...], preferred_element_type=jnp.float32)
        acc = out if idx == n - 1 else out.astype(x_ref.dtype)
    o_ref[...] = acc.astype(o_ref.dtype)


# ----------------------------------------------------------------------------
# Fallback: classic tiled matmul with K-reduction grid axis (used only when
# the resident-weight chain does not fit the VMEM budget).
# ----------------------------------------------------------------------------
def _matmul_tiled_kernel(x_ref, w_ref, o_ref, acc_ref):
    @pl.when(pl.program_id(2) == 0)
    def _():
        acc_ref[...] = jnp.zeros_like(acc_ref)

    acc_ref[...] += jnp.dot(x_ref[...], w_ref[...],
                            preferred_element_type=jnp.float32)
    o_ref[...] = acc_ref[...].astype(o_ref.dtype)


def _tiled_matmul(x2d, w, out_dtype, *, tm=256, tn=256, tk=512):
    M, K = x2d.shape
    Kw, N = w.shape
    assert K == Kw, (x2d.shape, w.shape)
    sub = 8 if jnp.dtype(x2d.dtype).itemsize == 4 else 16
    tm = min(tm, _round_up(M, sub))
    tn = min(tn, _round_up(N, 128))
    tk = min(tk, _round_up(K, 128))
    mp, kp, np_ = _round_up(M, tm), _round_up(K, tk), _round_up(N, tn)
    if (mp, kp) != (M, K):
        x2d = jnp.pad(x2d, ((0, mp - M), (0, kp - K)))
    if (kp, np_) != (K, N):
        w = jnp.pad(w, ((0, kp - K), (0, np_ - N)))

    out = pl.pallas_call(
        _matmul_tiled_kernel,
        out_shape=jax.ShapeDtypeStruct((mp, np_), out_dtype),
        grid=(mp // tm, np_ // tn, kp // tk),
        in_specs=[pl.BlockSpec((tm, tk), lambda i, j, k: (i, k)),
                  pl.BlockSpec((tk, tn), lambda i, j, k: (k, j))],
        out_specs=pl.BlockSpec((tm, tn), lambda i, j, k: (i, j)),
        scratch_shapes=[pltpu.VMEM((tm, tn), jnp.float32)],
        compiler_params=pltpu.CompilerParams(
            dimension_semantics=("parallel", "parallel", "arbitrary")),
    )(x2d, w)
    return out[:M, :N]


# ----------------------------------------------------------------------------
# Layer / model wrappers.
# ----------------------------------------------------------------------------
def distributed_transformer_layer(x, attention_weights, ffn_weights, *,
                                  tile_m=512, compute_dtype=jnp.bfloat16,
                                  out_dtype=None):
    """JAX/Pallas equivalent of DistributedTransformerLayer.forward.

    x:                  (B, S, H)
    attention_weights:  list of (H_in, H_out) matrices, applied in order
    ffn_weights:        list of (H_in, H_out) matrices, applied in order
    out_dtype:          dtype of the layer output (default: x.dtype).  Pass
                        compute_dtype for intermediate layers to halve HBM
                        traffic at layer boundaries.
    """
    # TODO(synk): the torch forward would also matmul 1-D bias chunks if they
    # appear in chunked_tensors; only 2-D weight matrices are supported here.
    B, S, H = x.shape
    out_dtype = jnp.dtype(x.dtype if out_dtype is None else out_dtype)
    weights = [jnp.asarray(w, dtype=compute_dtype)
               for w in (list(attention_weights) + list(ffn_weights))]
    if not weights:
        return x.astype(out_dtype)

    # Shape-chain sanity.
    d = H
    for w in weights:
        assert w.ndim == 2 and w.shape[0] == d, (w.shape, d)
        d = w.shape[1]
    out_dim = d

    M = B * S
    x2d = x.reshape(M, H).astype(compute_dtype)

    in_bytes = jnp.dtype(compute_dtype).itemsize
    o_bytes = out_dtype.itemsize
    sub = 8 if in_bytes == 4 else 16
    budget = _vmem_budget_bytes()
    weight_bytes = sum(int(w.size) for w in weights) * in_bytes  # single-buffered
    max_width = max(w.shape[1] for w in weights)
    headroom = 2 << 20

    def chain_bytes(tm, w_bytes=weight_bytes):
        return (w_bytes
                + 2 * tm * H * in_bytes             # double-buffered x tile
                + 2 * tm * out_dim * o_bytes        # double-buffered out tile
                + tm * max_width * (4 + in_bytes)   # f32 dot result + recast copy
                + headroom)

    tm = _choose_tile_m(M, tile_m, sub, lambda t: chain_bytes(t) <= budget)

    if tm is None:
        # Resident-weight chain does not fit VMEM: apply one tiled matmul per
        # weight (K-reduction grid + f32 accumulator), bf16 intermediates.
        acc = x2d
        for i, w in enumerate(weights):
            last = i == len(weights) - 1
            acc = _tiled_matmul(acc, w, out_dtype if last else compute_dtype)
        return acc.reshape(B, S, out_dim)

    m_pad = _round_up(M, tm)
    if m_pad != M:
        x2d = jnp.pad(x2d, ((0, m_pad - M), (0, 0)))
    grid = (m_pad // tm,)

    flops = 2 * m_pad * sum(w.shape[0] * w.shape[1] for w in weights)
    bytes_accessed = (m_pad * H * in_bytes + weight_bytes
                      + m_pad * out_dim * o_bytes)
    cost = pl.CostEstimate(flops=int(flops), transcendentals=0,
                           bytes_accessed=int(bytes_accessed))

    def call(single_buffer_weights):
        w_alloc = weight_bytes if single_buffer_weights else 2 * weight_bytes
        vmem_limit = int(min(max(chain_bytes(tm, w_alloc) + (2 << 20), 32 << 20),
                             budget))
        in_specs = [pl.BlockSpec((tm, H), lambda i: (i, 0))]
        for w in weights:
            if single_buffer_weights:
                # Constant index_map => no overlap benefit from double
                # buffering; single-buffer to halve the weight VMEM footprint.
                spec = pl.BlockSpec(w.shape, lambda i: (0, 0),
                                    pipeline_mode=pl.Buffered(1))
            else:
                spec = pl.BlockSpec(w.shape, lambda i: (0, 0))
            in_specs.append(spec)
        return pl.pallas_call(
            _chained_matmul_kernel,
            out_shape=jax.ShapeDtypeStruct((m_pad, out_dim), out_dtype),
            grid=grid,
            in_specs=in_specs,
            out_specs=pl.BlockSpec((tm, out_dim), lambda i: (i, 0)),
            compiler_params=pltpu.CompilerParams(
                dimension_semantics=("parallel",),  # shard row tiles across TCs
                vmem_limit_bytes=vmem_limit),
            cost_estimate=cost,
        )(x2d, *weights)

    try:
        out2d = call(True)        # single-buffered resident weights
    except Exception:
        out2d = call(False)       # robustness fallback: default buffering

    if m_pad != M:
        out2d = out2d[:M]
    return out2d.reshape(B, S, out_dim)


def distributed_model(x, layer_weights, *, fuse_layers=True,
                      compute_dtype=jnp.bfloat16, tile_m=512):
    """DistributedModel.forward: apply each layer's matmul chain in sequence.

    If every layer's weights together fit the VMEM budget, the whole stack is
    fused into a single pallas_call (activations never touch HBM between
    layers).  Otherwise layers run one at a time with bf16 inter-layer
    activations; only the final output is written in the input dtype.
    """
    final_dtype = x.dtype
    flat = [jnp.asarray(w) for attn, ffn in layer_weights
            for w in (list(attn) + list(ffn))]

    if fuse_layers and flat:
        B, S, H = x.shape
        in_bytes = jnp.dtype(compute_dtype).itemsize
        o_bytes = jnp.dtype(final_dtype).itemsize
        sub = 8 if in_bytes == 4 else 16
        weight_bytes = sum(int(w.size) for w in flat) * in_bytes
        max_width = max(w.shape[1] for w in flat)
        out_dim = flat[-1].shape[1]
        tm_min = min(_round_up(B * S, sub), 128)
        min_bytes = (weight_bytes
                     + 2 * tm_min * H * in_bytes
                     + 2 * tm_min * out_dim * o_bytes
                     + tm_min * max_width * (4 + in_bytes)
                     + (2 << 20))
        if min_bytes <= _vmem_budget_bytes():
            return distributed_transformer_layer(
                x, flat, [], tile_m=tile_m, compute_dtype=compute_dtype,
                out_dtype=final_dtype)

    n = len(layer_weights)
    for i, (attn, ffn) in enumerate(layer_weights):
        x = distributed_transformer_layer(
            x, attn, ffn, tile_m=tile_m, compute_dtype=compute_dtype,
            out_dtype=final_dtype if i == n - 1 else compute_dtype)
    return x


def _reference_chain(x, weights, compute_dtype=jnp.bfloat16):
    """Pure-JAX reference with matching numerics (bf16 operands, f32 accum)."""
    B, S, H = x.shape
    acc = x.reshape(B * S, H).astype(compute_dtype)
    n = len(weights)
    for i, w in enumerate(weights):
        out = jnp.dot(acc, w.astype(compute_dtype),
                      preferred_element_type=jnp.float32)
        acc = out if i == n - 1 else out.astype(compute_dtype)
    return acc.astype(x.dtype).reshape(B, S, weights[-1].shape[1])


if __name__ == "__main__":
    # Small but lane-dense, MXU-friendly shapes (feature dims >= 256 so each
    # matmul fully feeds the 256x256 MXU on v6e/v7x).
    B, S, H, F = 2, 8, 256, 512
    NUM_LAYERS = 2

    key = jax.random.PRNGKey(0)
    kx, kw = jax.random.split(key)
    x = jax.random.normal(kx, (B, S, H), jnp.float32)

    # Synthetic "distributed_params": per layer 4 attention shards (wk,wq,wv,wo)
    # of shape (H, H) and 2 feed-forward shards (H, F), (F, H).
    layer_weights = []
    for _ in range(NUM_LAYERS):
        kw, ka0, ka1, ka2, ka3, kf0, kf1 = jax.random.split(kw, 7)
        attn = [jax.random.normal(k, (H, H), jnp.float32) * (H ** -0.5)
                for k in (ka0, ka1, ka2, ka3)]
        ffn = [jax.random.normal(kf0, (H, F), jnp.float32) * (H ** -0.5),
               jax.random.normal(kf1, (F, H), jnp.float32) * (F ** -0.5)]
        layer_weights.append((attn, ffn))

    flat_ws = [w for attn, ffn in layer_weights for w in attn + ffn]
    ref = _reference_chain(x, flat_ws)

    # 1) Fully fused path (all layers' weights VMEM-resident in one kernel).
    out_fused = jax.block_until_ready(distributed_model(x, layer_weights))
    assert out_fused.shape == (B, S, H), out_fused.shape
    assert jnp.allclose(out_fused, ref, atol=2e-2, rtol=2e-2), \
        "fused path mismatch vs bf16/f32-accum reference"

    # 2) Per-layer path (bf16 inter-layer activations, f32 final output).
    out_layered = jax.block_until_ready(
        distributed_model(x, layer_weights, fuse_layers=False))
    assert out_layered.dtype == x.dtype
    assert jnp.allclose(out_layered, ref, atol=2e-2, rtol=2e-2), \
        "per-layer path mismatch vs bf16/f32-accum reference"

    # 3) Fallback tiled-matmul smoke test (used when weights exceed VMEM).
    xb = x.reshape(B * S, H).astype(jnp.bfloat16)
    wb = flat_ws[0].astype(jnp.bfloat16)
    got = jax.block_until_ready(_tiled_matmul(xb, wb, jnp.float32))
    want = jnp.dot(xb, wb, preferred_element_type=jnp.float32)
    assert jnp.allclose(got, want, atol=1e-2, rtol=1e-2), \
        "tiled-matmul fallback mismatch"

    # Loose sanity vs the pure-f32 torch-semantics chain (difference is only
    # bf16 operand rounding along the chain).
    ref_f32 = x
    for w in flat_ws:
        ref_f32 = jnp.matmul(ref_f32, w)
    rel_err = float(jnp.max(jnp.abs(out_fused - ref_f32)) /
                    (jnp.max(jnp.abs(ref_f32)) + 1e-6))
    assert rel_err < 0.1, f"relative error vs f32 reference too large: {rel_err}"

    print("KERNEL_OK")
</pallas_src>

<mosaic_0001>
module attributes {stable_mosaic.version = 11 : i64} {
  func.func @_chained_matmul_kernel(%arg0: i32, %arg1: memref<16x256xbf16, #tpu.memory_space<vmem>>, %arg2: memref<256x256xbf16, #tpu.memory_space<vmem>>, %arg3: memref<256x256xbf16, #tpu.memory_space<vmem>>, %arg4: memref<256x256xbf16, #tpu.memory_space<vmem>>, %arg5: memref<256x256xbf16, #tpu.memory_space<vmem>>, %arg6: memref<256x512xbf16, #tpu.memory_space<vmem>>, %arg7: memref<512x256xbf16, #tpu.memory_space<vmem>>, %arg8: memref<256x256xbf16, #tpu.memory_space<vmem>>, %arg9: memref<256x256xbf16, #tpu.memory_space<vmem>>, %arg10: memref<256x256xbf16, #tpu.memory_space<vmem>>, %arg11: memref<256x256xbf16, #tpu.memory_space<vmem>>, %arg12: memref<256x512xbf16, #tpu.memory_space<vmem>>, %arg13: memref<512x256xbf16, #tpu.memory_space<vmem>>, %arg14: memref<16x256xf32, #tpu.memory_space<vmem>>) attributes {dimension_semantics = [#tpu.dimension_semantics<parallel>], iteration_bounds = array<i64: 1>, scalar_prefetch = 0 : i64, scratch_operands = 0 : i64, tpu.core_type = #tpu.core_type<tc>, window_params = [{transform_indices = @transform_0, window_bounds = array<i64: 16, 256>}, {pipeline_mode = #tpu.pipeline_mode<synchronous>, transform_indices = @transform_1, window_bounds = array<i64: 256, 256>}, {pipeline_mode = #tpu.pipeline_mode<synchronous>, transform_indices = @transform_2, window_bounds = array<i64: 256, 256>}, {pipeline_mode = #tpu.pipeline_mode<synchronous>, transform_indices = @transform_3, window_bounds = array<i64: 256, 256>}, {pipeline_mode = #tpu.pipeline_mode<synchronous>, transform_indices = @transform_4, window_bounds = array<i64: 256, 256>}, {pipeline_mode = #tpu.pipeline_mode<synchronous>, transform_indices = @transform_5, window_bounds = array<i64: 256, 512>}, {pipeline_mode = #tpu.pipeline_mode<synchronous>, transform_indices = @transform_6, window_bounds = array<i64: 512, 256>}, {pipeline_mode = #tpu.pipeline_mode<synchronous>, transform_indices = @transform_7, window_bounds = array<i64: 256, 256>}, {pipeline_mode = #tpu.pipeline_mode<synchronous>, transform_indices = @transform_8, window_bounds = array<i64: 256, 256>}, {pipeline_mode = #tpu.pipeline_mode<synchronous>, transform_indices = @transform_9, window_bounds = array<i64: 256, 256>}, {pipeline_mode = #tpu.pipeline_mode<synchronous>, transform_indices = @transform_10, window_bounds = array<i64: 256, 256>}, {pipeline_mode = #tpu.pipeline_mode<synchronous>, transform_indices = @transform_11, window_bounds = array<i64: 256, 512>}, {pipeline_mode = #tpu.pipeline_mode<synchronous>, transform_indices = @transform_12, window_bounds = array<i64: 512, 256>}, {transform_indices = @transform_13, window_bounds = array<i64: 16, 256>}]} {
    %c0 = arith.constant 0 : index
    %c0_0 = arith.constant 0 : index
    %0 = vector.load %arg1[%c0, %c0_0] : memref<16x256xbf16, #tpu.memory_space<vmem>>, vector<16x256xbf16>
    %c0_1 = arith.constant 0 : index
    %c0_2 = arith.constant 0 : index
    %1 = vector.load %arg2[%c0_1, %c0_2] : memref<256x256xbf16, #tpu.memory_space<vmem>>, vector<256x256xbf16>
    %cst = arith.constant dense<0.000000e+00> : vector<16x256xf32>
    %2 = tpu.matmul %0, %1, %cst {dimension_numbers = #tpu.dot_dimension_numbers<[1], [0], [0], [1], [0, 0, 1, 1], [], []>} : vector<16x256xbf16>, vector<256x256xbf16>, vector<16x256xf32> -> vector<16x256xf32>
    %3 = arith.truncf %2 : vector<16x256xf32> to vector<16x256xbf16>
    %c0_3 = arith.constant 0 : index
    %c0_4 = arith.constant 0 : index
    %4 = vector.load %arg3[%c0_3, %c0_4] : memref<256x256xbf16, #tpu.memory_space<vmem>>, vector<256x256xbf16>
    %cst_5 = arith.constant dense<0.000000e+00> : vector<16x256xf32>
    %5 = tpu.matmul %3, %4, %cst_5 {dimension_numbers = #tpu.dot_dimension_numbers<[1], [0], [0], [1], [0, 0, 1, 1], [], []>} : vector<16x256xbf16>, vector<256x256xbf16>, vector<16x256xf32> -> vector<16x256xf32>
    %6 = arith.truncf %5 : vector<16x256xf32> to vector<16x256xbf16>
    %c0_6 = arith.constant 0 : index
    %c0_7 = arith.constant 0 : index
    %7 = vector.load %arg4[%c0_6, %c0_7] : memref<256x256xbf16, #tpu.memory_space<vmem>>, vector<256x256xbf16>
    %cst_8 = arith.constant dense<0.000000e+00> : vector<16x256xf32>
    %8 = tpu.matmul %6, %7, %cst_8 {dimension_numbers = #tpu.dot_dimension_numbers<[1], [0], [0], [1], [0, 0, 1, 1], [], []>} : vector<16x256xbf16>, vector<256x256xbf16>, vector<16x256xf32> -> vector<16x256xf32>
    %9 = arith.truncf %8 : vector<16x256xf32> to vector<16x256xbf16>
    %c0_9 = arith.constant 0 : index
    %c0_10 = arith.constant 0 : index
    %10 = vector.load %arg5[%c0_9, %c0_10] : memref<256x256xbf16, #tpu.memory_space<vmem>>, vector<256x256xbf16>
    %cst_11 = arith.constant dense<0.000000e+00> : vector<16x256xf32>
    %11 = tpu.matmul %9, %10, %cst_11 {dimension_numbers = #tpu.dot_dimension_numbers<[1], [0], [0], [1], [0, 0, 1, 1], [], []>} : vector<16x256xbf16>, vector<256x256xbf16>, vector<16x256xf32> -> vector<16x256xf32>
    %12 = arith.truncf %11 : vector<16x256xf32> to vector<16x256xbf16>
    %c0_12 = arith.constant 0 : index
    %c0_13 = arith.constant 0 : index
    %13 = vector.load %arg6[%c0_12, %c0_13] : memref<256x512xbf16, #tpu.memory_space<vmem>>, vector<256x512xbf16>
    %cst_14 = arith.constant dense<0.000000e+00> : vector<16x512xf32>
    %14 = tpu.matmul %12, %13, %cst_14 {dimension_numbers = #tpu.dot_dimension_numbers<[1], [0], [0], [1], [0, 0, 1, 1], [], []>} : vector<16x256xbf16>, vector<256x512xbf16>, vector<16x512xf32> -> vector<16x512xf32>
    %15 = arith.truncf %14 : vector<16x512xf32> to vector<16x512xbf16>
    %c0_15 = arith.constant 0 : index
    %c0_16 = arith.constant 0 : index
    %16 = vector.load %arg7[%c0_15, %c0_16] : memref<512x256xbf16, #tpu.memory_space<vmem>>, vector<512x256xbf16>
    %cst_17 = arith.constant dense<0.000000e+00> : vector<16x256xf32>
    %17 = tpu.matmul %15, %16, %cst_17 {dimension_numbers = #tpu.dot_dimension_numbers<[1], [0], [0], [1], [0, 0, 1, 1], [], []>} : vector<16x512xbf16>, vector<512x256xbf16>, vector<16x256xf32> -> vector<16x256xf32>
    %18 = arith.truncf %17 : vector<16x256xf32> to vector<16x256xbf16>
    %c0_18 = arith.constant 0 : index
    %c0_19 = arith.constant 0 : index
    %19 = vector.load %arg8[%c0_18, %c0_19] : memref<256x256xbf16, #tpu.memory_space<vmem>>, vector<256x256xbf16>
    %cst_20 = arith.constant dense<0.000000e+00> : vector<16x256xf32>
    %20 = tpu.matmul %18, %19, %cst_20 {dimension_numbers = #tpu.dot_dimension_numbers<[1], [0], [0], [1], [0, 0, 1, 1], [], []>} : vector<16x256xbf16>, vector<256x256xbf16>, vector<16x256xf32> -> vector<16x256xf32>
    %21 = arith.truncf %20 : vector<16x256xf32> to vector<16x256xbf16>
    %c0_21 = arith.constant 0 : index
    %c0_22 = arith.constant 0 : index
    %22 = vector.load %arg9[%c0_21, %c0_22] : memref<256x256xbf16, #tpu.memory_space<vmem>>, vector<256x256xbf16>
    %cst_23 = arith.constant dense<0.000000e+00> : vector<16x256xf32>
    %23 = tpu.matmul %21, %22, %cst_23 {dimension_numbers = #tpu.dot_dimension_numbers<[1], [0], [0], [1], [0, 0, 1, 1], [], []>} : vector<16x256xbf16>, vector<256x256xbf16>, vector<16x256xf32> -> vector<16x256xf32>
    %24 = arith.truncf %23 : vector<16x256xf32> to vector<16x256xbf16>
    %c0_24 = arith.constant 0 : index
    %c0_25 = arith.constant 0 : index
    %25 = vector.load %arg10[%c0_24, %c0_25] : memref<256x256xbf16, #tpu.memory_space<vmem>>, vector<256x256xbf16>
    %cst_26 = arith.constant dense<0.000000e+00> : vector<16x256xf32>
    %26 = tpu.matmul %24, %25, %cst_26 {dimension_numbers = #tpu.dot_dimension_numbers<[1], [0], [0], [1], [0, 0, 1, 1], [], []>} : vector<16x256xbf16>, vector<256x256xbf16>, vector<16x256xf32> -> vector<16x256xf32>
    %27 = arith.truncf %26 : vector<16x256xf32> to vector<16x256xbf16>
    %c0_27 = arith.constant 0 : index
    %c0_28 = arith.constant 0 : index
    %28 = vector.load %arg11[%c0_27, %c0_28] : memref<256x256xbf16, #tpu.memory_space<vmem>>, vector<256x256xbf16>
    %cst_29 = arith.constant dense<0.000000e+00> : vector<16x256xf32>
    %29 = tpu.matmul %27, %28, %cst_29 {dimension_numbers = #tpu.dot_dimension_numbers<[1], [0], [0], [1], [0, 0, 1, 1], [], []>} : vector<16x256xbf16>, vector<256x256xbf16>, vector<16x256xf32> -> vector<16x256xf32>
    %30 = arith.truncf %29 : vector<16x256xf32> to vector<16x256xbf16>
    %c0_30 = arith.constant 0 : index
    %c0_31 = arith.constant 0 : index
    %31 = vector.load %arg12[%c0_30, %c0_31] : memref<256x512xbf16, #tpu.memory_space<vmem>>, vector<256x512xbf16>
    %cst_32 = arith.constant dense<0.000000e+00> : vector<16x512xf32>
    %32 = tpu.matmul %30, %31, %cst_32 {dimension_numbers = #tpu.dot_dimension_numbers<[1], [0], [0], [1], [0, 0, 1, 1], [], []>} : vector<16x256xbf16>, vector<256x512xbf16>, vector<16x512xf32> -> vector<16x512xf32>
    %33 = arith.truncf %32 : vector<16x512xf32> to vector<16x512xbf16>
    %c0_33 = arith.constant 0 : index
    %c0_34 = arith.constant 0 : index
    %34 = vector.load %arg13[%c0_33, %c0_34] : memref<512x256xbf16, #tpu.memory_space<vmem>>, vector<512x256xbf16>
    %cst_35 = arith.constant dense<0.000000e+00> : vector<16x256xf32>
    %35 = tpu.matmul %33, %34, %cst_35 {dimension_numbers = #tpu.dot_dimension_numbers<[1], [0], [0], [1], [0, 0, 1, 1], [], []>} : vector<16x512xbf16>, vector<512x256xbf16>, vector<16x256xf32> -> vector<16x256xf32>
    %c0_36 = arith.constant 0 : index
    %c0_37 = arith.constant 0 : index
    %36 = vector.load %arg14[%c0_36, %c0_37] : memref<16x256xf32, #tpu.memory_space<vmem>>, vector<16x256xf32>
    tpu.vector_store %arg14[%c0_36, %c0_37], %35 {strides = array<i32>} : memref<16x256xf32, #tpu.memory_space<vmem>>, vector<16x256xf32>,
    return
  }
  func.func @transform_0(%arg0: i32) -> (i32, i32) {
    %c0_i32 = arith.constant 0 : i32
    %c0_i32_0 = arith.constant 0 : i32
    return %arg0, %c0_i32 : i32, i32
  }
  func.func @transform_1(%arg0: i32) -> (i32, i32) {
    %c0_i32 = arith.constant 0 : i32
    %c0_i32_0 = arith.constant 0 : i32
    %c0_i32_1 = arith.constant 0 : i32
    return %c0_i32, %c0_i32_0 : i32, i32
  }
  func.func @transform_2(%arg0: i32) -> (i32, i32) {
    %c0_i32 = arith.constant 0 : i32
    %c0_i32_0 = arith.constant 0 : i32
    %c0_i32_1 = arith.constant 0 : i32
    return %c0_i32, %c0_i32_0 : i32, i32
  }
  func.func @transform_3(%arg0: i32) -> (i32, i32) {
    %c0_i32 = arith.constant 0 : i32
    %c0_i32_0 = arith.constant 0 : i32
    %c0_i32_1 = arith.constant 0 : i32
    return %c0_i32, %c0_i32_0 : i32, i32
  }
  func.func @transform_4(%arg0: i32) -> (i32, i32) {
    %c0_i32 = arith.constant 0 : i32
    %c0_i32_0 = arith.constant 0 : i32
    %c0_i32_1 = arith.constant 0 : i32
    return %c0_i32, %c0_i32_0 : i32, i32
  }
  func.func @transform_5(%arg0: i32) -> (i32, i32) {
    %c0_i32 = arith.constant 0 : i32
    %c0_i32_0 = arith.constant 0 : i32
    %c0_i32_1 = arith.constant 0 : i32
    return %c0_i32, %c0_i32_0 : i32, i32
  }
  func.func @transform_6(%arg0: i32) -> (i32, i32) {
    %c0_i32 = arith.constant 0 : i32
    %c0_i32_0 = arith.constant 0 : i32
    %c0_i32_1 = arith.constant 0 : i32
    return %c0_i32, %c0_i32_0 : i32, i32
  }
  func.func @transform_7(%arg0: i32) -> (i32, i32) {
    %c0_i32 = arith.constant 0 : i32
    %c0_i32_0 = arith.constant 0 : i32
    %c0_i32_1 = arith.constant 0 : i32
    return %c0_i32, %c0_i32_0 : i32, i32
  }
  func.func @transform_8(%arg0: i32) -> (i32, i32) {
    %c0_i32 = arith.constant 0 : i32
    %c0_i32_0 = arith.constant 0 : i32
    %c0_i32_1 = arith.constant 0 : i32
    return %c0_i32, %c0_i32_0 : i32, i32
  }
  func.func @transform_9(%arg0: i32) -> (i32, i32) {
    %c0_i32 = arith.constant 0 : i32
    %c0_i32_0 = arith.constant 0 : i32
    %c0_i32_1 = arith.constant 0 : i32
    return %c0_i32, %c0_i32_0 : i32, i32
  }
  func.func @transform_10(%arg0: i32) -> (i32, i32) {
    %c0_i32 = arith.constant 0 : i32
    %c0_i32_0 = arith.constant 0 : i32
    %c0_i32_1 = arith.constant 0 : i32
    return %c0_i32, %c0_i32_0 : i32, i32
  }
  func.func @transform_11(%arg0: i32) -> (i32, i32) {
    %c0_i32 = arith.constant 0 : i32
    %c0_i32_0 = arith.constant 0 : i32
    %c0_i32_1 = arith.constant 0 : i32
    return %c0_i32, %c0_i32_0 : i32, i32
  }
  func.func @transform_12(%arg0: i32) -> (i32, i32) {
    %c0_i32 = arith.constant 0 : i32
    %c0_i32_0 = arith.constant 0 : i32
    %c0_i32_1 = arith.constant 0 : i32
    return %c0_i32, %c0_i32_0 : i32, i32
  }
  func.func @transform_13(%arg0: i32) -> (i32, i32) {
    %c0_i32 = arith.constant 0 : i32
    %c0_i32_0 = arith.constant 0 : i32
    return %arg0, %c0_i32 : i32, i32
  }
}

module attributes {stable_mosaic.version = 11 : i64} {
  func.func @_chained_matmul_kernel(%arg0: i32, %arg1: memref<16x256xbf16, #tpu.memory_space<vmem>>, %arg2: memref<256x256xbf16, #tpu.memory_space<vmem>>, %arg3: memref<256x256xbf16, #tpu.memory_space<vmem>>, %arg4: memref<256x256xbf16, #tpu.memory_space<vmem>>, %arg5: memref<256x256xbf16, #tpu.memory_space<vmem>>, %arg6: memref<256x512xbf16, #tpu.memory_space<vmem>>, %arg7: memref<512x256xbf16, #tpu.memory_space<vmem>>, %arg8: memref<256x256xbf16, #tpu.memory_space<vmem>>, %arg9: memref<256x256xbf16, #tpu.memory_space<vmem>>, %arg10: memref<256x256xbf16, #tpu.memory_space<vmem>>, %arg11: memref<256x256xbf16, #tpu.memory_space<vmem>>, %arg12: memref<256x512xbf16, #tpu.memory_space<vmem>>, %arg13: memref<512x256xbf16, #tpu.memory_space<vmem>>, %arg14: memref<16x256xf32, #tpu.memory_space<vmem>>) attributes {dimension_semantics = [#tpu.dimension_semantics<parallel>], iteration_bounds = array<i64: 1>, scalar_prefetch = 0 : i64, scratch_operands = 0 : i64, tpu.core_type = #tpu.core_type<tc>, window_params = [{transform_indices = @transform_0, window_bounds = array<i64: 16, 256>}, {pipeline_mode = #tpu.pipeline_mode<synchronous>, transform_indices = @transform_1, window_bounds = array<i64: 256, 256>}, {pipeline_mode = #tpu.pipeline_mode<synchronous>, transform_indices = @transform_2, window_bounds = array<i64: 256, 256>}, {pipeline_mode = #tpu.pipeline_mode<synchronous>, transform_indices = @transform_3, window_bounds = array<i64: 256, 256>}, {pipeline_mode = #tpu.pipeline_mode<synchronous>, transform_indices = @transform_4, window_bounds = array<i64: 256, 256>}, {pipeline_mode = #tpu.pipeline_mode<synchronous>, transform_indices = @transform_5, window_bounds = array<i64: 256, 512>}, {pipeline_mode = #tpu.pipeline_mode<synchronous>, transform_indices = @transform_6, window_bounds = array<i64: 512, 256>}, {pipeline_mode = #tpu.pipeline_mode<synchronous>, transform_indices = @transform_7, window_bounds = array<i64: 256, 256>}, {pipeline_mode = #tpu.pipeline_mode<synchronous>, transform_indices = @transform_8, window_bounds = array<i64: 256, 256>}, {pipeline_mode = #tpu.pipeline_mode<synchronous>, transform_indices = @transform_9, window_bounds = array<i64: 256, 256>}, {pipeline_mode = #tpu.pipeline_mode<synchronous>, transform_indices = @transform_10, window_bounds = array<i64: 256, 256>}, {pipeline_mode = #tpu.pipeline_mode<synchronous>, transform_indices = @transform_11, window_bounds = array<i64: 256, 512>}, {pipeline_mode = #tpu.pipeline_mode<synchronous>, transform_indices = @transform_12, window_bounds = array<i64: 512, 256>}, {transform_indices = @transform_13, window_bounds = array<i64: 16, 256>}]} {
    %c0 = arith.constant 0 : index
    %c0_0 = arith.constant 0 : index
    %0 = vector.load %arg1[%c0, %c0_0] : memref<16x256xbf16, #tpu.memory_space<vmem>>, vector<16x256xbf16>
    %c0_1 = arith.constant 0 : index
    %c0_2 = arith.constant 0 : index
    %1 = vector.load %arg2[%c0_1, %c0_2] : memref<256x256xbf16, #tpu.memory_space<vmem>>, vector<256x256xbf16>
    %cst = arith.constant dense<0.000000e+00> : vector<16x256xf32>
    %2 = tpu.matmul %0, %1, %cst {dimension_numbers = #tpu.dot_dimension_numbers<[1], [0], [0], [1], [0, 0, 1, 1], [], []>} : vector<16x256xbf16>, vector<256x256xbf16>, vector<16x256xf32> -> vector<16x256xf32>
    %3 = arith.truncf %2 : vector<16x256xf32> to vector<16x256xbf16>
    %c0_3 = arith.constant 0 : index
    %c0_4 = arith.constant 0 : index
    %4 = vector.load %arg3[%c0_3, %c0_4] : memref<256x256xbf16, #tpu.memory_space<vmem>>, vector<256x256xbf16>
    %cst_5 = arith.constant dense<0.000000e+00> : vector<16x256xf32>
    %5 = tpu.matmul %3, %4, %cst_5 {dimension_numbers = #tpu.dot_dimension_numbers<[1], [0], [0], [1], [0, 0, 1, 1], [], []>} : vector<16x256xbf16>, vector<256x256xbf16>, vector<16x256xf32> -> vector<16x256xf32>
    %6 = arith.truncf %5 : vector<16x256xf32> to vector<16x256xbf16>
    %c0_6 = arith.constant 0 : index
    %c0_7 = arith.constant 0 : index
    %7 = vector.load %arg4[%c0_6, %c0_7] : memref<256x256xbf16, #tpu.memory_space<vmem>>, vector<256x256xbf16>
    %cst_8 = arith.constant dense<0.000000e+00> : vector<16x256xf32>
    %8 = tpu.matmul %6, %7, %cst_8 {dimension_numbers = #tpu.dot_dimension_numbers<[1], [0], [0], [1], [0, 0, 1, 1], [], []>} : vector<16x256xbf16>, vector<256x256xbf16>, vector<16x256xf32> -> vector<16x256xf32>
    %9 = arith.truncf %8 : vector<16x256xf32> to vector<16x256xbf16>
    %c0_9 = arith.constant 0 : index
    %c0_10 = arith.constant 0 : index
    %10 = vector.load %arg5[%c0_9, %c0_10] : memref<256x256xbf16, #tpu.memory_space<vmem>>, vector<256x256xbf16>
    %cst_11 = arith.constant dense<0.000000e+00> : vector<16x256xf32>
    %11 = tpu.matmul %9, %10, %cst_11 {dimension_numbers = #tpu.dot_dimension_numbers<[1], [0], [0], [1], [0, 0, 1, 1], [], []>} : vector<16x256xbf16>, vector<256x256xbf16>, vector<16x256xf32> -> vector<16x256xf32>
    %12 = arith.truncf %11 : vector<16x256xf32> to vector<16x256xbf16>
    %c0_12 = arith.constant 0 : index
    %c0_13 = arith.constant 0 : index
    %13 = vector.load %arg6[%c0_12, %c0_13] : memref<256x512xbf16, #tpu.memory_space<vmem>>, vector<256x512xbf16>
    %cst_14 = arith.constant dense<0.000000e+00> : vector<16x512xf32>
    %14 = tpu.matmul %12, %13, %cst_14 {dimension_numbers = #tpu.dot_dimension_numbers<[1], [0], [0], [1], [0, 0, 1, 1], [], []>} : vector<16x256xbf16>, vector<256x512xbf16>, vector<16x512xf32> -> vector<16x512xf32>
    %15 = arith.truncf %14 : vector<16x512xf32> to vector<16x512xbf16>
    %c0_15 = arith.constant 0 : index
    %c0_16 = arith.constant 0 : index
    %16 = vector.load %arg7[%c0_15, %c0_16] : memref<512x256xbf16, #tpu.memory_space<vmem>>, vector<512x256xbf16>
    %cst_17 = arith.constant dense<0.000000e+00> : vector<16x256xf32>
    %17 = tpu.matmul %15, %16, %cst_17 {dimension_numbers = #tpu.dot_dimension_numbers<[1], [0], [0], [1], [0, 0, 1, 1], [], []>} : vector<16x512xbf16>, vector<512x256xbf16>, vector<16x256xf32> -> vector<16x256xf32>
    %18 = arith.truncf %17 : vector<16x256xf32> to vector<16x256xbf16>
    %c0_18 = arith.constant 0 : index
    %c0_19 = arith.constant 0 : index
    %19 = vector.load %arg8[%c0_18, %c0_19] : memref<256x256xbf16, #tpu.memory_space<vmem>>, vector<256x256xbf16>
    %cst_20 = arith.constant dense<0.000000e+00> : vector<16x256xf32>
    %20 = tpu.matmul %18, %19, %cst_20 {dimension_numbers = #tpu.dot_dimension_numbers<[1], [0], [0], [1], [0, 0, 1, 1], [], []>} : vector<16x256xbf16>, vector<256x256xbf16>, vector<16x256xf32> -> vector<16x256xf32>
    %21 = arith.truncf %20 : vector<16x256xf32> to vector<16x256xbf16>
    %c0_21 = arith.constant 0 : index
    %c0_22 = arith.constant 0 : index
    %22 = vector.load %arg9[%c0_21, %c0_22] : memref<256x256xbf16, #tpu.memory_space<vmem>>, vector<256x256xbf16>
    %cst_23 = arith.constant dense<0.000000e+00> : vector<16x256xf32>
    %23 = tpu.matmul %21, %22, %cst_23 {dimension_numbers = #tpu.dot_dimension_numbers<[1], [0], [0], [1], [0, 0, 1, 1], [], []>} : vector<16x256xbf16>, vector<256x256xbf16>, vector<16x256xf32> -> vector<16x256xf32>
    %24 = arith.truncf %23 : vector<16x256xf32> to vector<16x256xbf16>
    %c0_24 = arith.constant 0 : index
    %c0_25 = arith.constant 0 : index
    %25 = vector.load %arg10[%c0_24, %c0_25] : memref<256x256xbf16, #tpu.memory_space<vmem>>, vector<256x256xbf16>
    %cst_26 = arith.constant dense<0.000000e+00> : vector<16x256xf32>
    %26 = tpu.matmul %24, %25, %cst_26 {dimension_numbers = #tpu.dot_dimension_numbers<[1], [0], [0], [1], [0, 0, 1, 1], [], []>} : vector<16x256xbf16>, vector<256x256xbf16>, vector<16x256xf32> -> vector<16x256xf32>
    %27 = arith.truncf %26 : vector<16x256xf32> to vector<16x256xbf16>
    %c0_27 = arith.constant 0 : index
    %c0_28 = arith.constant 0 : index
    %28 = vector.load %arg11[%c0_27, %c0_28] : memref<256x256xbf16, #tpu.memory_space<vmem>>, vector<256x256xbf16>
    %cst_29 = arith.constant dense<0.000000e+00> : vector<16x256xf32>
    %29 = tpu.matmul %27, %28, %cst_29 {dimension_numbers = #tpu.dot_dimension_numbers<[1], [0], [0], [1], [0, 0, 1, 1], [], []>} : vector<16x256xbf16>, vector<256x256xbf16>, vector<16x256xf32> -> vector<16x256xf32>
    %30 = arith.truncf %29 : vector<16x256xf32> to vector<16x256xbf16>
    %c0_30 = arith.constant 0 : index
    %c0_31 = arith.constant 0 : index
    %31 = vector.load %arg12[%c0_30, %c0_31] : memref<256x512xbf16, #tpu.memory_space<vmem>>, vector<256x512xbf16>
    %cst_32 = arith.constant dense<0.000000e+00> : vector<16x512xf32>
    %32 = tpu.matmul %30, %31, %cst_32 {dimension_numbers = #tpu.dot_dimension_numbers<[1], [0], [0], [1], [0, 0, 1, 1], [], []>} : vector<16x256xbf16>, vector<256x512xbf16>, vector<16x512xf32> -> vector<16x512xf32>
    %33 = arith.truncf %32 : vector<16x512xf32> to vector<16x512xbf16>
    %c0_33 = arith.constant 0 : index
    %c0_34 = arith.constant 0 : index
    %34 = vector.load %arg13[%c0_33, %c0_34] : memref<512x256xbf16, #tpu.memory_space<vmem>>, vector<512x256xbf16>
    %cst_35 = arith.constant dense<0.000000e+00> : vector<16x256xf32>
    %35 = tpu.matmul %33, %34, %cst_35 {dimension_numbers = #tpu.dot_dimension_numbers<[1], [0], [0], [1], [0, 0, 1, 1], [], []>} : vector<16x512xbf16>, vector<512x256xbf16>, vector<16x256xf32> -> vector<16x256xf32>
    %c0_36 = arith.constant 0 : index
    %c0_37 = arith.constant 0 : index
    %36 = vector.load %arg14[%c0_36, %c0_37] : memref<16x256xf32, #tpu.memory_space<vmem>>, vector<16x256xf32>
    tpu.vector_store %arg14[%c0_36, %c0_37], %35 {strides = array<i32>} : memref<16x256xf32, #tpu.memory_space<vmem>>, vector<16x256xf32>,
    return
  }
  func.func @transform_0(%arg0: i32) -> (i32, i32) {
    %c0_i32 = arith.constant 0 : i32
    %c0_i32_0 = arith.constant 0 : i32
    return %arg0, %c0_i32 : i32, i32
  }
  func.func @transform_1(%arg0: i32) -> (i32, i32) {
    %c0_i32 = arith.constant 0 : i32
    %c0_i32_0 = arith.constant 0 : i32
    %c0_i32_1 = arith.constant 0 : i32
    return %c0_i32, %c0_i32_0 : i32, i32
  }
  func.func @transform_2(%arg0: i32) -> (i32, i32) {
    %c0_i32 = arith.constant 0 : i32
    %c0_i32_0 = arith.constant 0 : i32
    %c0_i32_1 = arith.constant 0 : i32
    return %c0_i32, %c0_i32_0 : i32, i32
  }
  func.func @transform_3(%arg0: i32) -> (i32, i32) {
    %c0_i32 = arith.constant 0 : i32
    %c0_i32_0 = arith.constant 0 : i32
    %c0_i32_1 = arith.constant 0 : i32
    return %c0_i32, %c0_i32_0 : i32, i32
  }
  func.func @transform_4(%arg0: i32) -> (i32, i32) {
    %c0_i32 = arith.constant 0 : i32
    %c0_i32_0 = arith.constant 0 : i32
    %c0_i32_1 = arith.constant 0 : i32
    return %c0_i32, %c0_i32_0 : i32, i32
  }
  func.func @transform_5(%arg0: i32) -> (i32, i32) {
    %c0_i32 = arith.constant 0 : i32
    %c0_i32_0 = arith.constant 0 : i32
    %c0_i32_1 = arith.constant 0 : i32
    return %c0_i32, %c0_i32_0 : i32, i32
  }
  func.func @transform_6(%arg0: i32) -> (i32, i32) {
    %c0_i32 = arith.constant 0 : i32
    %c0_i32_0 = arith.constant 0 : i32
    %c0_i32_1 = arith.constant 0 : i32
    return %c0_i32, %c0_i32_0 : i32, i32
  }
  func.func @transform_7(%arg0: i32) -> (i32, i32) {
    %c0_i32 = arith.constant 0 : i32
    %c0_i32_0 = arith.constant 0 : i32
    %c0_i32_1 = arith.constant 0 : i32
    return %c0_i32, %c0_i32_0 : i32, i32
  }
  func.func @transform_8(%arg0: i32) -> (i32, i32) {
    %c0_i32 = arith.constant 0 : i32
    %c0_i32_0 = arith.constant 0 : i32
    %c0_i32_1 = arith.constant 0 : i32
    return %c0_i32, %c0_i32_0 : i32, i32
  }
  func.func @transform_9(%arg0: i32) -> (i32, i32) {
    %c0_i32 = arith.constant 0 : i32
    %c0_i32_0 = arith.constant 0 : i32
    %c0_i32_1 = arith.constant 0 : i32
    return %c0_i32, %c0_i32_0 : i32, i32
  }
  func.func @transform_10(%arg0: i32) -> (i32, i32) {
    %c0_i32 = arith.constant 0 : i32
    %c0_i32_0 = arith.constant 0 : i32
    %c0_i32_1 = arith.constant 0 : i32
    return %c0_i32, %c0_i32_0 : i32, i32
  }
  func.func @transform_11(%arg0: i32) -> (i32, i32) {
    %c0_i32 = arith.constant 0 : i32
    %c0_i32_0 = arith.constant 0 : i32
    %c0_i32_1 = arith.constant 0 : i32
    return %c0_i32, %c0_i32_0 : i32, i32
  }
  func.func @transform_12(%arg0: i32) -> (i32, i32) {
    %c0_i32 = arith.constant 0 : i32
    %c0_i32_0 = arith.constant 0 : i32
    %c0_i32_1 = arith.constant 0 : i32
    return %c0_i32, %c0_i32_0 : i32, i32
  }
  func.func @transform_13(%arg0: i32) -> (i32, i32) {
    %c0_i32 = arith.constant 0 : i32
    %c0_i32_0 = arith.constant 0 : i32
    return %arg0, %c0_i32 : i32, i32
  }
}

</mosaic_0001>

<bundles_post_ra>
// kernel: tpu_custom_call.1
= control target key start
LH: loop header
LB: loop body
LE: loop exit
PB: predicated region body
PF: predicated region fallthrough
CT: control target
= control target key end

     0   :  { %18 = vsyncpa [#allocation3], 0  ;;  %s5817_s0 = inlined_call_operand.hbm [shape: bf16[16,256], index: 0, kind: input, shape index: {}]   ;;  %s5818_s1 = inlined_call_operand.hbm [shape: bf16[256,256], index: 1, kind: input, shape index: {}]   ;;  %s5819_s2 = inlined_call_operand.hbm [shape: bf16[256,256], index: 2, kind: input, shape index: {}]   ;;  %s5820_s3 = inlined_call_operand.hbm [shape: bf16[256,256], index: 3, kind: input, shape index: {}]   ;;  %s5821_s4 = inlined_call_operand.hbm [shape: bf16[256,256], index: 4, kind: input, shape index: {}]   ;;  %s5822_s5 = inlined_call_operand.hbm [shape: bf16[256,512], index: 5, kind: input, shape index: {}]   ;;  %s5823_s6 = inlined_call_operand.hbm [shape: bf16[512,256], index: 6, kind: input, shape index: {}]   ;;  %s5824_s7 = inlined_call_operand.hbm [shape: bf16[256,256], index: 7, kind: input, shape index: {}]   ;;  %s5825_s8 = inlined_call_operand.hbm [shape: bf16[256,256], index: 8, kind: input, shape index: {}]   ;;  %s5826_s9 = inlined_call_operand.hbm [shape: bf16[256,256], index: 9, kind: input, shape index: {}]   ;;  %s5827_s10 = inlined_call_operand.hbm [shape: bf16[256,256], index: 10, kind: input, shape index: {}]   ;;  %s5828_s11 = inlined_call_operand.hbm [shape: bf16[256,512], index: 11, kind: input, shape index: {}]   ;;  %s5829_s12 = inlined_call_operand.hbm [shape: bf16[512,256], index: 12, kind: input, shape index: {}]   ;;  %s5830_s13 = inlined_call_operand.hbm [shape: f32[16,256], index: 13, kind: output, shape index: {}]  }
   0x1   :  { %19 = vsyncpa [#allocation6], 0 }
   0x2   :  { %20 = vsyncpa [#allocation9], 0 }
   0x3   :  { %21 = vsyncpa [#allocation12], 0 }
   0x4   :  { %22 = vsyncpa [#allocation15], 0 }
   0x5   :  { %23 = vsyncpa [#allocation18], 0 }
   0x6   :  { %24 = vsyncpa [#allocation21], 0 }
   0x7   :  { %25 = vsyncpa [#allocation4], 0  ;;  %s5645_s25 = smov [#allocation5]   ;;  %s5646_s27 = smov [#allocation8]  }
   0x8   :  { %s43_s26 = sshll.u32 %s5645_s25, 4  ;;  %s67_s28 = sshll.u32 %s5646_s27, 4  ;;  %s44_s26 = int_to_ptr.vmem [resolvable:$true] %s43_s26  ;;  %s68_s28 = int_to_ptr.vmem [resolvable:$true] %s67_s28 }
   0x9   :  { %s5357_s29 = scalar_lea.vmem %s44_s26, 4096  ;;  %p5362_p1 = scmp.lt.s32.totalorder %s44_s26, %s44_s26 }
   0xa   :  { %p5358_p0 = scmp.ne.s32.totalorder %s44_s26, %s5357_s29  ;;  %p5363_p2 = scmp.lt.s32.totalorder %s5357_s29, %s5357_s29 }
   0xc   :  { %p5364_p3 = por %p5363_p2, %p5362_p1 }
   0xe   :  { %p5365_p4 = pnand %p5364_p3, %p5358_p0 }
  0x10   :  { %5368 = shalt.err (!%p5365_p4)
}
  0x11   :  { %s5647_s30 = smov 128   ;;  %s5648_s14 = smov 8  }
  0x12   :  { %49 = dma.hbm_to_vmem [thread:$0]  %s5818_s1, 4096, %s44_s26, [#allocation6], %s5647_s30, %s5647_s30, %s5648_s14  }
  0x13   :  { %s5377_s17 = scalar_lea.vmem %s68_s28, 4096  ;;  %p5382_p6 = scmp.lt.s32.totalorder %s68_s28, %s68_s28 }
  0x14   :  { %p5378_p5 = scmp.ne.s32.totalorder %s68_s28, %s5377_s17  ;;  %p5383_p7 = scmp.lt.s32.totalorder %s5377_s17, %s5377_s17 }
  0x16   :  { %p5384_p8 = por %p5383_p7, %p5382_p6 }
  0x18   :  { %p5385_p9 = pnand %p5384_p8, %p5378_p5 }
  0x1a   :  { %5388 = shalt.err (!%p5385_p9)
}
  0x1b   :  { %73 = dma.hbm_to_vmem [thread:$0]  %s5820_s3, 4096, %s68_s28, [#allocation9], %s5647_s30, %s5647_s30, %s5648_s14  }
  0x1c   :  { %s5649_s20 = smov [#allocation11]  }
  0x1d   :  { %s91_s21 = sshll.u32 %s5649_s20, 4  ;;  %s92_s21 = int_to_ptr.vmem [resolvable:$true] %s91_s21 }
  0x1e   :  { %s5397_s22 = scalar_lea.vmem %s92_s21, 8192  ;;  %p5402_p11 = scmp.lt.s32.totalorder %s92_s21, %s92_s21 }
  0x1f   :  { %p5398_p10 = scmp.ne.s32.totalorder %s92_s21, %s5397_s22  ;;  %p5403_p12 = scmp.lt.s32.totalorder %s5397_s22, %s5397_s22 }
  0x21   :  { %p5404_p13 = por %p5403_p12, %p5402_p11 }
  0x23   :  { %p5405_p0 = pnand %p5404_p13, %p5398_p10 }
  0x25   :  { %5408 = shalt.err (!%p5405_p0)
}
  0x26   :  { %s5650_s1 = smov 256   ;;  %s5651_s23 = smov 16  }
  0x27   :  { %97 = dma.hbm_to_vmem [thread:$0]  %s5822_s5, 8192, %s92_s21, [#allocation12], %s5650_s1, %s5650_s1, %s5651_s23  }
  0x28   :  { %s5652_s3 = smov [#allocation14]   ;;  %s5653_s27 = smov [#allocation17]  }
  0x29   :  { %s115_s26 = sshll.u32 %s5652_s3, 4  ;;  %s139_s28 = sshll.u32 %s5653_s27, 4  ;;  %s116_s26 = int_to_ptr.vmem [resolvable:$true] %s115_s26  ;;  %s140_s28 = int_to_ptr.vmem [resolvable:$true] %s139_s28 }
  0x2a   :  { %s5417_s29 = scalar_lea.vmem %s116_s26, 4096  ;;  %p5422_p2 = scmp.lt.s32.totalorder %s116_s26, %s116_s26 }
  0x2b   :  { %p5418_p1 = scmp.ne.s32.totalorder %s116_s26, %s5417_s29  ;;  %p5423_p3 = scmp.lt.s32.totalorder %s5417_s29, %s5417_s29 }
  0x2d   :  { %p5424_p4 = por %p5423_p3, %p5422_p2 }
  0x2f   :  { %p5425_p5 = pnand %p5424_p4, %p5418_p1 }
  0x31   :  { %5428 = shalt.err (!%p5425_p5)
}
  0x32   :  { %121 = dma.hbm_to_vmem [thread:$0]  %s5824_s7, 4096, %s116_s26, [#allocation15], %s5647_s30, %s5647_s30, %s5648_s14  }
  0x33   :  { %s5437_s5 = scalar_lea.vmem %s140_s28, 4096  ;;  %p5442_p7 = scmp.lt.s32.totalorder %s140_s28, %s140_s28 }
  0x34   :  { %p5438_p6 = scmp.ne.s32.totalorder %s140_s28, %s5437_s5  ;;  %p5443_p8 = scmp.lt.s32.totalorder %s5437_s5, %s5437_s5 }
  0x36   :  { %p5444_p9 = por %p5443_p8, %p5442_p7 }
  0x38   :  { %p5445_p10 = pnand %p5444_p9, %p5438_p6 }
  0x3a   :  { %5448 = shalt.err (!%p5445_p10)
}
  0x3b   :  { %145 = dma.hbm_to_vmem [thread:$0]  %s5826_s9, 4096, %s140_s28, [#allocation18], %s5647_s30, %s5647_s30, %s5648_s14  }
  0x3c   :  { %s5654_s19 = smov [#allocation20]   ;;  %s5655_s21 = smov [#allocation2]  }
  0x3d   :  { %s163_s20 = sshll.u32 %s5654_s19, 4  ;;  %s31_s7 = sshll.u32 %s5655_s21, 4  ;;  %s164_s20 = int_to_ptr.vmem [resolvable:$true] %s163_s20  ;;  %s32_s7 = int_to_ptr.vmem [resolvable:$true] %s31_s7 }
  0x3e   :  { %s5457_s22 = scalar_lea.vmem %s164_s20, 8192  ;;  %p5462_p12 = scmp.lt.s32.totalorder %s164_s20, %s164_s20 }
  0x3f   :  { %p5458_p11 = scmp.ne.s32.totalorder %s164_s20, %s5457_s22  ;;  %p5463_p13 = scmp.lt.s32.totalorder %s5457_s22, %s5457_s22 }
  0x41   :  { %p5464_p0 = por %p5463_p13, %p5462_p12 }
  0x43   :  { %p5465_p1 = pnand %p5464_p0, %p5458_p11 }
  0x45   :  { %5468 = shalt.err (!%p5465_p1)
}
  0x46   :  { %169 = dma.hbm_to_vmem [thread:$0]  %s5828_s11, 8192, %s164_s20, [#allocation21], %s5650_s1, %s5650_s1, %s5651_s23  }
  0x47   :  { %s5477_s9 = scalar_lea.vmem %s32_s7, 256  ;;  %p5482_p3 = scmp.lt.s32.totalorder %s32_s7, %s32_s7 }
  0x48   :  { %p5478_p2 = scmp.ne.s32.totalorder %s32_s7, %s5477_s9  ;;  %p5483_p4 = scmp.lt.s32.totalorder %s5477_s9, %s5477_s9 }
  0x4a   :  { %p5484_p5 = por %p5483_p4, %p5482_p3 }
  0x4c   :  { %p5485_p6 = pnand %p5484_p5, %p5478_p2 }
  0x4e   :  { %5488 = shalt.err (!%p5485_p6)
}
  0x4f   :  { %37 = dma.hbm_to_vmem [thread:$0]  %s5817_s0, 256, %s32_s7, [#allocation3], %s5647_s30, %s5647_s30, %s5648_s14  }
  0x50   :  { %s5656_s27 = smov [#allocation7]   ;;  %s5657_s29 = smov [#allocation10]  }
  0x51   :  { %s55_s28 = sshll.u32 %s5656_s27, 4  ;;  %s79_s11 = sshll.u32 %s5657_s29, 4  ;;  %s56_s28 = int_to_ptr.vmem [resolvable:$true] %s55_s28  ;;  %s80_s11 = int_to_ptr.vmem [resolvable:$true] %s79_s11 }
  0x52   :  { %s5497_s15 = scalar_lea.vmem %s56_s28, 4096  ;;  %p5502_p8 = scmp.lt.s32.totalorder %s56_s28, %s56_s28 }
  0x53   :  { %p5498_p7 = scmp.ne.s32.totalorder %s56_s28, %s5497_s15  ;;  %p5503_p9 = scmp.lt.s32.totalorder %s5497_s15, %s5497_s15 }
  0x55   :  { %p5504_p10 = por %p5503_p9, %p5502_p8 }
  0x57   :  { %p5505_p11 = pnand %p5504_p10, %p5498_p7 }
  0x59   :  { %5508 = shalt.err (!%p5505_p11)
}
  0x5a   :  { %61 = dma.hbm_to_vmem [thread:$0]  %s5819_s2, 4096, %s56_s28, [#allocation6], %s5647_s30, %s5647_s30, %s5648_s14  }
  0x5b   :  { %s5517_s0 = scalar_lea.vmem %s80_s11, 4096  ;;  %p5522_p13 = scmp.lt.s32.totalorder %s80_s11, %s80_s11 }
  0x5c   :  { %p5518_p12 = scmp.ne.s32.totalorder %s80_s11, %s5517_s0  ;;  %p5523_p0 = scmp.lt.s32.totalorder %s5517_s0, %s5517_s0 }
  0x5e   :  { %p5524_p1 = por %p5523_p0, %p5522_p13 }
  0x60   :  { %p5525_p2 = pnand %p5524_p1, %p5518_p12 }
  0x62   :  { %5528 = shalt.err (!%p5525_p2)
}
  0x63   :  { %85 = dma.hbm_to_vmem [thread:$0]  %s5821_s4, 4096, %s80_s11, [#allocation9], %s5647_s30, %s5647_s30, %s5648_s14  }
  0x64   :  { %s5658_s19 = smov [#allocation13]   ;;  %s5659_s21 = smov [#allocation16]  }
  0x65   :  { %s103_s20 = sshll.u32 %s5658_s19, 4  ;;  %s127_s2 = sshll.u32 %s5659_s21, 4  ;;  %s104_s20 = int_to_ptr.vmem [resolvable:$true] %s103_s20  ;;  %s128_s2 = int_to_ptr.vmem [resolvable:$true] %s127_s2 }
  0x66   :  { %s5537_s7 = scalar_lea.vmem %s104_s20, 8192  ;;  %p5542_p4 = scmp.lt.s32.totalorder %s104_s20, %s104_s20 }
  0x67   :  { %p5538_p3 = scmp.ne.s32.totalorder %s104_s20, %s5537_s7  ;;  %p5543_p5 = scmp.lt.s32.totalorder %s5537_s7, %s5537_s7 }
  0x69   :  { %p5544_p6 = por %p5543_p5, %p5542_p4 }
  0x6b   :  { %p5545_p7 = pnand %p5544_p6, %p5538_p3 }
  0x6d   :  { %5548 = shalt.err (!%p5545_p7)
}
  0x6e   :  { %109 = dma.hbm_to_vmem [thread:$0]  %s5823_s6, 8192, %s104_s20, [#allocation12], %s5647_s30, %s5647_s30, %s5648_s14  }
  0x6f   :  { %s5557_s4 = scalar_lea.vmem %s128_s2, 4096  ;;  %p5562_p9 = scmp.lt.s32.totalorder %s128_s2, %s128_s2 }
  0x70   :  { %p5558_p8 = scmp.ne.s32.totalorder %s128_s2, %s5557_s4  ;;  %p5563_p10 = scmp.lt.s32.totalorder %s5557_s4, %s5557_s4 }
  0x72   :  { %p5564_p11 = por %p5563_p10, %p5562_p9 }
  0x74   :  { %p5565_p12 = pnand %p5564_p11, %p5558_p8 }
  0x76   :  { %5568 = shalt.err (!%p5565_p12)
}
  0x77   :  { %133 = dma.hbm_to_vmem [thread:$0]  %s5825_s8, 4096, %s128_s2, [#allocation15], %s5647_s30, %s5647_s30, %s5648_s14  }
  0x78   :  { %s5660_s3 = smov [#allocation19]   ;;  %s5661_s27 = smov [#allocation22]  }
  0x79   :  { %s151_s26 = sshll.u32 %s5660_s3, 4  ;;  %s175_s6 = sshll.u32 %s5661_s27, 4  ;;  %s152_s26 = int_to_ptr.vmem [resolvable:$true] %s151_s26  ;;  %s176_s6 = int_to_ptr.vmem [resolvable:$true] %s175_s6 }
  0x7a   :  { %s5577_s28 = scalar_lea.vmem %s152_s26, 4096  ;;  %p5582_p0 = scmp.lt.s32.totalorder %s152_s26, %s152_s26 }
  0x7b   :  { %p5578_p13 = scmp.ne.s32.totalorder %s152_s26, %s5577_s28  ;;  %p5583_p1 = scmp.lt.s32.totalorder %s5577_s28, %s5577_s28 }
  0x7d   :  { %p5584_p2 = por %p5583_p1, %p5582_p0 }
  0x7f   :  { %p5585_p3 = pnand %p5584_p2, %p5578_p13 }
  0x81   :  { %5588 = shalt.err (!%p5585_p3)
}
  0x82   :  { %157 = dma.hbm_to_vmem [thread:$0]  %s5827_s10, 4096, %s152_s26, [#allocation18], %s5647_s30, %s5647_s30, %s5648_s14  }
  0x83   :  { %s5597_s8 = scalar_lea.vmem %s176_s6, 8192  ;;  %p5602_p5 = scmp.lt.s32.totalorder %s176_s6, %s176_s6 }
  0x84   :  { %p5598_p4 = scmp.ne.s32.totalorder %s176_s6, %s5597_s8  ;;  %p5603_p6 = scmp.lt.s32.totalorder %s5597_s8, %s5597_s8 }
  0x86   :  { %p5604_p7 = por %p5603_p6, %p5602_p5 }
  0x88   :  { %p5605_p8 = pnand %p5604_p7, %p5598_p4 }
  0x8a   :  { %5608 = shalt.err (!%p5605_p8)
}
  0x8b   :  { %181 = dma.hbm_to_vmem [thread:$0]  %s5829_s12, 8192, %s176_s6, [#allocation21], %s5647_s30, %s5647_s30, %s5648_s14  }
  0x8c   :  { %5629 = dma.done.wait [#allocation3], 256  }
  0x8d   :  { %5630 = vsyncadd [#allocation3], 4294967040 }
  0x8e   :  { %5631 = dma.done.wait [#allocation6], 8192  }
  0x8f   :  { %5632 = vsyncadd [#allocation6], 4294959104 }
  0x90   :  { %5633 = dma.done.wait [#allocation9], 8192  }
  0x91   :  { %5634 = vsyncadd [#allocation9], 4294959104 }
  0x92   :  { %5635 = dma.done.wait [#allocation12], 16384  }
  0x93   :  { %5636 = vsyncadd [#allocation12], 4294950912 }
  0x94   :  { %5637 = dma.done.wait [#allocation15], 8192  }
  0x95   :  { %5638 = vsyncadd [#allocation15], 4294959104 }
  0x96   :  { %5639 = dma.done.wait [#allocation18], 8192  }
  0x97   :  { %5640 = vsyncadd [#allocation18], 4294959104 }
  0x98   :  { %5641 = dma.done.wait [#allocation21], 16384  }
  0x99   :  { %5642 = vsyncadd [#allocation21], 4294950912  ;;  %v4578_v0 = vld [vmem:[#allocation5 + $0x74] ss:$8 sps:$4 sm:$0xff]   ;;  %v4580_v1 = vld [vmem:[#allocation5 + $0x70] ss:$8 sps:$4 sm:$0xff]  }
  0x9a   :  { %425 = vmatprep.subr.bf16.mxu0 %v4578_v0  ;;  %v4581_v2 = vld [vmem:[#allocation5 + $0x64] ss:$8 sps:$4 sm:$0xff]   ;;  %v4583_v3 = vld [vmem:[#allocation5 + $0x60] ss:$8 sps:$4 sm:$0xff]   ;;  %v4584_v4 = vld [vmem:[#allocation5 + $0x54] ss:$8 sps:$4 sm:$0xff]  }
  0x9b   :  { %426 = vmatpush1.bf16.msra.mxu0 %v4580_v1  ;;  %v4586_v5 = vld [vmem:[#allocation5 + $0x50] ss:$8 sps:$4 sm:$0xff]   ;;  %v4587_v6 = vld [vmem:[#allocation5 + $0x44] ss:$8 sps:$4 sm:$0xff]   ;;  %v4589_v7 = vld [vmem:[#allocation5 + $0x40] ss:$8 sps:$4 sm:$0xff]  }
  0x9c   :  { %427 = vmatprep.subr.bf16.mxu0 %v4581_v2  ;;  %v4590_v8 = vld [vmem:[#allocation5 + $0x34] ss:$8 sps:$4 sm:$0xff]   ;;  %v4592_v9 = vld [vmem:[#allocation5 + $0x30] ss:$8 sps:$4 sm:$0xff]   ;;  %v4593_v10 = vld [vmem:[#allocation5 + $0x24] ss:$8 sps:$4 sm:$0xff]  }
  0x9d   :  { %v4595_v11 = vld [vmem:[#allocation5 + $0x20] ss:$8 sps:$4 sm:$0xff]   ;;  %v4596_v12 = vld [vmem:[#allocation5 + $0x14] ss:$8 sps:$4 sm:$0xff]   ;;  %v4598_v13 = vld [vmem:[#allocation5 + $0x10] ss:$8 sps:$4 sm:$0xff]  }
  0x9e   :  { %v4599_v14 = vld [vmem:[#allocation5 + $0x4] ss:$8 sps:$4 sm:$0xff]   ;;  %v4628_v15 = vld [vmem:[#allocation2 + $0x4] ss:$8 sps:$4 sm:$0xff]   ;;  %v4631_v17 = vld [vmem:[#allocation7 + $0x70] ss:$8 sps:$4 sm:$0xff]  }
  0x9f   :  { %428 = vmatpush1.bf16.msra.mxu0 %v4583_v3  ;;  %v4629_v16 = vld [vmem:[#allocation7 + $0x74] ss:$8 sps:$4 sm:$0xff]   ;;  %457 = vmatprep.mubr.bf16.mxu0 %v4628_v15  ;;  %v4632_v18 = vld [vmem:[#allocation7 + $0x64] ss:$8 sps:$4 sm:$0xff]   ;;  %v4634_v19 = vld [vmem:[#allocation7 + $0x60] ss:$8 sps:$4 sm:$0xff]  }
  0xa0   :  { %429 = vmatprep.subr.bf16.mxu0 %v4584_v4  ;;  %662 = vmatprep.subr.bf16.mxu1 %v4629_v16  ;;  %v4601_v20 = vld [vmem:[#allocation5] ss:$8 sps:$4 sm:$0xff]   ;;  %v4635_v21 = vld [vmem:[#allocation7 + $0x54] ss:$8 sps:$4 sm:$0xff]   ;;  %v4637_v23 = vld [vmem:[#allocation7 + $0x50] ss:$8 sps:$4 sm:$0xff]  }
  0xa1   :  { %663 = vmatpush1.bf16.msra.mxu1 %v4631_v17  ;;  %v4602_v22 = vld [vmem:[#allocation5 + $0xf4] ss:$8 sps:$4 sm:$0xff]   ;;  %v4604_v24 = vld [vmem:[#allocation5 + $0xf0] ss:$8 sps:$4 sm:$0xff]   ;;  %v4638_v25 = vld [vmem:[#allocation7 + $0x44] ss:$8 sps:$4 sm:$0xff]  }
  0xa2   :  { %664 = vmatprep.subr.bf16.mxu1 %v4632_v18  ;;  %v4605_v26 = vld [vmem:[#allocation5 + $0xe4] ss:$8 sps:$4 sm:$0xff]   ;;  %v4640_v27 = vld [vmem:[#allocation7 + $0x40] ss:$8 sps:$4 sm:$0xff]   ;;  %v4641_v29 = vld [vmem:[#allocation7 + $0x34] ss:$8 sps:$4 sm:$0xff]  }
  0xa3   :  { %430 = vmatpush1.bf16.msra.mxu0 %v4586_v5  ;;  %v4607_v28 = vld [vmem:[#allocation5 + $0xe0] ss:$8 sps:$4 sm:$0xff]   ;;  %v4608_v30 = vld [vmem:[#allocation5 + $0xd4] ss:$8 sps:$4 sm:$0xff]   ;;  %v4610_v31 = vld [vmem:[#allocation5 + $0xd0] ss:$8 sps:$4 sm:$0xff]  }
  0xa4   :  { %431 = vmatprep.subr.bf16.mxu0 %v4587_v6  ;;  %v4643_v32 = vld [vmem:[#allocation7 + $0x30] ss:$8 sps:$4 sm:$0xff]   ;;  %v4611_v33 = vld [vmem:[#allocation5 + $0xc4] ss:$8 sps:$4 sm:$0xff]   ;;  %v4646_v35 = vld [vmem:[#allocation7 + $0x20] ss:$8 sps:$4 sm:$0xff]  }
  0xa5   :  { %665 = vmatpush1.bf16.msra.mxu1 %v4634_v19  ;;  %v4644_v34 = vld [vmem:[#allocation7 + $0x24] ss:$8 sps:$4 sm:$0xff]   ;;  %v4613_v36 = vld [vmem:[#allocation5 + $0xc0] ss:$8 sps:$4 sm:$0xff]   ;;  %v4647_v37 = vld [vmem:[#allocation7 + $0x14] ss:$8 sps:$4 sm:$0xff]  }
  0xa6   :  { %666 = vmatprep.subr.bf16.mxu1 %v4635_v21  ;;  %v4614_v38 = vld [vmem:[#allocation5 + $0xb4] ss:$8 sps:$4 sm:$0xff]   ;;  %v4649_v39 = vld [vmem:[#allocation7 + $0x10] ss:$8 sps:$4 sm:$0xff]   ;;  %v4650_v41 = vld [vmem:[#allocation7 + $0x4] ss:$8 sps:$4 sm:$0xff]  }
  0xa7   :  { %432 = vmatpush1.bf16.msra.mxu0 %v4589_v7  ;;  %v4616_v40 = vld [vmem:[#allocation5 + $0xb0] ss:$8 sps:$4 sm:$0xff]   ;;  %v4617_v42 = vld [vmem:[#allocation5 + $0xa4] ss:$8 sps:$4 sm:$0xff]   ;;  %v4652_v43 = vld [vmem:[#allocation7] ss:$8 sps:$4 sm:$0xff]  }
  0xa8   :  { %433 = vmatprep.subr.bf16.mxu0 %v4590_v8  ;;  %v4619_v44 = vld [vmem:[#allocation5 + $0xa0] ss:$8 sps:$4 sm:$0xff]   ;;  %v4653_v45 = vld [vmem:[#allocation7 + $0xf4] ss:$8 sps:$4 sm:$0xff]   ;;  %v4655_v47 = vld [vmem:[#allocation7 + $0xf0] ss:$8 sps:$4 sm:$0xff]  }
  0xa9   :  { %667 = vmatpush1.bf16.msra.mxu1 %v4637_v23  ;;  %v4620_v46 = vld [vmem:[#allocation5 + $0x94] ss:$8 sps:$4 sm:$0xff]   ;;  %v4622_v48 = vld [vmem:[#allocation5 + $0x90] ss:$8 sps:$4 sm:$0xff]   ;;  %v4656_v49 = vld [vmem:[#allocation7 + $0xe4] ss:$8 sps:$4 sm:$0xff]  }
  0xaa   :  { %668 = vmatprep.subr.bf16.mxu1 %v4638_v25  ;;  %v4623_v50 = vld [vmem:[#allocation5 + $0x84] ss:$8 sps:$4 sm:$0xff]   ;;  %v4658_v51 = vld [vmem:[#allocation7 + $0xe0] ss:$8 sps:$4 sm:$0xff]   ;;  %v4659_v53 = vld [vmem:[#allocation7 + $0xd4] ss:$8 sps:$4 sm:$0xff]  }
  0xab   :  { %434 = vmatpush1.bf16.msra.mxu0 %v4592_v9  ;;  %v4625_v52 = vld [vmem:[#allocation5 + $0x80] ss:$8 sps:$4 sm:$0xff]   ;;  %v4626_v54 = vld [vmem:[#allocation2] ss:$8 sps:$4 sm:$0xff]   ;;  %v4662_v56 = vld [vmem:[#allocation7 + $0xc4] ss:$8 sps:$4 sm:$0xff]  }
  0xac   :  { %435 = vmatprep.subr.bf16.mxu0 %v4593_v10  ;;  %v4661_v55 = vld [vmem:[#allocation7 + $0xd0] ss:$8 sps:$4 sm:$0xff]   ;;  %v4664_v57 = vld [vmem:[#allocation7 + $0xc0] ss:$8 sps:$4 sm:$0xff]   ;;  %v4665_v58 = vld [vmem:[#allocation7 + $0xb4] ss:$8 sps:$4 sm:$0xff]  }
  0xad   :  { %669 = vmatpush1.bf16.msra.mxu1 %v4640_v27  ;;  %v4667_v59 = vld [vmem:[#allocation7 + $0xb0] ss:$8 sps:$4 sm:$0xff]   ;;  %v4668_v60 = vld [vmem:[#allocation7 + $0xa4] ss:$8 sps:$4 sm:$0xff]   ;;  %v4670_v61 = vld [vmem:[#allocation7 + $0xa0] ss:$8 sps:$4 sm:$0xff]  }
  0xae   :  { %670 = vmatprep.subr.bf16.mxu1 %v4641_v29  ;;  %v4671_v62 = vld [vmem:[#allocation7 + $0x94] ss:$8 sps:$4 sm:$0xff]   ;;  %v4673_v63 = vld [vmem:[#allocation7 + $0x90] ss:$8 sps:$4 sm:$0xff]   ;;  %v4674_v0 = vld [vmem:[#allocation7 + $0x84] ss:$8 sps:$4 sm:$0xff]  }
  0xaf   :  { %436 = vmatpush1.bf16.msra.mxu0 %v4595_v11  ;;  %v4676_v1 = vld [vmem:[#allocation7 + $0x80] ss:$8 sps:$4 sm:$0xff]   ;;  %v4677_v2 = vld [vmem:[#allocation8 + $0x70] ss:$8 sps:$4 sm:$0xff]   ;;  %v4679_v3 = vld [vmem:[#allocation8 + $0x74] ss:$8 sps:$4 sm:$0xff]  }
  0xb0   :  { %437 = vmatprep.subr.bf16.mxu0 %v4596_v12  ;;  %v4682_v4 = vld [vmem:[#allocation8 + $0x64] ss:$8 sps:$4 sm:$0xff]   ;;  %v4680_v5 = vld [vmem:[#allocation8 + $0x60] ss:$8 sps:$4 sm:$0xff]   ;;  %v4685_v6 = vld [vmem:[#allocation8 + $0x54] ss:$8 sps:$4 sm:$0xff]  }
  0xb1   :  { %671 = vmatpush1.bf16.msra.mxu1 %v4643_v32  ;;  %v4683_v7 = vld [vmem:[#allocation8 + $0x50] ss:$8 sps:$4 sm:$0xff]   ;;  %v4688_v8 = vld [vmem:[#allocation8 + $0x44] ss:$8 sps:$4 sm:$0xff]   ;;  %v4686_v9 = vld [vmem:[#allocation8 + $0x40] ss:$8 sps:$4 sm:$0xff]  }
  0xb2   :  { %672 = vmatprep.subr.bf16.mxu1 %v4644_v34  ;;  %v4691_v10 = vld [vmem:[#allocation8 + $0x34] ss:$8 sps:$4 sm:$0xff]   ;;  %v4689_v11 = vld [vmem:[#allocation8 + $0x30] ss:$8 sps:$4 sm:$0xff]   ;;  %v4694_v12 = vld [vmem:[#allocation8 + $0x24] ss:$8 sps:$4 sm:$0xff]  }
  0xb3   :  { %438 = vmatpush1.bf16.msra.mxu0 %v4598_v13  ;;  %v4692_v13 = vld [vmem:[#allocation8 + $0x20] ss:$8 sps:$4 sm:$0xff]   ;;  %v4695_v15 = vld [vmem:[#allocation8 + $0x10] ss:$8 sps:$4 sm:$0xff]   ;;  %v4700_v16 = vld [vmem:[#allocation8 + $0x4] ss:$8 sps:$4 sm:$0xff]  }
  0xb4   :  { %439 = vmatprep.subr.bf16.mxu0 %v4599_v14  ;;  %v4697_v14 = vld [vmem:[#allocation8 + $0x14] ss:$8 sps:$4 sm:$0xff]   ;;  %v4698_v17 = vld [vmem:[#allocation8] ss:$8 sps:$4 sm:$0xff]   ;;  %v4701_v19 = vld [vmem:[#allocation8 + $0xf0] ss:$8 sps:$4 sm:$0xff]  }
  0xb5   :  { %673 = vmatpush1.bf16.msra.mxu1 %v4646_v35  ;;  %v4703_v18 = vld [vmem:[#allocation8 + $0xf4] ss:$8 sps:$4 sm:$0xff]   ;;  %v4704_v21 = vld [vmem:[#allocation8 + $0xe0] ss:$8 sps:$4 sm:$0xff]   ;;  %v4707_v23 = vld [vmem:[#allocation8 + $0xd0] ss:$8 sps:$4 sm:$0xff]  }
  0xb6   :  { %674 = vmatprep.subr.bf16.mxu1 %v4647_v37  ;;  %v4710_v25 = vld [vmem:[#allocation8 + $0xc0] ss:$8 sps:$4 sm:$0xff]   ;;  %v4713_v27 = vld [vmem:[#allocation8 + $0xb0] ss:$8 sps:$4 sm:$0xff]   ;;  %s5662_s10 = smov [#allocation23]  }
  0xb7   :  { %440 = vmatpush1.bf16.msra.mxu0 %v4601_v20  ;;  %v4706_v20 = vld [vmem:[#allocation8 + $0xe4] ss:$8 sps:$4 sm:$0xff]   ;;  %v4716_v29 = vld [vmem:[#allocation8 + $0xa0] ss:$8 sps:$4 sm:$0xff]   ;;  %v4719_v37 = vld [vmem:[#allocation8 + $0x90] ss:$8 sps:$4 sm:$0xff]  }
  0xb8   :  { %441 = vmatprep.subr.bf16.mxu0 %v4602_v22  ;;  %v4709_v22 = vld [vmem:[#allocation8 + $0xd4] ss:$8 sps:$4 sm:$0xff]   ;;  %s4028_s12 = sshll.u32 %s5662_s10, 4  ;;  %s4029_s12 = int_to_ptr.vmem [resolvable:$true] %s4028_s12 }
  0xb9   :  { %675 = vmatpush1.bf16.msra.mxu1 %v4649_v39  ;;  %v4722_v39 = vld [vmem:[#allocation8 + $0x80] ss:$8 sps:$4 sm:$0xff]   ;;  %s5609_s30 = scalar_lea.vmem %s4029_s12, 512  ;;  %p5614_p10 = scmp.lt.s32.totalorder %s4029_s12, %s4029_s12 }
  0xba   :  { %676 = vmatprep.subr.bf16.mxu1 %v4650_v41  ;;  %v4727_v41 = vld [vmem:[#allocation10 + $0x74] ss:$8 sps:$4 sm:$0xff]   ;;  %p5610_p9 = scmp.ne.s32.totalorder %s4029_s12, %s5609_s30  ;;  %p5615_p11 = scmp.lt.s32.totalorder %s5609_s30, %s5609_s30 }
  0xbb   :  { %442 = vmatpush2.bf16.msra.mxu0 %v4604_v24  ;;  %v4712_v24 = vld [vmem:[#allocation8 + $0xc4] ss:$8 sps:$4 sm:$0xff]  }
  0xbc   :  { %443 = vmatprep.subr.bf16.mxu0 %v4605_v26  ;;  %v4715_v26 = vld [vmem:[#allocation8 + $0xb4] ss:$8 sps:$4 sm:$0xff]   ;;  %p5616_p12 = por %p5615_p11, %p5614_p10 }
  0xbd   :  { %677 = vmatpush1.bf16.msra.mxu1 %v4652_v43  ;;  %v4728_v43 = vld [vmem:[#allocation10 + $0x60] ss:$8 sps:$4 sm:$0xff]  }
  0xbe   :  { %678 = vmatprep.subr.bf16.mxu1 %v4653_v45  ;;  %v4731_v45 = vld [vmem:[#allocation10 + $0x50] ss:$8 sps:$4 sm:$0xff]   ;;  %p5617_p13 = pnand %p5616_p12, %p5610_p9 }
  0xbf   :  { %444 = vmatpush2.bf16.msra.mxu0 %v4607_v28  ;;  %v4718_v28 = vld [vmem:[#allocation8 + $0xa4] ss:$8 sps:$4 sm:$0xff]  }
  0xc0   :  { %445 = vmatprep.subr.bf16.mxu0 %v4608_v30 }
  0xc1   :  { %679 = vmatpush2.bf16.msra.mxu1 %v4655_v47  ;;  %v4734_v47 = vld [vmem:[#allocation10 + $0x40] ss:$8 sps:$4 sm:$0xff]  }
  0xc2   :  { %680 = vmatprep.subr.bf16.mxu1 %v4656_v49  ;;  %v4737_v49 = vld [vmem:[#allocation10 + $0x30] ss:$8 sps:$4 sm:$0xff]  }
  0xc3   :  { %446 = vmatpush2.bf16.msra.mxu0 %v4610_v31 }
  0xc4   :  { %447 = vmatprep.subr.bf16.mxu0 %v4611_v33 }
  0xc5   :  { %681 = vmatpush2.bf16.msra.mxu1 %v4658_v51  ;;  %v4740_v51 = vld [vmem:[#allocation10 + $0x20] ss:$8 sps:$4 sm:$0xff]  }
  0xc6   :  { %682 = vmatprep.subr.bf16.mxu1 %v4659_v53  ;;  %v4743_v53 = vld [vmem:[#allocation10 + $0x10] ss:$8 sps:$4 sm:$0xff]  }
  0xc7   :  { %448 = vmatpush2.bf16.msra.mxu0 %v4613_v36  ;;  %v4721_v36 = vld [vmem:[#allocation8 + $0x94] ss:$8 sps:$4 sm:$0xff]  }
  0xc8   :  { %449 = vmatprep.subr.bf16.mxu0 %v4614_v38  ;;  %v4724_v38 = vld [vmem:[#allocation8 + $0x84] ss:$8 sps:$4 sm:$0xff]  }
  0xc9   :  { %683 = vmatpush2.bf16.msra.mxu1 %v4661_v55  ;;  %v4746_v55 = vld [vmem:[#allocation10] ss:$8 sps:$4 sm:$0xff]  }
  0xca   :  { %684 = vmatprep.subr.bf16.mxu1 %v4662_v56  ;;  %v4751_v56 = vld [vmem:[#allocation10 + $0xf4] ss:$8 sps:$4 sm:$0xff]  }
  0xcb   :  { %450 = vmatpush2.bf16.msra.mxu0 %v4616_v40  ;;  %v4725_v40 = vld [vmem:[#allocation10 + $0x70] ss:$8 sps:$4 sm:$0xff]  }
  0xcc   :  { %451 = vmatprep.subr.bf16.mxu0 %v4617_v42  ;;  %v4730_v42 = vld [vmem:[#allocation10 + $0x64] ss:$8 sps:$4 sm:$0xff]  }
  0xcd   :  { %685 = vmatpush2.bf16.msra.mxu1 %v4664_v57  ;;  %v4749_v57 = vld [vmem:[#allocation10 + $0xf0] ss:$8 sps:$4 sm:$0xff]  }
  0xce   :  { %686 = vmatprep.subr.bf16.mxu1 %v4665_v58  ;;  %v4754_v58 = vld [vmem:[#allocation10 + $0xe4] ss:$8 sps:$4 sm:$0xff]  }
  0xcf   :  { %452 = vmatpush2.bf16.msra.mxu0 %v4619_v44  ;;  %v4733_v44 = vld [vmem:[#allocation10 + $0x54] ss:$8 sps:$4 sm:$0xff]  }
  0xd0   :  { %453 = vmatprep.subr.bf16.mxu0 %v4620_v46  ;;  %v4736_v46 = vld [vmem:[#allocation10 + $0x44] ss:$8 sps:$4 sm:$0xff]  }
  0xd1   :  { %687 = vmatpush2.bf16.msra.mxu1 %v4667_v59  ;;  %v4752_v59 = vld [vmem:[#allocation10 + $0xe0] ss:$8 sps:$4 sm:$0xff]  }
  0xd2   :  { %688 = vmatprep.subr.bf16.mxu1 %v4668_v60  ;;  %v4757_v60 = vld [vmem:[#allocation10 + $0xd4] ss:$8 sps:$4 sm:$0xff]  }
  0xd3   :  { %454 = vmatpush2.bf16.msra.mxu0 %v4622_v48  ;;  %v4739_v48 = vld [vmem:[#allocation10 + $0x34] ss:$8 sps:$4 sm:$0xff]  }
  0xd4   :  { %455 = vmatprep.subr.bf16.mxu0 %v4623_v50  ;;  %v4742_v50 = vld [vmem:[#allocation10 + $0x24] ss:$8 sps:$4 sm:$0xff]  }
  0xd5   :  { %689 = vmatpush2.bf16.msra.mxu1 %v4670_v61  ;;  %v4755_v61 = vld [vmem:[#allocation10 + $0xd0] ss:$8 sps:$4 sm:$0xff]  }
  0xd6   :  { %690 = vmatprep.subr.bf16.mxu1 %v4671_v62  ;;  %v4760_v62 = vld [vmem:[#allocation10 + $0xc4] ss:$8 sps:$4 sm:$0xff]  }
  0xd7   :  { %456 = vmatpush2.bf16.msra.mxu0 %v4625_v52  ;;  %v4745_v52 = vld [vmem:[#allocation10 + $0x14] ss:$8 sps:$4 sm:$0xff]  }
  0xd8   :  { %899 = vmatprep.subr.bf16.mxu0 %v4679_v3  ;;  %v4764_v3 = vld [vmem:[#allocation10 + $0xa0] ss:$8 sps:$4 sm:$0xff]  }
  0xd9   :  { %691 = vmatpush2.bf16.msra.mxu1 %v4673_v63  ;;  %v4758_v63 = vld [vmem:[#allocation10 + $0xc0] ss:$8 sps:$4 sm:$0xff]  }
  0xda   :  { %458 = vmatmul.mubr.bf16.vlgmr.msra.gmra.mxu0 %v4626_v54  ;;  %692 = vmatprep.subr.bf16.mxu1 %v4674_v0  ;;  %v4748_v54 = vld [vmem:[#allocation10 + $0x4] ss:$8 sps:$4 sm:$0xff]   ;;  %v4763_v0 = vld [vmem:[#allocation10 + $0xb4] ss:$8 sps:$4 sm:$0xff]  }
  0xdb   :  { %900 = vmatpush1.bf16.msra.mxu0 %v4677_v2  ;;  %v4766_v2 = vld [vmem:[#allocation10 + $0xa4] ss:$8 sps:$4 sm:$0xff]  }
  0xdc   :  { %901 = vmatprep.subr.bf16.mxu0 %v4682_v4 }
  0xdd   :  { %693 = vmatpush2.bf16.msra.mxu1 %v4676_v1  ;;  %v4761_v1 = vld [vmem:[#allocation10 + $0xb0] ss:$8 sps:$4 sm:$0xff]  }
  0xde   :  { %1136 = vmatprep.subr.bf16.mxu1 %v4727_v41  ;;  %v4853_v41 = vld [vmem:[#allocation11 + $0x144] ss:$16 sps:$4 sm:$0xff]  }
  0xdf   :  { %902 = vmatpush1.bf16.msra.mxu0 %v4680_v5 }
  0xe0   :  { %903 = vmatprep.subr.bf16.mxu0 %v4685_v6 }
  0xe3   :  { %904 = vmatpush1.bf16.msra.mxu0 %v4683_v7 }
  0xe4   :  { %905 = vmatprep.subr.bf16.mxu0 %v4688_v8 }
  0xe7   :  { %906 = vmatpush1.bf16.msra.mxu0 %v4686_v9 }
  0xe8   :  { %907 = vmatprep.subr.bf16.mxu0 %v4691_v10  ;;  %v4769_v10 = vld [vmem:[#allocation10 + $0x94] ss:$8 sps:$4 sm:$0xff]  }
  0xeb   :  { %908 = vmatpush1.bf16.msra.mxu0 %v4689_v11  ;;  %v4767_v11 = vld [vmem:[#allocation10 + $0x90] ss:$8 sps:$4 sm:$0xff]  }
  0xec   :  { %909 = vmatprep.subr.bf16.mxu0 %v4694_v12  ;;  %v4772_v12 = vld [vmem:[#allocation10 + $0x84] ss:$8 sps:$4 sm:$0xff]  }
  0xef   :  { %910 = vmatpush1.bf16.msra.mxu0 %v4692_v13  ;;  %v4770_v13 = vld [vmem:[#allocation10 + $0x80] ss:$8 sps:$4 sm:$0xff]  }
  0xf0   :  { %911 = vmatprep.subr.bf16.mxu0 %v4697_v14  ;;  %v4773_v14 = vld [vmem:[#allocation11 + $0xe0] ss:$16 sps:$4 sm:$0xff]  }
  0xf3   :  { %912 = vmatpush1.bf16.msra.mxu0 %v4695_v15  ;;  %v4775_v15 = vld [vmem:[#allocation11 + $0xe4] ss:$16 sps:$4 sm:$0xff]  }
  0xf4   :  { %913 = vmatprep.subr.bf16.mxu0 %v4700_v16  ;;  %v4778_v16 = vld [vmem:[#allocation11 + $0xec] ss:$16 sps:$4 sm:$0xff]  }
  0xf7   :  { %914 = vmatpush1.bf16.msra.mxu0 %v4698_v17  ;;  %v4781_v17 = vld [vmem:[#allocation11 + $0xc4] ss:$16 sps:$4 sm:$0xff]  }
  0xf8   :  { %915 = vmatprep.subr.bf16.mxu0 %v4703_v18  ;;  %v4779_v18 = vld [vmem:[#allocation11 + $0xc0] ss:$16 sps:$4 sm:$0xff]  }
  0xfb   :  { %916 = vmatpush2.bf16.msra.mxu0 %v4701_v19  ;;  %v4787_v19 = vld [vmem:[#allocation11 + $0xa4] ss:$16 sps:$4 sm:$0xff]  }
  0xfc   :  { %917 = vmatprep.subr.bf16.mxu0 %v4706_v20  ;;  %v4785_v20 = vld [vmem:[#allocation11 + $0xa0] ss:$16 sps:$4 sm:$0xff]  }
  0xff   :  { %918 = vmatpush2.bf16.msra.mxu0 %v4704_v21  ;;  %v4793_v21 = vld [vmem:[#allocation11 + $0x84] ss:$16 sps:$4 sm:$0xff]  }
 0x100   :  { %919 = vmatprep.subr.bf16.mxu0 %v4709_v22  ;;  %v4791_v22 = vld [vmem:[#allocation11 + $0x80] ss:$16 sps:$4 sm:$0xff]  }
 0x103   :  { %920 = vmatpush2.bf16.msra.mxu0 %v4707_v23  ;;  %v4799_v23 = vld [vmem:[#allocation11 + $0x64] ss:$16 sps:$4 sm:$0xff]  }
 0x104   :  { %921 = vmatprep.subr.bf16.mxu0 %v4712_v24  ;;  %v4797_v24 = vld [vmem:[#allocation11 + $0x60] ss:$16 sps:$4 sm:$0xff]  }
 0x107   :  { %922 = vmatpush2.bf16.msra.mxu0 %v4710_v25  ;;  %v4805_v25 = vld [vmem:[#allocation11 + $0x44] ss:$16 sps:$4 sm:$0xff]  }
 0x108   :  { %923 = vmatprep.subr.bf16.mxu0 %v4715_v26  ;;  %v4803_v26 = vld [vmem:[#allocation11 + $0x40] ss:$16 sps:$4 sm:$0xff]  }
 0x10b   :  { %924 = vmatpush2.bf16.msra.mxu0 %v4713_v27  ;;  %v4811_v27 = vld [vmem:[#allocation11 + $0x24] ss:$16 sps:$4 sm:$0xff]  }
 0x10c   :  { %925 = vmatprep.subr.bf16.mxu0 %v4718_v28  ;;  %v4809_v28 = vld [vmem:[#allocation11 + $0x20] ss:$16 sps:$4 sm:$0xff]  }
 0x10f   :  { %926 = vmatpush2.bf16.msra.mxu0 %v4716_v29  ;;  %v4817_v29 = vld [vmem:[#allocation11 + $0x4] ss:$16 sps:$4 sm:$0xff]  }
 0x110   :  { %927 = vmatprep.subr.bf16.mxu0 %v4721_v36  ;;  %v4833_v36 = vld [vmem:[#allocation11 + $0x1a0] ss:$16 sps:$4 sm:$0xff]  }
 0x113   :  { %928 = vmatpush2.bf16.msra.mxu0 %v4719_v37  ;;  %v4841_v37 = vld [vmem:[#allocation11 + $0x184] ss:$16 sps:$4 sm:$0xff]  }
 0x114   :  { %929 = vmatprep.subr.bf16.mxu0 %v4724_v38  ;;  %v4839_v38 = vld [vmem:[#allocation11 + $0x180] ss:$16 sps:$4 sm:$0xff]  }
 0x117   :  { %930 = vmatpush2.bf16.msra.mxu0 %v4722_v39  ;;  %v4847_v39 = vld [vmem:[#allocation11 + $0x164] ss:$16 sps:$4 sm:$0xff]  }
 0x118   :  { %1565 = vmatprep.subr.bf16.mxu0 %v4775_v15  ;;  %v4860_v15 = vld [vmem:[#allocation11 + $0x128] ss:$16 sps:$4 sm:$0xff]  }
 0x19a   :  { %v459_v30 = vpop.f32.mrf.mxu0 }
 0x19c   :  { %v461_v31 = vpop.f32.mrf.mxu0 }
 0x19e   :  { %v463_v32 = vpop.f32.mrf.mxu0 }
 0x19f   :  { %v468_v35 = vpack.c.bf16 %v463_v32, %v459_v30  ;;  %v4815_v30 = vld [vmem:[#allocation11] ss:$16 sps:$4 sm:$0xff]  }
 0x1a0   :  { %v465_v33 = vpop.f32.mrf.mxu0  ;;  %v4821_v32 = vld [vmem:[#allocation11 + $0x1e0] ss:$16 sps:$4 sm:$0xff]  }
 0x1a1   :  { %v469_v34 = vpack.c.bf16 %v465_v33, %v461_v31  ;;  %v4823_v31 = vld [vmem:[#allocation11 + $0x1e4] ss:$16 sps:$4 sm:$0xff]  }
 0x1a2   :  { %v4829_v33 = vld [vmem:[#allocation11 + $0x1c4] ss:$16 sps:$4 sm:$0xff]  }
 0x1a3   :  { %694 = vmatprep.mubr.bf16.mxu1 %v469_v34  ;;  %v4827_v34 = vld [vmem:[#allocation11 + $0x1c0] ss:$16 sps:$4 sm:$0xff]  }
 0x1a4   :  { %695 = vmatmul.mubr.bf16.vlgmr.msra.gmra.mxu1 %v468_v35  ;;  %v4835_v35 = vld [vmem:[#allocation11 + $0x1a4] ss:$16 sps:$4 sm:$0xff]  }
 0x1a5   :  { %1137 = vmatpush1.bf16.msra.mxu1 %v4725_v40  ;;  %v4845_v40 = vld [vmem:[#allocation11 + $0x160] ss:$16 sps:$4 sm:$0xff]  }
 0x1a6   :  { %1138 = vmatprep.subr.bf16.mxu1 %v4730_v42  ;;  %v4851_v42 = vld [vmem:[#allocation11 + $0x140] ss:$16 sps:$4 sm:$0xff]  }
 0x1a9   :  { %1139 = vmatpush1.bf16.msra.mxu1 %v4728_v43 }
 0x1aa   :  { %1140 = vmatprep.subr.bf16.mxu1 %v4733_v44 }
 0x1ad   :  { %1141 = vmatpush1.bf16.msra.mxu1 %v4731_v45 }
 0x1ae   :  { %1142 = vmatprep.subr.bf16.mxu1 %v4736_v46 }
 0x1b1   :  { %1143 = vmatpush1.bf16.msra.mxu1 %v4734_v47 }
 0x1b2   :  { %1144 = vmatprep.subr.bf16.mxu1 %v4739_v48  ;;  %v4776_v48 = vld [vmem:[#allocation11 + $0xe8] ss:$16 sps:$4 sm:$0xff]  }
 0x1b5   :  { %1145 = vmatpush1.bf16.msra.mxu1 %v4737_v49 }
 0x1b6   :  { %1146 = vmatprep.subr.bf16.mxu1 %v4742_v50  ;;  %v4784_v50 = vld [vmem:[#allocation11 + $0xcc] ss:$16 sps:$4 sm:$0xff]  }
 0x1b9   :  { %1147 = vmatpush1.bf16.msra.mxu1 %v4740_v51  ;;  %v4782_v51 = vld [vmem:[#allocation11 + $0xc8] ss:$16 sps:$4 sm:$0xff]  }
 0x1ba   :  { %1148 = vmatprep.subr.bf16.mxu1 %v4745_v52  ;;  %v4790_v52 = vld [vmem:[#allocation11 + $0xac] ss:$16 sps:$4 sm:$0xff]  }
 0x1bd   :  { %1149 = vmatpush1.bf16.msra.mxu1 %v4743_v53  ;;  %v4788_v53 = vld [vmem:[#allocation11 + $0xa8] ss:$16 sps:$4 sm:$0xff]  }
 0x1be   :  { %1150 = vmatprep.subr.bf16.mxu1 %v4748_v54  ;;  %v4796_v54 = vld [vmem:[#allocation11 + $0x8c] ss:$16 sps:$4 sm:$0xff]  }
 0x1c1   :  { %1151 = vmatpush1.bf16.msra.mxu1 %v4746_v55  ;;  %v4794_v55 = vld [vmem:[#allocation11 + $0x88] ss:$16 sps:$4 sm:$0xff]  }
 0x1c2   :  { %1152 = vmatprep.subr.bf16.mxu1 %v4751_v56  ;;  %v4802_v56 = vld [vmem:[#allocation11 + $0x6c] ss:$16 sps:$4 sm:$0xff]  }
 0x1c5   :  { %1153 = vmatpush2.bf16.msra.mxu1 %v4749_v57  ;;  %v4800_v57 = vld [vmem:[#allocation11 + $0x68] ss:$16 sps:$4 sm:$0xff]  }
 0x1c6   :  { %1154 = vmatprep.subr.bf16.mxu1 %v4754_v58  ;;  %v4808_v58 = vld [vmem:[#allocation11 + $0x4c] ss:$16 sps:$4 sm:$0xff]  }
 0x1c9   :  { %1155 = vmatpush2.bf16.msra.mxu1 %v4752_v59  ;;  %v4806_v59 = vld [vmem:[#allocation11 + $0x48] ss:$16 sps:$4 sm:$0xff]  }
 0x1ca   :  { %1156 = vmatprep.subr.bf16.mxu1 %v4757_v60  ;;  %v4814_v60 = vld [vmem:[#allocation11 + $0x2c] ss:$16 sps:$4 sm:$0xff]  }
 0x1cd   :  { %1157 = vmatpush2.bf16.msra.mxu1 %v4755_v61  ;;  %v4812_v61 = vld [vmem:[#allocation11 + $0x28] ss:$16 sps:$4 sm:$0xff]  }
 0x1ce   :  { %1158 = vmatprep.subr.bf16.mxu1 %v4760_v62  ;;  %v4820_v62 = vld [vmem:[#allocation11 + $0xc] ss:$16 sps:$4 sm:$0xff]  }
 0x1d1   :  { %1159 = vmatpush2.bf16.msra.mxu1 %v4758_v63  ;;  %v4818_v63 = vld [vmem:[#allocation11 + $0x8] ss:$16 sps:$4 sm:$0xff]  }
 0x1d2   :  { %1160 = vmatprep.subr.bf16.mxu1 %v4763_v0  ;;  %v4826_v0 = vld [vmem:[#allocation11 + $0x1ec] ss:$16 sps:$4 sm:$0xff]  }
 0x1d5   :  { %1161 = vmatpush2.bf16.msra.mxu1 %v4761_v1  ;;  %v4824_v1 = vld [vmem:[#allocation11 + $0x1e8] ss:$16 sps:$4 sm:$0xff]  }
 0x1d6   :  { %1162 = vmatprep.subr.bf16.mxu1 %v4766_v2  ;;  %v4832_v2 = vld [vmem:[#allocation11 + $0x1cc] ss:$16 sps:$4 sm:$0xff]  }
 0x1d9   :  { %1163 = vmatpush2.bf16.msra.mxu1 %v4764_v3  ;;  %v4830_v3 = vld [vmem:[#allocation11 + $0x1c8] ss:$16 sps:$4 sm:$0xff]  }
 0x1da   :  { %1164 = vmatprep.subr.bf16.mxu1 %v4769_v10  ;;  %v4856_v10 = vld [vmem:[#allocation11 + $0x14c] ss:$16 sps:$4 sm:$0xff]  }
 0x1dd   :  { %1165 = vmatpush2.bf16.msra.mxu1 %v4767_v11  ;;  %v4854_v11 = vld [vmem:[#allocation11 + $0x148] ss:$16 sps:$4 sm:$0xff]  }
 0x1de   :  { %1166 = vmatprep.subr.bf16.mxu1 %v4772_v12  ;;  %v4859_v12 = vld [vmem:[#allocation11 + $0x124] ss:$16 sps:$4 sm:$0xff]  }
 0x1e1   :  { %1167 = vmatpush2.bf16.msra.mxu1 %v4770_v13  ;;  %v4862_v13 = vld [vmem:[#allocation11 + $0x12c] ss:$16 sps:$4 sm:$0xff]  }
 0x1e2   :  { %1608 = vmatprep.subr.bf16.mxu1 %v4778_v16  ;;  %v4865_v16 = vld [vmem:[#allocation11 + $0x104] ss:$16 sps:$4 sm:$0xff]  }
 0x264   :  { %v696_v4 = vpop.f32.mrf.mxu1 }
 0x266   :  { %v698_v5 = vpop.f32.mrf.mxu1 }
 0x268   :  { %v700_v6 = vpop.f32.mrf.mxu1 }
 0x269   :  { %v705_v9 = vpack.c.bf16 %v700_v6, %v696_v4  ;;  %v4838_v4 = vld [vmem:[#allocation11 + $0x1ac] ss:$16 sps:$4 sm:$0xff]  }
 0x26a   :  { %v702_v7 = vpop.f32.mrf.mxu1  ;;  %v4844_v6 = vld [vmem:[#allocation11 + $0x18c] ss:$16 sps:$4 sm:$0xff]  }
 0x26b   :  { %v706_v8 = vpack.c.bf16 %v702_v7, %v698_v5  ;;  %v4836_v5 = vld [vmem:[#allocation11 + $0x1a8] ss:$16 sps:$4 sm:$0xff]  }
 0x26c   :  { %v4842_v7 = vld [vmem:[#allocation11 + $0x188] ss:$16 sps:$4 sm:$0xff]  }
 0x26d   :  { %931 = vmatprep.mubr.bf16.mxu0 %v706_v8  ;;  %v4850_v8 = vld [vmem:[#allocation11 + $0x16c] ss:$16 sps:$4 sm:$0xff]  }
 0x26e   :  { %932 = vmatmul.mubr.bf16.vlgmr.msra.gmra.mxu0 %v705_v9  ;;  %v4848_v9 = vld [vmem:[#allocation11 + $0x168] ss:$16 sps:$4 sm:$0xff]  }
 0x26f   :  { %1566 = vmatpush1.bf16.msra.mxu0 %v4773_v14  ;;  %v4857_v14 = vld [vmem:[#allocation11 + $0x120] ss:$16 sps:$4 sm:$0xff]  }
 0x270   :  { %1567 = vmatprep.subr.bf16.mxu0 %v4781_v17  ;;  %v4868_v17 = vld [vmem:[#allocation11 + $0x10c] ss:$16 sps:$4 sm:$0xff]  }
 0x273   :  { %1568 = vmatpush1.bf16.msra.mxu0 %v4779_v18  ;;  %v4863_v18 = vld [vmem:[#allocation11 + $0x100] ss:$16 sps:$4 sm:$0xff]  }
 0x274   :  { %1569 = vmatprep.subr.bf16.mxu0 %v4787_v19  ;;  %v4866_v19 = vld [vmem:[#allocation11 + $0x108] ss:$16 sps:$4 sm:$0xff]  }
 0x277   :  { %1570 = vmatpush1.bf16.msra.mxu0 %v4785_v20  ;;  %v4871_v20 = vld [vmem:[#allocation13 + $0x74] ss:$8 sps:$4 sm:$0xff]  }
 0x278   :  { %1571 = vmatprep.subr.bf16.mxu0 %v4793_v21  ;;  %v4874_v21 = vld [vmem:[#allocation13 + $0x174] ss:$8 sps:$4 sm:$0xff]  }
 0x27b   :  { %1572 = vmatpush1.bf16.msra.mxu0 %v4791_v22 }
 0x27c   :  { %1573 = vmatprep.subr.bf16.mxu0 %v4799_v23 }
 0x27f   :  { %1574 = vmatpush1.bf16.msra.mxu0 %v4797_v24 }
 0x280   :  { %1575 = vmatprep.subr.bf16.mxu0 %v4805_v25 }
 0x283   :  { %1576 = vmatpush1.bf16.msra.mxu0 %v4803_v26 }
 0x284   :  { %1577 = vmatprep.subr.bf16.mxu0 %v4811_v27  ;;  %v4869_v27 = vld [vmem:[#allocation13 + $0x70] ss:$8 sps:$4 sm:$0xff]  }
 0x287   :  { %1578 = vmatpush1.bf16.msra.mxu0 %v4809_v28  ;;  %v4872_v28 = vld [vmem:[#allocation13 + $0x170] ss:$8 sps:$4 sm:$0xff]  }
 0x288   :  { %1579 = vmatprep.subr.bf16.mxu0 %v4817_v29 }
 0x28b   :  { %1580 = vmatpush1.bf16.msra.mxu0 %v4815_v30  ;;  %v4877_v30 = vld [vmem:[#allocation13 + $0x64] ss:$8 sps:$4 sm:$0xff]  }
 0x28c   :  { %1581 = vmatprep.subr.bf16.mxu0 %v4823_v31  ;;  %v4880_v31 = vld [vmem:[#allocation13 + $0x164] ss:$8 sps:$4 sm:$0xff]  }
 0x28f   :  { %1582 = vmatpush2.bf16.msra.mxu0 %v4821_v32  ;;  %v4875_v32 = vld [vmem:[#allocation13 + $0x60] ss:$8 sps:$4 sm:$0xff]  }
 0x290   :  { %1583 = vmatprep.subr.bf16.mxu0 %v4829_v33  ;;  %v4878_v33 = vld [vmem:[#allocation13 + $0x160] ss:$8 sps:$4 sm:$0xff]  }
 0x293   :  { %1584 = vmatpush2.bf16.msra.mxu0 %v4827_v34  ;;  %v4883_v34 = vld [vmem:[#allocation13 + $0x54] ss:$8 sps:$4 sm:$0xff]  }
 0x294   :  { %1585 = vmatprep.subr.bf16.mxu0 %v4835_v35  ;;  %v4886_v35 = vld [vmem:[#allocation13 + $0x154] ss:$8 sps:$4 sm:$0xff]  }
 0x297   :  { %1586 = vmatpush2.bf16.msra.mxu0 %v4833_v36  ;;  %v4881_v36 = vld [vmem:[#allocation13 + $0x50] ss:$8 sps:$4 sm:$0xff]  }
 0x298   :  { %1587 = vmatprep.subr.bf16.mxu0 %v4841_v37  ;;  %v4884_v37 = vld [vmem:[#allocation13 + $0x150] ss:$8 sps:$4 sm:$0xff]  }
 0x29b   :  { %1588 = vmatpush2.bf16.msra.mxu0 %v4839_v38  ;;  %v4889_v38 = vld [vmem:[#allocation13 + $0x44] ss:$8 sps:$4 sm:$0xff]  }
 0x29c   :  { %1589 = vmatprep.subr.bf16.mxu0 %v4847_v39  ;;  %v4892_v39 = vld [vmem:[#allocation13 + $0x144] ss:$8 sps:$4 sm:$0xff]  }
 0x29f   :  { %1590 = vmatpush2.bf16.msra.mxu0 %v4845_v40  ;;  %v4887_v40 = vld [vmem:[#allocation13 + $0x40] ss:$8 sps:$4 sm:$0xff]  }
 0x2a0   :  { %1591 = vmatprep.subr.bf16.mxu0 %v4853_v41  ;;  %v4890_v41 = vld [vmem:[#allocation13 + $0x140] ss:$8 sps:$4 sm:$0xff]  }
 0x2a3   :  { %1592 = vmatpush2.bf16.msra.mxu0 %v4851_v42  ;;  %v4895_v42 = vld [vmem:[#allocation13 + $0x34] ss:$8 sps:$4 sm:$0xff]  }
 0x2a4   :  { %1593 = vmatprep.subr.bf16.mxu0 %v4859_v12  ;;  %v4941_v12 = vld [vmem:[#allocation13 + $0xb0] ss:$8 sps:$4 sm:$0xff]  }
 0x2a7   :  { %1594 = vmatpush2.bf16.msra.mxu0 %v4857_v14  ;;  %v4949_v14 = vld [vmem:[#allocation13 + $0xa4] ss:$8 sps:$4 sm:$0xff]  }
 0x2a8   :  { %1595 = vmatprep.subr.bf16.mxu0 %v4865_v16  ;;  %v4947_v16 = vld [vmem:[#allocation13 + $0xa0] ss:$8 sps:$4 sm:$0xff]  }
 0x2ab   :  { %1596 = vmatpush2.bf16.msra.mxu0 %v4863_v18  ;;  %v4955_v18 = vld [vmem:[#allocation13 + $0x94] ss:$8 sps:$4 sm:$0xff]  }
 0x2ac   :  { %2039 = vmatprep.subr.bf16.mxu0 %v4871_v20  ;;  %v4953_v20 = vld [vmem:[#allocation13 + $0x90] ss:$8 sps:$4 sm:$0xff]  }
 0x32e   :  { %v933_v43 = vpop.f32.mrf.mxu0 }
 0x330   :  { %v935_v44 = vpop.f32.mrf.mxu0 }
 0x332   :  { %v937_v45 = vpop.f32.mrf.mxu0 }
 0x333   :  { %v942_v49 = vpack.c.bf16 %v937_v45, %v933_v43  ;;  %v4898_v43 = vld [vmem:[#allocation13 + $0x134] ss:$8 sps:$4 sm:$0xff]   ;;  %v4896_v45 = vld [vmem:[#allocation13 + $0x130] ss:$8 sps:$4 sm:$0xff]  }
 0x334   :  { %v939_v46 = vpop.f32.mrf.mxu0 }
 0x335   :  { %v943_v47 = vpack.c.bf16 %v939_v46, %v935_v44  ;;  %v4893_v44 = vld [vmem:[#allocation13 + $0x30] ss:$8 sps:$4 sm:$0xff]   ;;  %v4901_v46 = vld [vmem:[#allocation13 + $0x24] ss:$8 sps:$4 sm:$0xff]  }
 0x337   :  { %1168 = vmatprep.mubr.bf16.mxu1 %v943_v47  ;;  %v4904_v47 = vld [vmem:[#allocation13 + $0x124] ss:$8 sps:$4 sm:$0xff]  }
 0x338   :  { %1169 = vmatmul.mubr.bf16.vlgmr.msra.gmra.mxu1 %v942_v49  ;;  %v4902_v49 = vld [vmem:[#allocation13 + $0x120] ss:$8 sps:$4 sm:$0xff]  }
 0x339   :  { %1609 = vmatpush1.bf16.msra.mxu1 %v4776_v48  ;;  %v4899_v48 = vld [vmem:[#allocation13 + $0x20] ss:$8 sps:$4 sm:$0xff]  }
 0x33a   :  { %1610 = vmatprep.subr.bf16.mxu1 %v4784_v50  ;;  %v4907_v50 = vld [vmem:[#allocation13 + $0x14] ss:$8 sps:$4 sm:$0xff]  }
 0x33d   :  { %1611 = vmatpush1.bf16.msra.mxu1 %v4782_v51  ;;  %v4910_v51 = vld [vmem:[#allocation13 + $0x114] ss:$8 sps:$4 sm:$0xff]  }
 0x33e   :  { %1612 = vmatprep.subr.bf16.mxu1 %v4790_v52  ;;  %v4905_v52 = vld [vmem:[#allocation13 + $0x10] ss:$8 sps:$4 sm:$0xff]  }
 0x341   :  { %1613 = vmatpush1.bf16.msra.mxu1 %v4788_v53  ;;  %v4908_v53 = vld [vmem:[#allocation13 + $0x110] ss:$8 sps:$4 sm:$0xff]  }
 0x342   :  { %1614 = vmatprep.subr.bf16.mxu1 %v4796_v54  ;;  %v4913_v54 = vld [vmem:[#allocation13 + $0x4] ss:$8 sps:$4 sm:$0xff]  }
 0x345   :  { %1615 = vmatpush1.bf16.msra.mxu1 %v4794_v55  ;;  %v4916_v55 = vld [vmem:[#allocation13 + $0x104] ss:$8 sps:$4 sm:$0xff]  }
 0x346   :  { %1616 = vmatprep.subr.bf16.mxu1 %v4802_v56  ;;  %v4911_v56 = vld [vmem:[#allocation13] ss:$8 sps:$4 sm:$0xff]  }
 0x349   :  { %1617 = vmatpush1.bf16.msra.mxu1 %v4800_v57  ;;  %v4914_v57 = vld [vmem:[#allocation13 + $0x100] ss:$8 sps:$4 sm:$0xff]  }
 0x34a   :  { %1618 = vmatprep.subr.bf16.mxu1 %v4808_v58  ;;  %v4919_v58 = vld [vmem:[#allocation13 + $0xf4] ss:$8 sps:$4 sm:$0xff]  }
 0x34d   :  { %1619 = vmatpush1.bf16.msra.mxu1 %v4806_v59  ;;  %v4922_v59 = vld [vmem:[#allocation13 + $0x1f4] ss:$8 sps:$4 sm:$0xff]  }
 0x34e   :  { %1620 = vmatprep.subr.bf16.mxu1 %v4814_v60  ;;  %v4917_v60 = vld [vmem:[#allocation13 + $0xf0] ss:$8 sps:$4 sm:$0xff]  }
 0x351   :  { %1621 = vmatpush1.bf16.msra.mxu1 %v4812_v61  ;;  %v4920_v61 = vld [vmem:[#allocation13 + $0x1f0] ss:$8 sps:$4 sm:$0xff]  }
 0x352   :  { %1622 = vmatprep.subr.bf16.mxu1 %v4820_v62  ;;  %v4925_v62 = vld [vmem:[#allocation13 + $0xe4] ss:$8 sps:$4 sm:$0xff]  }
 0x355   :  { %1623 = vmatpush1.bf16.msra.mxu1 %v4818_v63  ;;  %v4928_v63 = vld [vmem:[#allocation13 + $0x1e4] ss:$8 sps:$4 sm:$0xff]  }
 0x356   :  { %1624 = vmatprep.subr.bf16.mxu1 %v4826_v0  ;;  %v4923_v0 = vld [vmem:[#allocation13 + $0xe0] ss:$8 sps:$4 sm:$0xff]  }
 0x359   :  { %1625 = vmatpush2.bf16.msra.mxu1 %v4824_v1  ;;  %v4926_v1 = vld [vmem:[#allocation13 + $0x1e0] ss:$8 sps:$4 sm:$0xff]  }
 0x35a   :  { %1626 = vmatprep.subr.bf16.mxu1 %v4832_v2  ;;  %v4931_v2 = vld [vmem:[#allocation13 + $0xd4] ss:$8 sps:$4 sm:$0xff]  }
 0x35d   :  { %1627 = vmatpush2.bf16.msra.mxu1 %v4830_v3  ;;  %v4934_v3 = vld [vmem:[#allocation13 + $0x1d4] ss:$8 sps:$4 sm:$0xff]  }
 0x35e   :  { %1628 = vmatprep.subr.bf16.mxu1 %v4838_v4  ;;  %v4929_v4 = vld [vmem:[#allocation13 + $0xd0] ss:$8 sps:$4 sm:$0xff]  }
 0x361   :  { %1629 = vmatpush2.bf16.msra.mxu1 %v4836_v5  ;;  %v4932_v5 = vld [vmem:[#allocation13 + $0x1d0] ss:$8 sps:$4 sm:$0xff]  }
 0x362   :  { %1630 = vmatprep.subr.bf16.mxu1 %v4844_v6  ;;  %v4937_v6 = vld [vmem:[#allocation13 + $0xc4] ss:$8 sps:$4 sm:$0xff]  }
 0x365   :  { %1631 = vmatpush2.bf16.msra.mxu1 %v4842_v7  ;;  %v4940_v7 = vld [vmem:[#allocation13 + $0x1c4] ss:$8 sps:$4 sm:$0xff]  }
 0x366   :  { %1632 = vmatprep.subr.bf16.mxu1 %v4850_v8  ;;  %v4935_v8 = vld [vmem:[#allocation13 + $0xc0] ss:$8 sps:$4 sm:$0xff]  }
 0x369   :  { %1633 = vmatpush2.bf16.msra.mxu1 %v4848_v9  ;;  %v4938_v9 = vld [vmem:[#allocation13 + $0x1c0] ss:$8 sps:$4 sm:$0xff]  }
 0x36a   :  { %1634 = vmatprep.subr.bf16.mxu1 %v4856_v10  ;;  %v4943_v10 = vld [vmem:[#allocation13 + $0xb4] ss:$8 sps:$4 sm:$0xff]  }
 0x36d   :  { %1635 = vmatpush2.bf16.msra.mxu1 %v4854_v11  ;;  %v4946_v11 = vld [vmem:[#allocation13 + $0x1b4] ss:$8 sps:$4 sm:$0xff]  }
 0x36e   :  { %1636 = vmatprep.subr.bf16.mxu1 %v4862_v13  ;;  %v4944_v13 = vld [vmem:[#allocation13 + $0x1b0] ss:$8 sps:$4 sm:$0xff]  }
 0x371   :  { %1637 = vmatpush2.bf16.msra.mxu1 %v4860_v15  ;;  %v4952_v15 = vld [vmem:[#allocation13 + $0x1a4] ss:$8 sps:$4 sm:$0xff]  }
 0x372   :  { %1638 = vmatprep.subr.bf16.mxu1 %v4868_v17  ;;  %v4950_v17 = vld [vmem:[#allocation13 + $0x1a0] ss:$8 sps:$4 sm:$0xff]  }
 0x375   :  { %1639 = vmatpush2.bf16.msra.mxu1 %v4866_v19  ;;  %v4958_v19 = vld [vmem:[#allocation13 + $0x194] ss:$8 sps:$4 sm:$0xff]  }
 0x376   :  { %2082 = vmatprep.subr.bf16.mxu1 %v4874_v21  ;;  %v4956_v21 = vld [vmem:[#allocation13 + $0x190] ss:$8 sps:$4 sm:$0xff]  }
 0x3f8   :  { %v1170_v22 = vpop.f32.mrf.mxu1 }
 0x3fa   :  { %v1172_v23 = vpop.f32.mrf.mxu1 }
 0x3fc   :  { %v1174_v24 = vpop.f32.mrf.mxu1 }
 0x3fd   :  { %v1179_v29 = vpack.c.bf16 %v1174_v24, %v1170_v22  ;;  %v4961_v22 = vld [vmem:[#allocation13 + $0x84] ss:$8 sps:$4 sm:$0xff]   ;;  %v4959_v24 = vld [vmem:[#allocation13 + $0x80] ss:$8 sps:$4 sm:$0xff]  }
 0x3fe   :  { %v1176_v25 = vpop.f32.mrf.mxu1 }
 0x3ff   :  { %v1180_v26 = vpack.c.bf16 %v1176_v25, %v1172_v23  ;;  %v4964_v23 = vld [vmem:[#allocation13 + $0x184] ss:$8 sps:$4 sm:$0xff]   ;;  %v4962_v25 = vld [vmem:[#allocation13 + $0x180] ss:$8 sps:$4 sm:$0xff]  }
 0x401   :  { %1597 = vmatprep.mubr.bf16.mxu0 %v1180_v26  ;;  %1640 = vmatprep.mubr.bf16.mxu1 %v1180_v26  ;;  %v4967_v26 = vld [vmem:[#allocation14 + $0x74] ss:$8 sps:$4 sm:$0xff]  }
 0x402   :  { %1598 = vmatmul.mubr.bf16.vlgmr.msra.gmra.mxu0 %v1179_v29  ;;  %1641 = vmatmul.mubr.bf16.vlgmr.msra.gmra.mxu1 %v1179_v29 }
 0x403   :  { %2040 = vmatpush1.bf16.msra.mxu0 %v4869_v27  ;;  %2083 = vmatpush1.bf16.msra.mxu1 %v4872_v28 }
 0x404   :  { %2041 = vmatprep.subr.bf16.mxu0 %v4877_v30  ;;  %2084 = vmatprep.subr.bf16.mxu1 %v4880_v31 }
 0x407   :  { %2042 = vmatpush1.bf16.msra.mxu0 %v4875_v32  ;;  %2085 = vmatpush1.bf16.msra.mxu1 %v4878_v33 }
 0x408   :  { %2043 = vmatprep.subr.bf16.mxu0 %v4883_v34  ;;  %2086 = vmatprep.subr.bf16.mxu1 %v4886_v35 }
 0x40b   :  { %2044 = vmatpush1.bf16.msra.mxu0 %v4881_v36  ;;  %2087 = vmatpush1.bf16.msra.mxu1 %v4884_v37  ;;  %v4965_v37 = vld [vmem:[#allocation14 + $0x70] ss:$8 sps:$4 sm:$0xff]  }
 0x40c   :  { %2045 = vmatprep.subr.bf16.mxu0 %v4889_v38  ;;  %2088 = vmatprep.subr.bf16.mxu1 %v4892_v39 }
 0x40f   :  { %2046 = vmatpush1.bf16.msra.mxu0 %v4887_v40  ;;  %2089 = vmatpush1.bf16.msra.mxu1 %v4890_v41  ;;  %v4970_v40 = vld [vmem:[#allocation14 + $0x64] ss:$8 sps:$4 sm:$0xff]   ;;  %v4968_v41 = vld [vmem:[#allocation14 + $0x60] ss:$8 sps:$4 sm:$0xff]  }
 0x410   :  { %2047 = vmatprep.subr.bf16.mxu0 %v4895_v42  ;;  %2090 = vmatprep.subr.bf16.mxu1 %v4898_v43  ;;  %v4973_v42 = vld [vmem:[#allocation14 + $0x54] ss:$8 sps:$4 sm:$0xff]   ;;  %v4971_v43 = vld [vmem:[#allocation14 + $0x50] ss:$8 sps:$4 sm:$0xff]  }
 0x413   :  { %2048 = vmatpush1.bf16.msra.mxu0 %v4893_v44  ;;  %2091 = vmatpush1.bf16.msra.mxu1 %v4896_v45  ;;  %v4976_v44 = vld [vmem:[#allocation14 + $0x44] ss:$8 sps:$4 sm:$0xff]   ;;  %v4974_v45 = vld [vmem:[#allocation14 + $0x40] ss:$8 sps:$4 sm:$0xff]  }
 0x414   :  { %2049 = vmatprep.subr.bf16.mxu0 %v4901_v46  ;;  %2092 = vmatprep.subr.bf16.mxu1 %v4904_v47  ;;  %v4979_v46 = vld [vmem:[#allocation14 + $0x34] ss:$8 sps:$4 sm:$0xff]   ;;  %v4977_v47 = vld [vmem:[#allocation14 + $0x30] ss:$8 sps:$4 sm:$0xff]  }
 0x417   :  { %2050 = vmatpush1.bf16.msra.mxu0 %v4899_v48  ;;  %2093 = vmatpush1.bf16.msra.mxu1 %v4902_v49  ;;  %v4982_v48 = vld [vmem:[#allocation14 + $0x24] ss:$8 sps:$4 sm:$0xff]   ;;  %v4980_v49 = vld [vmem:[#allocation14 + $0x20] ss:$8 sps:$4 sm:$0xff]  }
 0x418   :  { %2051 = vmatprep.subr.bf16.mxu0 %v4907_v50  ;;  %2094 = vmatprep.subr.bf16.mxu1 %v4910_v51  ;;  %v4985_v50 = vld [vmem:[#allocation14 + $0x14] ss:$8 sps:$4 sm:$0xff]   ;;  %v4983_v51 = vld [vmem:[#allocation14 + $0x10] ss:$8 sps:$4 sm:$0xff]  }
 0x41b   :  { %2052 = vmatpush1.bf16.msra.mxu0 %v4905_v52  ;;  %2095 = vmatpush1.bf16.msra.mxu1 %v4908_v53  ;;  %v4988_v52 = vld [vmem:[#allocation14 + $0x4] ss:$8 sps:$4 sm:$0xff]   ;;  %v4986_v53 = vld [vmem:[#allocation14] ss:$8 sps:$4 sm:$0xff]  }
 0x41c   :  { %2053 = vmatprep.subr.bf16.mxu0 %v4913_v54  ;;  %2096 = vmatprep.subr.bf16.mxu1 %v4916_v55  ;;  %v4991_v54 = vld [vmem:[#allocation14 + $0xf4] ss:$8 sps:$4 sm:$0xff]   ;;  %v4989_v55 = vld [vmem:[#allocation14 + $0xf0] ss:$8 sps:$4 sm:$0xff]  }
 0x41f   :  { %2054 = vmatpush1.bf16.msra.mxu0 %v4911_v56  ;;  %2097 = vmatpush1.bf16.msra.mxu1 %v4914_v57  ;;  %v4994_v56 = vld [vmem:[#allocation14 + $0xe4] ss:$8 sps:$4 sm:$0xff]   ;;  %v4992_v57 = vld [vmem:[#allocation14 + $0xe0] ss:$8 sps:$4 sm:$0xff]  }
 0x420   :  { %2055 = vmatprep.subr.bf16.mxu0 %v4919_v58  ;;  %2098 = vmatprep.subr.bf16.mxu1 %v4922_v59  ;;  %v4997_v58 = vld [vmem:[#allocation14 + $0xd4] ss:$8 sps:$4 sm:$0xff]   ;;  %v4995_v59 = vld [vmem:[#allocation14 + $0xd0] ss:$8 sps:$4 sm:$0xff]  }
 0x423   :  { %2056 = vmatpush2.bf16.msra.mxu0 %v4917_v60  ;;  %2099 = vmatpush2.bf16.msra.mxu1 %v4920_v61  ;;  %v5000_v60 = vld [vmem:[#allocation14 + $0xc4] ss:$8 sps:$4 sm:$0xff]   ;;  %v4998_v61 = vld [vmem:[#allocation14 + $0xc0] ss:$8 sps:$4 sm:$0xff]  }
 0x424   :  { %2057 = vmatprep.subr.bf16.mxu0 %v4925_v62  ;;  %2100 = vmatprep.subr.bf16.mxu1 %v4928_v63  ;;  %v5003_v62 = vld [vmem:[#allocation14 + $0xb4] ss:$8 sps:$4 sm:$0xff]   ;;  %v5001_v63 = vld [vmem:[#allocation14 + $0xb0] ss:$8 sps:$4 sm:$0xff]  }
 0x427   :  { %2058 = vmatpush2.bf16.msra.mxu0 %v4923_v0  ;;  %2101 = vmatpush2.bf16.msra.mxu1 %v4926_v1  ;;  %v5006_v0 = vld [vmem:[#allocation14 + $0xa4] ss:$8 sps:$4 sm:$0xff]   ;;  %v5004_v1 = vld [vmem:[#allocation14 + $0xa0] ss:$8 sps:$4 sm:$0xff]  }
 0x428   :  { %2059 = vmatprep.subr.bf16.mxu0 %v4931_v2  ;;  %2102 = vmatprep.subr.bf16.mxu1 %v4934_v3  ;;  %v5009_v2 = vld [vmem:[#allocation14 + $0x94] ss:$8 sps:$4 sm:$0xff]   ;;  %v5007_v3 = vld [vmem:[#allocation14 + $0x90] ss:$8 sps:$4 sm:$0xff]  }
 0x42b   :  { %2060 = vmatpush2.bf16.msra.mxu0 %v4929_v4  ;;  %2103 = vmatpush2.bf16.msra.mxu1 %v4932_v5  ;;  %v5012_v4 = vld [vmem:[#allocation14 + $0x84] ss:$8 sps:$4 sm:$0xff]   ;;  %v5010_v5 = vld [vmem:[#allocation14 + $0x80] ss:$8 sps:$4 sm:$0xff]  }
 0x42c   :  { %2061 = vmatprep.subr.bf16.mxu0 %v4937_v6  ;;  %2104 = vmatprep.subr.bf16.mxu1 %v4940_v7  ;;  %v5013_v6 = vld [vmem:[#allocation16 + $0x70] ss:$8 sps:$4 sm:$0xff]   ;;  %v5015_v7 = vld [vmem:[#allocation16 + $0x74] ss:$8 sps:$4 sm:$0xff]  }
 0x42f   :  { %2062 = vmatpush2.bf16.msra.mxu0 %v4935_v8  ;;  %2105 = vmatpush2.bf16.msra.mxu1 %v4938_v9  ;;  %v5018_v8 = vld [vmem:[#allocation16 + $0x64] ss:$8 sps:$4 sm:$0xff]   ;;  %v5016_v9 = vld [vmem:[#allocation16 + $0x60] ss:$8 sps:$4 sm:$0xff]  }
 0x430   :  { %2063 = vmatprep.subr.bf16.mxu0 %v4943_v10  ;;  %2106 = vmatprep.subr.bf16.mxu1 %v4946_v11  ;;  %v5021_v10 = vld [vmem:[#allocation16 + $0x54] ss:$8 sps:$4 sm:$0xff]   ;;  %v5019_v11 = vld [vmem:[#allocation16 + $0x50] ss:$8 sps:$4 sm:$0xff]  }
 0x433   :  { %2064 = vmatpush2.bf16.msra.mxu0 %v4941_v12  ;;  %2107 = vmatpush2.bf16.msra.mxu1 %v4944_v13  ;;  %v5024_v12 = vld [vmem:[#allocation16 + $0x44] ss:$8 sps:$4 sm:$0xff]   ;;  %v5022_v13 = vld [vmem:[#allocation16 + $0x40] ss:$8 sps:$4 sm:$0xff]  }
 0x434   :  { %2065 = vmatprep.subr.bf16.mxu0 %v4949_v14  ;;  %2108 = vmatprep.subr.bf16.mxu1 %v4952_v15  ;;  %v5027_v14 = vld [vmem:[#allocation16 + $0x34] ss:$8 sps:$4 sm:$0xff]   ;;  %v5025_v15 = vld [vmem:[#allocation16 + $0x30] ss:$8 sps:$4 sm:$0xff]  }
 0x437   :  { %2066 = vmatpush2.bf16.msra.mxu0 %v4947_v16  ;;  %2109 = vmatpush2.bf16.msra.mxu1 %v4950_v17  ;;  %v5030_v16 = vld [vmem:[#allocation16 + $0x24] ss:$8 sps:$4 sm:$0xff]   ;;  %v5028_v17 = vld [vmem:[#allocation16 + $0x20] ss:$8 sps:$4 sm:$0xff]  }
 0x438   :  { %2067 = vmatprep.subr.bf16.mxu0 %v4955_v18  ;;  %2110 = vmatprep.subr.bf16.mxu1 %v4958_v19  ;;  %v5033_v18 = vld [vmem:[#allocation16 + $0x14] ss:$8 sps:$4 sm:$0xff]   ;;  %v5031_v19 = vld [vmem:[#allocation16 + $0x10] ss:$8 sps:$4 sm:$0xff]  }
 0x43b   :  { %2068 = vmatpush2.bf16.msra.mxu0 %v4953_v20  ;;  %2111 = vmatpush2.bf16.msra.mxu1 %v4956_v21  ;;  %v5036_v20 = vld [vmem:[#allocation16 + $0x4] ss:$8 sps:$4 sm:$0xff]   ;;  %v5034_v21 = vld [vmem:[#allocation16] ss:$8 sps:$4 sm:$0xff]  }
 0x43c   :  { %2069 = vmatprep.subr.bf16.mxu0 %v4961_v22  ;;  %2112 = vmatprep.subr.bf16.mxu1 %v4964_v23  ;;  %v5039_v22 = vld [vmem:[#allocation16 + $0xf4] ss:$8 sps:$4 sm:$0xff]   ;;  %v5037_v23 = vld [vmem:[#allocation16 + $0xf0] ss:$8 sps:$4 sm:$0xff]  }
 0x43f   :  { %2070 = vmatpush2.bf16.msra.mxu0 %v4959_v24  ;;  %2113 = vmatpush2.bf16.msra.mxu1 %v4962_v25  ;;  %v5042_v24 = vld [vmem:[#allocation16 + $0xe4] ss:$8 sps:$4 sm:$0xff]   ;;  %v5040_v25 = vld [vmem:[#allocation16 + $0xe0] ss:$8 sps:$4 sm:$0xff]  }
 0x440   :  { %2319 = vmatprep.subr.bf16.mxu0 %v4967_v26  ;;  %2556 = vmatprep.subr.bf16.mxu1 %v5015_v7  ;;  %v5045_v26 = vld [vmem:[#allocation16 + $0xd4] ss:$8 sps:$4 sm:$0xff]   ;;  %v5088_v7 = vld [vmem:[#allocation17 + $0xe0] ss:$8 sps:$4 sm:$0xff]  }
 0x4c2   :  { %v1599_v27 = vpop.f32.mrf.mxu0  ;;  %v1642_v28 = vpop.f32.mrf.mxu1 }
 0x4c4   :  { %v1601_v29 = vpop.f32.mrf.mxu0  ;;  %v1644_v30 = vpop.f32.mrf.mxu1 }
 0x4c6   :  { %v1603_v31 = vpop.f32.mrf.mxu0  ;;  %v1646_v32 = vpop.f32.mrf.mxu1 }
 0x4c7   :  { %v1651_v38 = vpack.c.bf16 %v1603_v31, %v1599_v27  ;;  %v1653_v39 = vpack.c.bf16 %v1646_v32, %v1642_v28  ;;  %v5043_v27 = vld [vmem:[#allocation16 + $0xd0] ss:$8 sps:$4 sm:$0xff]   ;;  %v5048_v28 = vld [vmem:[#allocation16 + $0xc4] ss:$8 sps:$4 sm:$0xff]  }
 0x4c8   :  { %v1605_v33 = vpop.f32.mrf.mxu0  ;;  %v1648_v34 = vpop.f32.mrf.mxu1  ;;  %v5049_v31 = vld [vmem:[#allocation16 + $0xb0] ss:$8 sps:$4 sm:$0xff]   ;;  %v5054_v32 = vld [vmem:[#allocation16 + $0xa4] ss:$8 sps:$4 sm:$0xff]  }
 0x4c9   :  { %v1652_v35 = vpack.c.bf16 %v1605_v33, %v1601_v29  ;;  %v1654_v36 = vpack.c.bf16 %v1648_v34, %v1644_v30  ;;  %v5046_v29 = vld [vmem:[#allocation16 + $0xc0] ss:$8 sps:$4 sm:$0xff]   ;;  %v5051_v30 = vld [vmem:[#allocation16 + $0xb4] ss:$8 sps:$4 sm:$0xff]  }
 0x4ca   :  { %v5052_v33 = vld [vmem:[#allocation16 + $0xa0] ss:$8 sps:$4 sm:$0xff]  }
 0x4cb   :  { %2071 = vmatprep.mubr.bf16.mxu0 %v1652_v35  ;;  %2114 = vmatprep.mubr.bf16.mxu1 %v1654_v36 }
 0x4cc   :  { %2072 = vmatmul.mubr.bf16.vlgmr.msra.gmra.mxu0 %v1651_v38  ;;  %2115 = vmatmul.mubr.bf16.vlgmr.msra.gmra.mxu1 %v1653_v39 }
 0x4cd   :  { %2320 = vmatpush1.bf16.msra.mxu0 %v4965_v37  ;;  %2557 = vmatpush1.bf16.msra.mxu1 %v5013_v6  ;;  %v5090_v6 = vld [vmem:[#allocation17 + $0xe4] ss:$8 sps:$4 sm:$0xff]  }
 0x4ce   :  { %2321 = vmatprep.subr.bf16.mxu0 %v4970_v40  ;;  %2558 = vmatprep.subr.bf16.mxu1 %v5018_v8  ;;  %v5093_v8 = vld [vmem:[#allocation17 + $0xd4] ss:$8 sps:$4 sm:$0xff]  }
 0x4d1   :  { %2322 = vmatpush1.bf16.msra.mxu0 %v4968_v41  ;;  %2559 = vmatpush1.bf16.msra.mxu1 %v5016_v9  ;;  %v5091_v9 = vld [vmem:[#allocation17 + $0xd0] ss:$8 sps:$4 sm:$0xff]  }
 0x4d2   :  { %2323 = vmatprep.subr.bf16.mxu0 %v4973_v42  ;;  %2560 = vmatprep.subr.bf16.mxu1 %v5021_v10  ;;  %v5096_v10 = vld [vmem:[#allocation17 + $0xc4] ss:$8 sps:$4 sm:$0xff]  }
 0x4d5   :  { %2324 = vmatpush1.bf16.msra.mxu0 %v4971_v43  ;;  %2561 = vmatpush1.bf16.msra.mxu1 %v5019_v11  ;;  %v5094_v11 = vld [vmem:[#allocation17 + $0xc0] ss:$8 sps:$4 sm:$0xff]  }
 0x4d6   :  { %2325 = vmatprep.subr.bf16.mxu0 %v4976_v44  ;;  %2562 = vmatprep.subr.bf16.mxu1 %v5024_v12  ;;  %v5099_v12 = vld [vmem:[#allocation17 + $0xb4] ss:$8 sps:$4 sm:$0xff]  }
 0x4d9   :  { %2326 = vmatpush1.bf16.msra.mxu0 %v4974_v45  ;;  %2563 = vmatpush1.bf16.msra.mxu1 %v5022_v13  ;;  %v5097_v13 = vld [vmem:[#allocation17 + $0xb0] ss:$8 sps:$4 sm:$0xff]  }
 0x4da   :  { %2327 = vmatprep.subr.bf16.mxu0 %v4979_v46  ;;  %2564 = vmatprep.subr.bf16.mxu1 %v5027_v14  ;;  %v5102_v14 = vld [vmem:[#allocation17 + $0xa4] ss:$8 sps:$4 sm:$0xff]  }
 0x4dd   :  { %2328 = vmatpush1.bf16.msra.mxu0 %v4977_v47  ;;  %2565 = vmatpush1.bf16.msra.mxu1 %v5025_v15  ;;  %v5100_v15 = vld [vmem:[#allocation17 + $0xa0] ss:$8 sps:$4 sm:$0xff]  }
 0x4de   :  { %2329 = vmatprep.subr.bf16.mxu0 %v4982_v48  ;;  %2566 = vmatprep.subr.bf16.mxu1 %v5030_v16  ;;  %v5057_v48 = vld [vmem:[#allocation16 + $0x94] ss:$8 sps:$4 sm:$0xff]  }
 0x4e1   :  { %2330 = vmatpush1.bf16.msra.mxu0 %v4980_v49  ;;  %2567 = vmatpush1.bf16.msra.mxu1 %v5028_v17  ;;  %v5055_v49 = vld [vmem:[#allocation16 + $0x90] ss:$8 sps:$4 sm:$0xff]  }
 0x4e2   :  { %2331 = vmatprep.subr.bf16.mxu0 %v4985_v50  ;;  %2568 = vmatprep.subr.bf16.mxu1 %v5033_v18  ;;  %v5060_v50 = vld [vmem:[#allocation16 + $0x84] ss:$8 sps:$4 sm:$0xff]  }
 0x4e5   :  { %2332 = vmatpush1.bf16.msra.mxu0 %v4983_v51  ;;  %2569 = vmatpush1.bf16.msra.mxu1 %v5031_v19  ;;  %v5058_v51 = vld [vmem:[#allocation16 + $0x80] ss:$8 sps:$4 sm:$0xff]  }
 0x4e6   :  { %2333 = vmatprep.subr.bf16.mxu0 %v4988_v52  ;;  %2570 = vmatprep.subr.bf16.mxu1 %v5036_v20  ;;  %v5061_v52 = vld [vmem:[#allocation17 + $0x70] ss:$8 sps:$4 sm:$0xff]  }
 0x4e9   :  { %2334 = vmatpush1.bf16.msra.mxu0 %v4986_v53  ;;  %2571 = vmatpush1.bf16.msra.mxu1 %v5034_v21  ;;  %v5063_v53 = vld [vmem:[#allocation17 + $0x74] ss:$8 sps:$4 sm:$0xff]  }
 0x4ea   :  { %2335 = vmatprep.subr.bf16.mxu0 %v4991_v54  ;;  %2572 = vmatprep.subr.bf16.mxu1 %v5039_v22  ;;  %v5066_v54 = vld [vmem:[#allocation17 + $0x64] ss:$8 sps:$4 sm:$0xff]   ;;  %v5105_v22 = vld [vmem:[#allocation17 + $0x94] ss:$8 sps:$4 sm:$0xff]  }
 0x4ed   :  { %2336 = vmatpush2.bf16.msra.mxu0 %v4989_v55  ;;  %2573 = vmatpush2.bf16.msra.mxu1 %v5037_v23  ;;  %v5064_v55 = vld [vmem:[#allocation17 + $0x60] ss:$8 sps:$4 sm:$0xff]   ;;  %v5103_v23 = vld [vmem:[#allocation17 + $0x90] ss:$8 sps:$4 sm:$0xff]  }
 0x4ee   :  { %2337 = vmatprep.subr.bf16.mxu0 %v4994_v56  ;;  %2574 = vmatprep.subr.bf16.mxu1 %v5042_v24  ;;  %v5069_v56 = vld [vmem:[#allocation17 + $0x54] ss:$8 sps:$4 sm:$0xff]   ;;  %v5108_v24 = vld [vmem:[#allocation17 + $0x84] ss:$8 sps:$4 sm:$0xff]  }
 0x4f1   :  { %2338 = vmatpush2.bf16.msra.mxu0 %v4992_v57  ;;  %2575 = vmatpush2.bf16.msra.mxu1 %v5040_v25  ;;  %v5067_v57 = vld [vmem:[#allocation17 + $0x50] ss:$8 sps:$4 sm:$0xff]   ;;  %v5106_v25 = vld [vmem:[#allocation17 + $0x80] ss:$8 sps:$4 sm:$0xff]  }
 0x4f2   :  { %2339 = vmatprep.subr.bf16.mxu0 %v4997_v58  ;;  %2576 = vmatprep.subr.bf16.mxu1 %v5045_v26  ;;  %v5072_v58 = vld [vmem:[#allocation17 + $0x44] ss:$8 sps:$4 sm:$0xff]   ;;  %v5109_v26 = vld [vmem:[#allocation19 + $0x70] ss:$8 sps:$4 sm:$0xff]  }
 0x4f5   :  { %2340 = vmatpush2.bf16.msra.mxu0 %v4995_v59  ;;  %2577 = vmatpush2.bf16.msra.mxu1 %v5043_v27  ;;  %v5070_v59 = vld [vmem:[#allocation17 + $0x40] ss:$8 sps:$4 sm:$0xff]   ;;  %v5111_v27 = vld [vmem:[#allocation19 + $0x74] ss:$8 sps:$4 sm:$0xff]  }
 0x4f6   :  { %2341 = vmatprep.subr.bf16.mxu0 %v5000_v60  ;;  %2578 = vmatprep.subr.bf16.mxu1 %v5048_v28  ;;  %v5075_v60 = vld [vmem:[#allocation17 + $0x34] ss:$8 sps:$4 sm:$0xff]   ;;  %v5114_v28 = vld [vmem:[#allocation19 + $0x64] ss:$8 sps:$4 sm:$0xff]  }
 0x4f9   :  { %2342 = vmatpush2.bf16.msra.mxu0 %v4998_v61  ;;  %2579 = vmatpush2.bf16.msra.mxu1 %v5046_v29  ;;  %v5073_v61 = vld [vmem:[#allocation17 + $0x30] ss:$8 sps:$4 sm:$0xff]   ;;  %v5112_v29 = vld [vmem:[#allocation19 + $0x60] ss:$8 sps:$4 sm:$0xff]  }
 0x4fa   :  { %2343 = vmatprep.subr.bf16.mxu0 %v5003_v62  ;;  %2580 = vmatprep.subr.bf16.mxu1 %v5051_v30  ;;  %v5078_v62 = vld [vmem:[#allocation17 + $0x24] ss:$8 sps:$4 sm:$0xff]   ;;  %v5117_v30 = vld [vmem:[#allocation19 + $0x54] ss:$8 sps:$4 sm:$0xff]  }
 0x4fd   :  { %2344 = vmatpush2.bf16.msra.mxu0 %v5001_v63  ;;  %2581 = vmatpush2.bf16.msra.mxu1 %v5049_v31  ;;  %v5076_v63 = vld [vmem:[#allocation17 + $0x20] ss:$8 sps:$4 sm:$0xff]   ;;  %v5115_v31 = vld [vmem:[#allocation19 + $0x50] ss:$8 sps:$4 sm:$0xff]  }
 0x4fe   :  { %2345 = vmatprep.subr.bf16.mxu0 %v5006_v0  ;;  %2582 = vmatprep.subr.bf16.mxu1 %v5054_v32  ;;  %v5081_v0 = vld [vmem:[#allocation17 + $0x14] ss:$8 sps:$4 sm:$0xff]   ;;  %v5120_v32 = vld [vmem:[#allocation19 + $0x44] ss:$8 sps:$4 sm:$0xff]  }
 0x501   :  { %2346 = vmatpush2.bf16.msra.mxu0 %v5004_v1  ;;  %2583 = vmatpush2.bf16.msra.mxu1 %v5052_v33  ;;  %v5079_v1 = vld [vmem:[#allocation17 + $0x10] ss:$8 sps:$4 sm:$0xff]   ;;  %v5118_v33 = vld [vmem:[#allocation19 + $0x40] ss:$8 sps:$4 sm:$0xff]  }
 0x502   :  { %2347 = vmatprep.subr.bf16.mxu0 %v5009_v2  ;;  %2584 = vmatprep.subr.bf16.mxu1 %v5057_v48  ;;  %v5084_v2 = vld [vmem:[#allocation17 + $0x4] ss:$8 sps:$4 sm:$0xff]  }
 0x503   :  { %v5144_v48 = vld [vmem:[#allocation19 + $0xc4] ss:$8 sps:$4 sm:$0xff]  }
 0x505   :  { %2348 = vmatpush2.bf16.msra.mxu0 %v5007_v3  ;;  %2585 = vmatpush2.bf16.msra.mxu1 %v5055_v49  ;;  %v5082_v3 = vld [vmem:[#allocation17] ss:$8 sps:$4 sm:$0xff]  }
 0x506   :  { %2349 = vmatprep.subr.bf16.mxu0 %v5012_v4  ;;  %2586 = vmatprep.subr.bf16.mxu1 %v5060_v50  ;;  %v5087_v4 = vld [vmem:[#allocation17 + $0xf4] ss:$8 sps:$4 sm:$0xff]   ;;  %v5142_v49 = vld [vmem:[#allocation19 + $0xc0] ss:$8 sps:$4 sm:$0xff]  }
 0x507   :  { %v5147_v50 = vld [vmem:[#allocation19 + $0xb4] ss:$8 sps:$4 sm:$0xff]  }
 0x509   :  { %2350 = vmatpush2.bf16.msra.mxu0 %v5010_v5  ;;  %2587 = vmatpush2.bf16.msra.mxu1 %v5058_v51  ;;  %v5085_v5 = vld [vmem:[#allocation17 + $0xf0] ss:$8 sps:$4 sm:$0xff]  }
 0x50a   :  { %2793 = vmatprep.subr.bf16.mxu0 %v5063_v53  ;;  %3030 = vmatprep.subr.bf16.mxu1 %v5111_v27  ;;  %v5145_v51 = vld [vmem:[#allocation19 + $0xb0] ss:$8 sps:$4 sm:$0xff]   ;;  %v5148_v53 = vld [vmem:[#allocation19 + $0xa0] ss:$8 sps:$4 sm:$0xff]   ;;  %v5237_v27 = vld [vmem:[#allocation20 + $0x144] ss:$16 sps:$4 sm:$0xff]  }
 0x58c   :  { %v2073_v34 = vpop.f32.mrf.mxu0  ;;  %v2116_v35 = vpop.f32.mrf.mxu1 }
 0x58d   :  { %v2117_v45 = vadd.f32 %v2116_v35, %v2073_v34  ;;  %v5123_v34 = vld [vmem:[#allocation19 + $0x34] ss:$8 sps:$4 sm:$0xff]   ;;  %v5121_v35 = vld [vmem:[#allocation19 + $0x30] ss:$8 sps:$4 sm:$0xff]  }
 0x58e   :  { %v2075_v36 = vpop.f32.mrf.mxu0  ;;  %v2118_v37 = vpop.f32.mrf.mxu1 }
 0x58f   :  { %v2119_v43 = vadd.f32 %v2118_v37, %v2075_v36  ;;  %v5126_v36 = vld [vmem:[#allocation19 + $0x24] ss:$8 sps:$4 sm:$0xff]   ;;  %v5124_v37 = vld [vmem:[#allocation19 + $0x20] ss:$8 sps:$4 sm:$0xff]  }
 0x590   :  { %v2077_v38 = vpop.f32.mrf.mxu0  ;;  %v2120_v39 = vpop.f32.mrf.mxu1 }
 0x591   :  { %v2121_v40 = vadd.f32 %v2120_v39, %v2077_v38  ;;  %v5129_v38 = vld [vmem:[#allocation19 + $0x14] ss:$8 sps:$4 sm:$0xff]   ;;  %v5127_v39 = vld [vmem:[#allocation19 + $0x10] ss:$8 sps:$4 sm:$0xff]  }
 0x592   :  { %v2079_v41 = vpop.f32.mrf.mxu0  ;;  %v2122_v42 = vpop.f32.mrf.mxu1 }
 0x593   :  { %v2123_v44 = vadd.f32 %v2122_v42, %v2079_v41  ;;  %v2125_v47 = vpack.c.bf16 %v2121_v40, %v2117_v45  ;;  %v5132_v40 = vld [vmem:[#allocation19 + $0x4] ss:$8 sps:$4 sm:$0xff]   ;;  %v5130_v41 = vld [vmem:[#allocation19] ss:$8 sps:$4 sm:$0xff]   ;;  %v5135_v42 = vld [vmem:[#allocation19 + $0xf4] ss:$8 sps:$4 sm:$0xff]  }
 0x594   :  { %v5136_v45 = vld [vmem:[#allocation19 + $0xe0] ss:$8 sps:$4 sm:$0xff]  }
 0x595   :  { %v2126_v46 = vpack.c.bf16 %v2123_v44, %v2119_v43  ;;  %v5133_v43 = vld [vmem:[#allocation19 + $0xf0] ss:$8 sps:$4 sm:$0xff]   ;;  %v5138_v44 = vld [vmem:[#allocation19 + $0xe4] ss:$8 sps:$4 sm:$0xff]  }
 0x597   :  { %2351 = vmatprep.mubr.bf16.mxu0 %v2126_v46  ;;  %v5141_v46 = vld [vmem:[#allocation19 + $0xd4] ss:$8 sps:$4 sm:$0xff]  }
 0x598   :  { %2352 = vmatmul.mubr.bf16.vlgmr.msra.gmra.mxu0 %v2125_v47  ;;  %v5139_v47 = vld [vmem:[#allocation19 + $0xd0] ss:$8 sps:$4 sm:$0xff]  }
 0x599   :  { %2794 = vmatpush1.bf16.msra.mxu0 %v5061_v52  ;;  %v5150_v52 = vld [vmem:[#allocation19 + $0xa4] ss:$8 sps:$4 sm:$0xff]  }
 0x59a   :  { %2795 = vmatprep.subr.bf16.mxu0 %v5066_v54 }
 0x59d   :  { %2796 = vmatpush1.bf16.msra.mxu0 %v5064_v55 }
 0x59e   :  { %2797 = vmatprep.subr.bf16.mxu0 %v5069_v56 }
 0x5a1   :  { %2798 = vmatpush1.bf16.msra.mxu0 %v5067_v57 }
 0x5a2   :  { %2799 = vmatprep.subr.bf16.mxu0 %v5072_v58 }
 0x5a5   :  { %2800 = vmatpush1.bf16.msra.mxu0 %v5070_v59 }
 0x5a6   :  { %2801 = vmatprep.subr.bf16.mxu0 %v5075_v60  ;;  %v5153_v60 = vld [vmem:[#allocation19 + $0x94] ss:$8 sps:$4 sm:$0xff]  }
 0x5a9   :  { %2802 = vmatpush1.bf16.msra.mxu0 %v5073_v61  ;;  %v5151_v61 = vld [vmem:[#allocation19 + $0x90] ss:$8 sps:$4 sm:$0xff]  }
 0x5aa   :  { %2803 = vmatprep.subr.bf16.mxu0 %v5078_v62  ;;  %v5156_v62 = vld [vmem:[#allocation19 + $0x84] ss:$8 sps:$4 sm:$0xff]  }
 0x5ad   :  { %2804 = vmatpush1.bf16.msra.mxu0 %v5076_v63  ;;  %v5154_v63 = vld [vmem:[#allocation19 + $0x80] ss:$8 sps:$4 sm:$0xff]  }
 0x5ae   :  { %2805 = vmatprep.subr.bf16.mxu0 %v5081_v0  ;;  %v5157_v0 = vld [vmem:[#allocation20 + $0xe0] ss:$16 sps:$4 sm:$0xff]  }
 0x5b1   :  { %2806 = vmatpush1.bf16.msra.mxu0 %v5079_v1  ;;  %v5159_v1 = vld [vmem:[#allocation20 + $0xe4] ss:$16 sps:$4 sm:$0xff]  }
 0x5b2   :  { %2807 = vmatprep.subr.bf16.mxu0 %v5084_v2  ;;  %v5162_v2 = vld [vmem:[#allocation20 + $0xec] ss:$16 sps:$4 sm:$0xff]  }
 0x5b5   :  { %2808 = vmatpush1.bf16.msra.mxu0 %v5082_v3  ;;  %v5165_v3 = vld [vmem:[#allocation20 + $0xc4] ss:$16 sps:$4 sm:$0xff]  }
 0x5b6   :  { %2809 = vmatprep.subr.bf16.mxu0 %v5087_v4  ;;  %v5163_v4 = vld [vmem:[#allocation20 + $0xc0] ss:$16 sps:$4 sm:$0xff]  }
 0x5b9   :  { %2810 = vmatpush2.bf16.msra.mxu0 %v5085_v5  ;;  %v5171_v5 = vld [vmem:[#allocation20 + $0xa4] ss:$16 sps:$4 sm:$0xff]  }
 0x5ba   :  { %2811 = vmatprep.subr.bf16.mxu0 %v5090_v6  ;;  %v5169_v6 = vld [vmem:[#allocation20 + $0xa0] ss:$16 sps:$4 sm:$0xff]  }
 0x5bd   :  { %2812 = vmatpush2.bf16.msra.mxu0 %v5088_v7  ;;  %v5177_v7 = vld [vmem:[#allocation20 + $0x84] ss:$16 sps:$4 sm:$0xff]  }
 0x5be   :  { %2813 = vmatprep.subr.bf16.mxu0 %v5093_v8  ;;  %v5175_v8 = vld [vmem:[#allocation20 + $0x80] ss:$16 sps:$4 sm:$0xff]  }
 0x5c1   :  { %2814 = vmatpush2.bf16.msra.mxu0 %v5091_v9  ;;  %v5183_v9 = vld [vmem:[#allocation20 + $0x64] ss:$16 sps:$4 sm:$0xff]  }
 0x5c2   :  { %2815 = vmatprep.subr.bf16.mxu0 %v5096_v10  ;;  %v5181_v10 = vld [vmem:[#allocation20 + $0x60] ss:$16 sps:$4 sm:$0xff]  }
 0x5c5   :  { %2816 = vmatpush2.bf16.msra.mxu0 %v5094_v11  ;;  %v5189_v11 = vld [vmem:[#allocation20 + $0x44] ss:$16 sps:$4 sm:$0xff]  }
 0x5c6   :  { %2817 = vmatprep.subr.bf16.mxu0 %v5099_v12  ;;  %v5187_v12 = vld [vmem:[#allocation20 + $0x40] ss:$16 sps:$4 sm:$0xff]  }
 0x5c9   :  { %2818 = vmatpush2.bf16.msra.mxu0 %v5097_v13  ;;  %v5195_v13 = vld [vmem:[#allocation20 + $0x24] ss:$16 sps:$4 sm:$0xff]  }
 0x5ca   :  { %2819 = vmatprep.subr.bf16.mxu0 %v5102_v14  ;;  %v5193_v14 = vld [vmem:[#allocation20 + $0x20] ss:$16 sps:$4 sm:$0xff]  }
 0x5cd   :  { %2820 = vmatpush2.bf16.msra.mxu0 %v5100_v15  ;;  %v5201_v15 = vld [vmem:[#allocation20 + $0x4] ss:$16 sps:$4 sm:$0xff]  }
 0x5ce   :  { %2821 = vmatprep.subr.bf16.mxu0 %v5105_v22  ;;  %v5217_v22 = vld [vmem:[#allocation20 + $0x1a0] ss:$16 sps:$4 sm:$0xff]  }
 0x5d1   :  { %2822 = vmatpush2.bf16.msra.mxu0 %v5103_v23  ;;  %v5225_v23 = vld [vmem:[#allocation20 + $0x184] ss:$16 sps:$4 sm:$0xff]  }
 0x5d2   :  { %2823 = vmatprep.subr.bf16.mxu0 %v5108_v24  ;;  %v5223_v24 = vld [vmem:[#allocation20 + $0x180] ss:$16 sps:$4 sm:$0xff]  }
 0x5d5   :  { %2824 = vmatpush2.bf16.msra.mxu0 %v5106_v25  ;;  %v5231_v25 = vld [vmem:[#allocation20 + $0x164] ss:$16 sps:$4 sm:$0xff]  }
 0x5d6   :  { %3459 = vmatprep.subr.bf16.mxu0 %v5159_v1  ;;  %v5244_v1 = vld [vmem:[#allocation20 + $0x128] ss:$16 sps:$4 sm:$0xff]  }
 0x658   :  { %v2353_v16 = vpop.f32.mrf.mxu0 }
 0x65a   :  { %v2355_v17 = vpop.f32.mrf.mxu0 }
 0x65c   :  { %v2357_v18 = vpop.f32.mrf.mxu0 }
 0x65d   :  { %v2362_v21 = vpack.c.bf16 %v2357_v18, %v2353_v16  ;;  %v5199_v16 = vld [vmem:[#allocation20] ss:$16 sps:$4 sm:$0xff]  }
 0x65e   :  { %v2359_v19 = vpop.f32.mrf.mxu0  ;;  %v5205_v18 = vld [vmem:[#allocation20 + $0x1e0] ss:$16 sps:$4 sm:$0xff]  }
 0x65f   :  { %v2363_v20 = vpack.c.bf16 %v2359_v19, %v2355_v17  ;;  %v5207_v17 = vld [vmem:[#allocation20 + $0x1e4] ss:$16 sps:$4 sm:$0xff]  }
 0x660   :  { %v5213_v19 = vld [vmem:[#allocation20 + $0x1c4] ss:$16 sps:$4 sm:$0xff]  }
 0x661   :  { %2588 = vmatprep.mubr.bf16.mxu1 %v2363_v20  ;;  %v5211_v20 = vld [vmem:[#allocation20 + $0x1c0] ss:$16 sps:$4 sm:$0xff]  }
 0x662   :  { %2589 = vmatmul.mubr.bf16.vlgmr.msra.gmra.mxu1 %v2362_v21  ;;  %v5219_v21 = vld [vmem:[#allocation20 + $0x1a4] ss:$16 sps:$4 sm:$0xff]  }
 0x663   :  { %3031 = vmatpush1.bf16.msra.mxu1 %v5109_v26  ;;  %v5229_v26 = vld [vmem:[#allocation20 + $0x160] ss:$16 sps:$4 sm:$0xff]  }
 0x664   :  { %3032 = vmatprep.subr.bf16.mxu1 %v5114_v28  ;;  %v5235_v28 = vld [vmem:[#allocation20 + $0x140] ss:$16 sps:$4 sm:$0xff]  }
 0x667   :  { %3033 = vmatpush1.bf16.msra.mxu1 %v5112_v29 }
 0x668   :  { %3034 = vmatprep.subr.bf16.mxu1 %v5117_v30 }
 0x66b   :  { %3035 = vmatpush1.bf16.msra.mxu1 %v5115_v31 }
 0x66c   :  { %3036 = vmatprep.subr.bf16.mxu1 %v5120_v32 }
 0x66f   :  { %3037 = vmatpush1.bf16.msra.mxu1 %v5118_v33 }
 0x670   :  { %3038 = vmatprep.subr.bf16.mxu1 %v5123_v34  ;;  %v5160_v34 = vld [vmem:[#allocation20 + $0xe8] ss:$16 sps:$4 sm:$0xff]  }
 0x673   :  { %3039 = vmatpush1.bf16.msra.mxu1 %v5121_v35 }
 0x674   :  { %3040 = vmatprep.subr.bf16.mxu1 %v5126_v36  ;;  %v5168_v36 = vld [vmem:[#allocation20 + $0xcc] ss:$16 sps:$4 sm:$0xff]  }
 0x677   :  { %3041 = vmatpush1.bf16.msra.mxu1 %v5124_v37  ;;  %v5166_v37 = vld [vmem:[#allocation20 + $0xc8] ss:$16 sps:$4 sm:$0xff]  }
 0x678   :  { %3042 = vmatprep.subr.bf16.mxu1 %v5129_v38  ;;  %v5174_v38 = vld [vmem:[#allocation20 + $0xac] ss:$16 sps:$4 sm:$0xff]  }
 0x67b   :  { %3043 = vmatpush1.bf16.msra.mxu1 %v5127_v39  ;;  %v5172_v39 = vld [vmem:[#allocation20 + $0xa8] ss:$16 sps:$4 sm:$0xff]  }
 0x67c   :  { %3044 = vmatprep.subr.bf16.mxu1 %v5132_v40  ;;  %v5180_v40 = vld [vmem:[#allocation20 + $0x8c] ss:$16 sps:$4 sm:$0xff]  }
 0x67f   :  { %3045 = vmatpush1.bf16.msra.mxu1 %v5130_v41  ;;  %v5178_v41 = vld [vmem:[#allocation20 + $0x88] ss:$16 sps:$4 sm:$0xff]  }
 0x680   :  { %3046 = vmatprep.subr.bf16.mxu1 %v5135_v42  ;;  %v5186_v42 = vld [vmem:[#allocation20 + $0x6c] ss:$16 sps:$4 sm:$0xff]  }
 0x683   :  { %3047 = vmatpush2.bf16.msra.mxu1 %v5133_v43  ;;  %v5184_v43 = vld [vmem:[#allocation20 + $0x68] ss:$16 sps:$4 sm:$0xff]  }
 0x684   :  { %3048 = vmatprep.subr.bf16.mxu1 %v5138_v44  ;;  %v5192_v44 = vld [vmem:[#allocation20 + $0x4c] ss:$16 sps:$4 sm:$0xff]  }
 0x687   :  { %3049 = vmatpush2.bf16.msra.mxu1 %v5136_v45  ;;  %v5190_v45 = vld [vmem:[#allocation20 + $0x48] ss:$16 sps:$4 sm:$0xff]  }
 0x688   :  { %3050 = vmatprep.subr.bf16.mxu1 %v5141_v46  ;;  %v5198_v46 = vld [vmem:[#allocation20 + $0x2c] ss:$16 sps:$4 sm:$0xff]  }
 0x68b   :  { %3051 = vmatpush2.bf16.msra.mxu1 %v5139_v47  ;;  %v5196_v47 = vld [vmem:[#allocation20 + $0x28] ss:$16 sps:$4 sm:$0xff]  }
 0x68c   :  { %3052 = vmatprep.subr.bf16.mxu1 %v5144_v48  ;;  %v5204_v48 = vld [vmem:[#allocation20 + $0xc] ss:$16 sps:$4 sm:$0xff]  }
 0x68f   :  { %3053 = vmatpush2.bf16.msra.mxu1 %v5142_v49  ;;  %v5202_v49 = vld [vmem:[#allocation20 + $0x8] ss:$16 sps:$4 sm:$0xff]  }
 0x690   :  { %3054 = vmatprep.subr.bf16.mxu1 %v5147_v50  ;;  %v5210_v50 = vld [vmem:[#allocation20 + $0x1ec] ss:$16 sps:$4 sm:$0xff]  }
 0x693   :  { %3055 = vmatpush2.bf16.msra.mxu1 %v5145_v51  ;;  %v5208_v51 = vld [vmem:[#allocation20 + $0x1e8] ss:$16 sps:$4 sm:$0xff]  }
 0x694   :  { %3056 = vmatprep.subr.bf16.mxu1 %v5150_v52  ;;  %v5216_v52 = vld [vmem:[#allocation20 + $0x1cc] ss:$16 sps:$4 sm:$0xff]  }
 0x697   :  { %3057 = vmatpush2.bf16.msra.mxu1 %v5148_v53  ;;  %v5214_v53 = vld [vmem:[#allocation20 + $0x1c8] ss:$16 sps:$4 sm:$0xff]  }
 0x698   :  { %3058 = vmatprep.subr.bf16.mxu1 %v5153_v60  ;;  %v5240_v60 = vld [vmem:[#allocation20 + $0x14c] ss:$16 sps:$4 sm:$0xff]  }
 0x69b   :  { %3059 = vmatpush2.bf16.msra.mxu1 %v5151_v61  ;;  %v5238_v61 = vld [vmem:[#allocation20 + $0x148] ss:$16 sps:$4 sm:$0xff]  }
 0x69c   :  { %3060 = vmatprep.subr.bf16.mxu1 %v5156_v62  ;;  %v5243_v62 = vld [vmem:[#allocation20 + $0x124] ss:$16 sps:$4 sm:$0xff]  }
 0x69f   :  { %3061 = vmatpush2.bf16.msra.mxu1 %v5154_v63  ;;  %v5246_v63 = vld [vmem:[#allocation20 + $0x12c] ss:$16 sps:$4 sm:$0xff]  }
 0x6a0   :  { %3502 = vmatprep.subr.bf16.mxu1 %v5162_v2  ;;  %v5249_v2 = vld [vmem:[#allocation20 + $0x104] ss:$16 sps:$4 sm:$0xff]  }
 0x722   :  { %v2590_v54 = vpop.f32.mrf.mxu1 }
 0x724   :  { %v2592_v55 = vpop.f32.mrf.mxu1 }
 0x726   :  { %v2594_v56 = vpop.f32.mrf.mxu1 }
 0x727   :  { %v2599_v59 = vpack.c.bf16 %v2594_v56, %v2590_v54  ;;  %v5222_v54 = vld [vmem:[#allocation20 + $0x1ac] ss:$16 sps:$4 sm:$0xff]  }
 0x728   :  { %v2596_v57 = vpop.f32.mrf.mxu1  ;;  %v5228_v56 = vld [vmem:[#allocation20 + $0x18c] ss:$16 sps:$4 sm:$0xff]  }
 0x729   :  { %v2600_v58 = vpack.c.bf16 %v2596_v57, %v2592_v55  ;;  %v5220_v55 = vld [vmem:[#allocation20 + $0x1a8] ss:$16 sps:$4 sm:$0xff]  }
 0x72a   :  { %v5226_v57 = vld [vmem:[#allocation20 + $0x188] ss:$16 sps:$4 sm:$0xff]  }
 0x72b   :  { %2825 = vmatprep.mubr.bf16.mxu0 %v2600_v58  ;;  %v5234_v58 = vld [vmem:[#allocation20 + $0x16c] ss:$16 sps:$4 sm:$0xff]  }
 0x72c   :  { %2826 = vmatmul.mubr.bf16.vlgmr.msra.gmra.mxu0 %v2599_v59  ;;  %v5232_v59 = vld [vmem:[#allocation20 + $0x168] ss:$16 sps:$4 sm:$0xff]  }
 0x72d   :  { %3460 = vmatpush1.bf16.msra.mxu0 %v5157_v0  ;;  %v5241_v0 = vld [vmem:[#allocation20 + $0x120] ss:$16 sps:$4 sm:$0xff]  }
 0x72e   :  { %3461 = vmatprep.subr.bf16.mxu0 %v5165_v3  ;;  %v5252_v3 = vld [vmem:[#allocation20 + $0x10c] ss:$16 sps:$4 sm:$0xff]  }
 0x731   :  { %3462 = vmatpush1.bf16.msra.mxu0 %v5163_v4  ;;  %v5247_v4 = vld [vmem:[#allocation20 + $0x100] ss:$16 sps:$4 sm:$0xff]  }
 0x732   :  { %3463 = vmatprep.subr.bf16.mxu0 %v5171_v5  ;;  %v5250_v5 = vld [vmem:[#allocation20 + $0x108] ss:$16 sps:$4 sm:$0xff]  }
 0x735   :  { %3464 = vmatpush1.bf16.msra.mxu0 %v5169_v6  ;;  %v5255_v6 = vld [vmem:[#allocation22 + $0x74] ss:$8 sps:$4 sm:$0xff]  }
 0x736   :  { %3465 = vmatprep.subr.bf16.mxu0 %v5177_v7  ;;  %v5258_v7 = vld [vmem:[#allocation22 + $0x174] ss:$8 sps:$4 sm:$0xff]  }
 0x739   :  { %3466 = vmatpush1.bf16.msra.mxu0 %v5175_v8 }
 0x73a   :  { %3467 = vmatprep.subr.bf16.mxu0 %v5183_v9 }
 0x73d   :  { %3468 = vmatpush1.bf16.msra.mxu0 %v5181_v10 }
 0x73e   :  { %3469 = vmatprep.subr.bf16.mxu0 %v5189_v11 }
 0x741   :  { %3470 = vmatpush1.bf16.msra.mxu0 %v5187_v12 }
 0x742   :  { %3471 = vmatprep.subr.bf16.mxu0 %v5195_v13  ;;  %v5253_v13 = vld [vmem:[#allocation22 + $0x70] ss:$8 sps:$4 sm:$0xff]  }
 0x745   :  { %3472 = vmatpush1.bf16.msra.mxu0 %v5193_v14  ;;  %v5256_v14 = vld [vmem:[#allocation22 + $0x170] ss:$8 sps:$4 sm:$0xff]  }
 0x746   :  { %3473 = vmatprep.subr.bf16.mxu0 %v5201_v15 }
 0x749   :  { %3474 = vmatpush1.bf16.msra.mxu0 %v5199_v16  ;;  %v5261_v16 = vld [vmem:[#allocation22 + $0x64] ss:$8 sps:$4 sm:$0xff]  }
 0x74a   :  { %3475 = vmatprep.subr.bf16.mxu0 %v5207_v17  ;;  %v5264_v17 = vld [vmem:[#allocation22 + $0x164] ss:$8 sps:$4 sm:$0xff]  }
 0x74d   :  { %3476 = vmatpush2.bf16.msra.mxu0 %v5205_v18  ;;  %v5259_v18 = vld [vmem:[#allocation22 + $0x60] ss:$8 sps:$4 sm:$0xff]  }
 0x74e   :  { %3477 = vmatprep.subr.bf16.mxu0 %v5213_v19  ;;  %v5262_v19 = vld [vmem:[#allocation22 + $0x160] ss:$8 sps:$4 sm:$0xff]  }
 0x751   :  { %3478 = vmatpush2.bf16.msra.mxu0 %v5211_v20  ;;  %v5267_v20 = vld [vmem:[#allocation22 + $0x54] ss:$8 sps:$4 sm:$0xff]  }
 0x752   :  { %3479 = vmatprep.subr.bf16.mxu0 %v5219_v21  ;;  %v5270_v21 = vld [vmem:[#allocation22 + $0x154] ss:$8 sps:$4 sm:$0xff]  }
 0x755   :  { %3480 = vmatpush2.bf16.msra.mxu0 %v5217_v22  ;;  %v5265_v22 = vld [vmem:[#allocation22 + $0x50] ss:$8 sps:$4 sm:$0xff]  }
 0x756   :  { %3481 = vmatprep.subr.bf16.mxu0 %v5225_v23  ;;  %v5268_v23 = vld [vmem:[#allocation22 + $0x150] ss:$8 sps:$4 sm:$0xff]  }
 0x759   :  { %3482 = vmatpush2.bf16.msra.mxu0 %v5223_v24  ;;  %v5273_v24 = vld [vmem:[#allocation22 + $0x44] ss:$8 sps:$4 sm:$0xff]  }
 0x75a   :  { %3483 = vmatprep.subr.bf16.mxu0 %v5231_v25  ;;  %v5276_v25 = vld [vmem:[#allocation22 + $0x144] ss:$8 sps:$4 sm:$0xff]  }
 0x75d   :  { %3484 = vmatpush2.bf16.msra.mxu0 %v5229_v26  ;;  %v5271_v26 = vld [vmem:[#allocation22 + $0x40] ss:$8 sps:$4 sm:$0xff]  }
 0x75e   :  { %3485 = vmatprep.subr.bf16.mxu0 %v5237_v27  ;;  %v5274_v27 = vld [vmem:[#allocation22 + $0x140] ss:$8 sps:$4 sm:$0xff]  }
 0x761   :  { %3486 = vmatpush2.bf16.msra.mxu0 %v5235_v28  ;;  %v5279_v28 = vld [vmem:[#allocation22 + $0x34] ss:$8 sps:$4 sm:$0xff]  }
 0x762   :  { %3487 = vmatprep.subr.bf16.mxu0 %v5243_v62  ;;  %v5325_v62 = vld [vmem:[#allocation22 + $0xb0] ss:$8 sps:$4 sm:$0xff]  }
 0x765   :  { %3488 = vmatpush2.bf16.msra.mxu0 %v5241_v0  ;;  %v5333_v0 = vld [vmem:[#allocation22 + $0xa4] ss:$8 sps:$4 sm:$0xff]  }
 0x766   :  { %3489 = vmatprep.subr.bf16.mxu0 %v5249_v2  ;;  %v5331_v2 = vld [vmem:[#allocation22 + $0xa0] ss:$8 sps:$4 sm:$0xff]  }
 0x769   :  { %3490 = vmatpush2.bf16.msra.mxu0 %v5247_v4  ;;  %v5339_v4 = vld [vmem:[#allocation22 + $0x94] ss:$8 sps:$4 sm:$0xff]  }
 0x76a   :  { %3933 = vmatprep.subr.bf16.mxu0 %v5255_v6  ;;  %v5337_v6 = vld [vmem:[#allocation22 + $0x90] ss:$8 sps:$4 sm:$0xff]  }
 0x7ec   :  { %v2827_v29 = vpop.f32.mrf.mxu0 }
 0x7ee   :  { %v2829_v30 = vpop.f32.mrf.mxu0 }
 0x7f0   :  { %v2831_v31 = vpop.f32.mrf.mxu0 }
 0x7f1   :  { %v2836_v35 = vpack.c.bf16 %v2831_v31, %v2827_v29  ;;  %v5282_v29 = vld [vmem:[#allocation22 + $0x134] ss:$8 sps:$4 sm:$0xff]   ;;  %v5280_v31 = vld [vmem:[#allocation22 + $0x130] ss:$8 sps:$4 sm:$0xff]  }
 0x7f2   :  { %v2833_v32 = vpop.f32.mrf.mxu0 }
 0x7f3   :  { %v2837_v33 = vpack.c.bf16 %v2833_v32, %v2829_v30  ;;  %v5277_v30 = vld [vmem:[#allocation22 + $0x30] ss:$8 sps:$4 sm:$0xff]   ;;  %v5285_v32 = vld [vmem:[#allocation22 + $0x24] ss:$8 sps:$4 sm:$0xff]  }
 0x7f5   :  { %3062 = vmatprep.mubr.bf16.mxu1 %v2837_v33  ;;  %v5288_v33 = vld [vmem:[#allocation22 + $0x124] ss:$8 sps:$4 sm:$0xff]  }
 0x7f6   :  { %3063 = vmatmul.mubr.bf16.vlgmr.msra.gmra.mxu1 %v2836_v35  ;;  %v5286_v35 = vld [vmem:[#allocation22 + $0x120] ss:$8 sps:$4 sm:$0xff]  }
 0x7f7   :  { %3503 = vmatpush1.bf16.msra.mxu1 %v5160_v34  ;;  %v5283_v34 = vld [vmem:[#allocation22 + $0x20] ss:$8 sps:$4 sm:$0xff]  }
 0x7f8   :  { %3504 = vmatprep.subr.bf16.mxu1 %v5168_v36  ;;  %v5291_v36 = vld [vmem:[#allocation22 + $0x14] ss:$8 sps:$4 sm:$0xff]  }
 0x7fb   :  { %3505 = vmatpush1.bf16.msra.mxu1 %v5166_v37  ;;  %v5294_v37 = vld [vmem:[#allocation22 + $0x114] ss:$8 sps:$4 sm:$0xff]  }
 0x7fc   :  { %3506 = vmatprep.subr.bf16.mxu1 %v5174_v38  ;;  %v5289_v38 = vld [vmem:[#allocation22 + $0x10] ss:$8 sps:$4 sm:$0xff]  }
 0x7ff   :  { %3507 = vmatpush1.bf16.msra.mxu1 %v5172_v39  ;;  %v5292_v39 = vld [vmem:[#allocation22 + $0x110] ss:$8 sps:$4 sm:$0xff]  }
 0x800   :  { %3508 = vmatprep.subr.bf16.mxu1 %v5180_v40  ;;  %v5297_v40 = vld [vmem:[#allocation22 + $0x4] ss:$8 sps:$4 sm:$0xff]  }
 0x803   :  { %3509 = vmatpush1.bf16.msra.mxu1 %v5178_v41  ;;  %v5300_v41 = vld [vmem:[#allocation22 + $0x104] ss:$8 sps:$4 sm:$0xff]  }
 0x804   :  { %3510 = vmatprep.subr.bf16.mxu1 %v5186_v42  ;;  %v5295_v42 = vld [vmem:[#allocation22] ss:$8 sps:$4 sm:$0xff]  }
 0x807   :  { %3511 = vmatpush1.bf16.msra.mxu1 %v5184_v43  ;;  %v5298_v43 = vld [vmem:[#allocation22 + $0x100] ss:$8 sps:$4 sm:$0xff]  }
 0x808   :  { %3512 = vmatprep.subr.bf16.mxu1 %v5192_v44  ;;  %v5303_v44 = vld [vmem:[#allocation22 + $0xf4] ss:$8 sps:$4 sm:$0xff]  }
 0x80b   :  { %3513 = vmatpush1.bf16.msra.mxu1 %v5190_v45  ;;  %v5306_v45 = vld [vmem:[#allocation22 + $0x1f4] ss:$8 sps:$4 sm:$0xff]  }
 0x80c   :  { %3514 = vmatprep.subr.bf16.mxu1 %v5198_v46  ;;  %v5301_v46 = vld [vmem:[#allocation22 + $0xf0] ss:$8 sps:$4 sm:$0xff]  }
 0x80f   :  { %3515 = vmatpush1.bf16.msra.mxu1 %v5196_v47  ;;  %v5304_v47 = vld [vmem:[#allocation22 + $0x1f0] ss:$8 sps:$4 sm:$0xff]  }
 0x810   :  { %3516 = vmatprep.subr.bf16.mxu1 %v5204_v48  ;;  %v5309_v48 = vld [vmem:[#allocation22 + $0xe4] ss:$8 sps:$4 sm:$0xff]  }
 0x813   :  { %3517 = vmatpush1.bf16.msra.mxu1 %v5202_v49  ;;  %v5312_v49 = vld [vmem:[#allocation22 + $0x1e4] ss:$8 sps:$4 sm:$0xff]  }
 0x814   :  { %3518 = vmatprep.subr.bf16.mxu1 %v5210_v50  ;;  %v5307_v50 = vld [vmem:[#allocation22 + $0xe0] ss:$8 sps:$4 sm:$0xff]  }
 0x817   :  { %3519 = vmatpush2.bf16.msra.mxu1 %v5208_v51  ;;  %v5310_v51 = vld [vmem:[#allocation22 + $0x1e0] ss:$8 sps:$4 sm:$0xff]  }
 0x818   :  { %3520 = vmatprep.subr.bf16.mxu1 %v5216_v52  ;;  %v5315_v52 = vld [vmem:[#allocation22 + $0xd4] ss:$8 sps:$4 sm:$0xff]  }
 0x81b   :  { %3521 = vmatpush2.bf16.msra.mxu1 %v5214_v53  ;;  %v5318_v53 = vld [vmem:[#allocation22 + $0x1d4] ss:$8 sps:$4 sm:$0xff]  }
 0x81c   :  { %3522 = vmatprep.subr.bf16.mxu1 %v5222_v54  ;;  %v5313_v54 = vld [vmem:[#allocation22 + $0xd0] ss:$8 sps:$4 sm:$0xff]  }
 0x81f   :  { %3523 = vmatpush2.bf16.msra.mxu1 %v5220_v55  ;;  %v5316_v55 = vld [vmem:[#allocation22 + $0x1d0] ss:$8 sps:$4 sm:$0xff]  }
 0x820   :  { %3524 = vmatprep.subr.bf16.mxu1 %v5228_v56  ;;  %v5321_v56 = vld [vmem:[#allocation22 + $0xc4] ss:$8 sps:$4 sm:$0xff]  }
 0x823   :  { %3525 = vmatpush2.bf16.msra.mxu1 %v5226_v57  ;;  %v5324_v57 = vld [vmem:[#allocation22 + $0x1c4] ss:$8 sps:$4 sm:$0xff]  }
 0x824   :  { %3526 = vmatprep.subr.bf16.mxu1 %v5234_v58  ;;  %v5319_v58 = vld [vmem:[#allocation22 + $0xc0] ss:$8 sps:$4 sm:$0xff]  }
 0x827   :  { %3527 = vmatpush2.bf16.msra.mxu1 %v5232_v59  ;;  %v5322_v59 = vld [vmem:[#allocation22 + $0x1c0] ss:$8 sps:$4 sm:$0xff]  }
 0x828   :  { %3528 = vmatprep.subr.bf16.mxu1 %v5240_v60  ;;  %v5327_v60 = vld [vmem:[#allocation22 + $0xb4] ss:$8 sps:$4 sm:$0xff]  }
 0x82b   :  { %3529 = vmatpush2.bf16.msra.mxu1 %v5238_v61  ;;  %v5330_v61 = vld [vmem:[#allocation22 + $0x1b4] ss:$8 sps:$4 sm:$0xff]  }
 0x82c   :  { %3530 = vmatprep.subr.bf16.mxu1 %v5246_v63  ;;  %v5328_v63 = vld [vmem:[#allocation22 + $0x1b0] ss:$8 sps:$4 sm:$0xff]  }
 0x82f   :  { %3531 = vmatpush2.bf16.msra.mxu1 %v5244_v1  ;;  %v5336_v1 = vld [vmem:[#allocation22 + $0x1a4] ss:$8 sps:$4 sm:$0xff]  }
 0x830   :  { %3532 = vmatprep.subr.bf16.mxu1 %v5252_v3  ;;  %v5334_v3 = vld [vmem:[#allocation22 + $0x1a0] ss:$8 sps:$4 sm:$0xff]  }
 0x833   :  { %3533 = vmatpush2.bf16.msra.mxu1 %v5250_v5  ;;  %v5342_v5 = vld [vmem:[#allocation22 + $0x194] ss:$8 sps:$4 sm:$0xff]  }
 0x834   :  { %3976 = vmatprep.subr.bf16.mxu1 %v5258_v7  ;;  %v5340_v7 = vld [vmem:[#allocation22 + $0x190] ss:$8 sps:$4 sm:$0xff]  }
 0x8b6   :  { %v3064_v8 = vpop.f32.mrf.mxu1 }
 0x8b8   :  { %v3066_v9 = vpop.f32.mrf.mxu1 }
 0x8ba   :  { %v3068_v10 = vpop.f32.mrf.mxu1 }
 0x8bb   :  { %v3073_v15 = vpack.c.bf16 %v3068_v10, %v3064_v8  ;;  %v5345_v8 = vld [vmem:[#allocation22 + $0x84] ss:$8 sps:$4 sm:$0xff]   ;;  %v5343_v10 = vld [vmem:[#allocation22 + $0x80] ss:$8 sps:$4 sm:$0xff]  }
 0x8bc   :  { %v3070_v11 = vpop.f32.mrf.mxu1 }
 0x8bd   :  { %v3074_v12 = vpack.c.bf16 %v3070_v11, %v3066_v9  ;;  %v5348_v9 = vld [vmem:[#allocation22 + $0x184] ss:$8 sps:$4 sm:$0xff]   ;;  %v5346_v11 = vld [vmem:[#allocation22 + $0x180] ss:$8 sps:$4 sm:$0xff]  }
 0x8bf   :  { %3491 = vmatprep.mubr.bf16.mxu0 %v3074_v12  ;;  %3534 = vmatprep.mubr.bf16.mxu1 %v3074_v12 }
 0x8c0   :  { %3492 = vmatmul.mubr.bf16.vlgmr.msra.gmra.mxu0 %v3073_v15  ;;  %3535 = vmatmul.mubr.bf16.vlgmr.msra.gmra.mxu1 %v3073_v15 }
 0x8c1   :  { %3934 = vmatpush1.bf16.msra.mxu0 %v5253_v13  ;;  %3977 = vmatpush1.bf16.msra.mxu1 %v5256_v14 }
 0x8c2   :  { %3935 = vmatprep.subr.bf16.mxu0 %v5261_v16  ;;  %3978 = vmatprep.subr.bf16.mxu1 %v5264_v17 }
 0x8c5   :  { %3936 = vmatpush1.bf16.msra.mxu0 %v5259_v18  ;;  %3979 = vmatpush1.bf16.msra.mxu1 %v5262_v19 }
 0x8c6   :  { %3937 = vmatprep.subr.bf16.mxu0 %v5267_v20  ;;  %3980 = vmatprep.subr.bf16.mxu1 %v5270_v21 }
 0x8c9   :  { %3938 = vmatpush1.bf16.msra.mxu0 %v5265_v22  ;;  %3981 = vmatpush1.bf16.msra.mxu1 %v5268_v23 }
 0x8ca   :  { %3939 = vmatprep.subr.bf16.mxu0 %v5273_v24  ;;  %3982 = vmatprep.subr.bf16.mxu1 %v5276_v25 }
 0x8cd   :  { %3940 = vmatpush1.bf16.msra.mxu0 %v5271_v26  ;;  %3983 = vmatpush1.bf16.msra.mxu1 %v5274_v27 }
 0x8ce   :  { %3941 = vmatprep.subr.bf16.mxu0 %v5279_v28  ;;  %3984 = vmatprep.subr.bf16.mxu1 %v5282_v29 }
 0x8d1   :  { %3942 = vmatpush1.bf16.msra.mxu0 %v5277_v30  ;;  %3985 = vmatpush1.bf16.msra.mxu1 %v5280_v31 }
 0x8d2   :  { %3943 = vmatprep.subr.bf16.mxu0 %v5285_v32  ;;  %3986 = vmatprep.subr.bf16.mxu1 %v5288_v33 }
 0x8d5   :  { %3944 = vmatpush1.bf16.msra.mxu0 %v5283_v34  ;;  %3987 = vmatpush1.bf16.msra.mxu1 %v5286_v35 }
 0x8d6   :  { %3945 = vmatprep.subr.bf16.mxu0 %v5291_v36  ;;  %3988 = vmatprep.subr.bf16.mxu1 %v5294_v37 }
 0x8d9   :  { %3946 = vmatpush1.bf16.msra.mxu0 %v5289_v38  ;;  %3989 = vmatpush1.bf16.msra.mxu1 %v5292_v39 }
 0x8da   :  { %3947 = vmatprep.subr.bf16.mxu0 %v5297_v40  ;;  %3990 = vmatprep.subr.bf16.mxu1 %v5300_v41 }
 0x8dd   :  { %3948 = vmatpush1.bf16.msra.mxu0 %v5295_v42  ;;  %3991 = vmatpush1.bf16.msra.mxu1 %v5298_v43 }
 0x8de   :  { %3949 = vmatprep.subr.bf16.mxu0 %v5303_v44  ;;  %3992 = vmatprep.subr.bf16.mxu1 %v5306_v45 }
 0x8e1   :  { %3950 = vmatpush2.bf16.msra.mxu0 %v5301_v46  ;;  %3993 = vmatpush2.bf16.msra.mxu1 %v5304_v47 }
 0x8e2   :  { %3951 = vmatprep.subr.bf16.mxu0 %v5309_v48  ;;  %3994 = vmatprep.subr.bf16.mxu1 %v5312_v49 }
 0x8e5   :  { %3952 = vmatpush2.bf16.msra.mxu0 %v5307_v50  ;;  %3995 = vmatpush2.bf16.msra.mxu1 %v5310_v51 }
 0x8e6   :  { %3953 = vmatprep.subr.bf16.mxu0 %v5315_v52  ;;  %3996 = vmatprep.subr.bf16.mxu1 %v5318_v53 }
 0x8e9   :  { %3954 = vmatpush2.bf16.msra.mxu0 %v5313_v54  ;;  %3997 = vmatpush2.bf16.msra.mxu1 %v5316_v55 }
 0x8ea   :  { %3955 = vmatprep.subr.bf16.mxu0 %v5321_v56  ;;  %3998 = vmatprep.subr.bf16.mxu1 %v5324_v57 }
 0x8ed   :  { %3956 = vmatpush2.bf16.msra.mxu0 %v5319_v58  ;;  %3999 = vmatpush2.bf16.msra.mxu1 %v5322_v59 }
 0x8ee   :  { %3957 = vmatprep.subr.bf16.mxu0 %v5327_v60  ;;  %4000 = vmatprep.subr.bf16.mxu1 %v5330_v61 }
 0x8f1   :  { %3958 = vmatpush2.bf16.msra.mxu0 %v5325_v62  ;;  %4001 = vmatpush2.bf16.msra.mxu1 %v5328_v63 }
 0x8f2   :  { %3959 = vmatprep.subr.bf16.mxu0 %v5333_v0  ;;  %4002 = vmatprep.subr.bf16.mxu1 %v5336_v1 }
 0x8f5   :  { %3960 = vmatpush2.bf16.msra.mxu0 %v5331_v2  ;;  %4003 = vmatpush2.bf16.msra.mxu1 %v5334_v3 }
 0x8f6   :  { %3961 = vmatprep.subr.bf16.mxu0 %v5339_v4  ;;  %4004 = vmatprep.subr.bf16.mxu1 %v5342_v5 }
 0x8f9   :  { %3962 = vmatpush2.bf16.msra.mxu0 %v5337_v6  ;;  %4005 = vmatpush2.bf16.msra.mxu1 %v5340_v7 }
 0x8fa   :  { %3963 = vmatprep.subr.bf16.mxu0 %v5345_v8  ;;  %4006 = vmatprep.subr.bf16.mxu1 %v5348_v9 }
 0x8fd   :  { %3964 = vmatpush2.bf16.msra.mxu0 %v5343_v10  ;;  %4007 = vmatpush2.bf16.msra.mxu1 %v5346_v11 }
 0x980   :  { %v3493_v12 = vpop.f32.mrf.mxu0  ;;  %v3536_v13 = vpop.f32.mrf.mxu1 }
 0x982   :  { %v3495_v14 = vpop.f32.mrf.mxu0  ;;  %v3538_v15 = vpop.f32.mrf.mxu1 }
 0x984   :  { %v3497_v16 = vpop.f32.mrf.mxu0  ;;  %v3540_v17 = vpop.f32.mrf.mxu1 }
 0x985   :  { %v3545_v22 = vpack.c.bf16 %v3497_v16, %v3493_v12  ;;  %v3547_v23 = vpack.c.bf16 %v3540_v17, %v3536_v13 }
 0x986   :  { %v3499_v18 = vpop.f32.mrf.mxu0  ;;  %v3542_v19 = vpop.f32.mrf.mxu1 }
 0x987   :  { %v3546_v20 = vpack.c.bf16 %v3499_v18, %v3495_v14  ;;  %v3548_v21 = vpack.c.bf16 %v3542_v19, %v3538_v15 }
 0x989   :  { %3965 = vmatprep.mubr.bf16.mxu0 %v3546_v20  ;;  %4008 = vmatprep.mubr.bf16.mxu1 %v3548_v21 }
 0x98a   :  { %3966 = vmatmul.mubr.bf16.vlgmr.msra.gmra.mxu0 %v3545_v22  ;;  %4009 = vmatmul.mubr.bf16.vlgmr.msra.gmra.mxu1 %v3547_v23 }
 0xa4a   :  { %v3967_v24 = vpop.f32.mrf.mxu0  ;;  %v4010_v25 = vpop.f32.mrf.mxu1 }
 0xa4b   :  { %v4011_v26 = vadd.f32 %v4010_v25, %v3967_v24 }
 0xa4c   :  { %v3969_v27 = vpop.f32.mrf.mxu0  ;;  %v4012_v28 = vpop.f32.mrf.mxu1 }
 0xa4d   :  { %4019 = vst [vmem:[#allocation23] sm:$0xff] %v4011_v26  ;;  %v4013_v29 = vadd.f32 %v4012_v28, %v3969_v27 }
 0xa4e   :  { %v3971_v30 = vpop.f32.mrf.mxu0  ;;  %v4014_v31 = vpop.f32.mrf.mxu1 }
 0xa4f   :  { %4020 = vst [vmem:[#allocation23 + $0x8] sm:$0xff] %v4013_v29  ;;  %v4015_v32 = vadd.f32 %v4014_v31, %v3971_v30 }
 0xa50   :  { %v3973_v33 = vpop.f32.mrf.mxu0  ;;  %v4016_v34 = vpop.f32.mrf.mxu1 }
 0xa51   :  { %4021 = vst [vmem:[#allocation23 + $0x10] sm:$0xff] %v4015_v32  ;;  %v4017_v35 = vadd.f32 %v4016_v34, %v3973_v33 }
 0xa53   :  { %4022 = vst [vmem:[#allocation23 + $0x18] sm:$0xff] %v4017_v35 }
 0xa54   :  { %5620 = shalt.err (!%p5617_p13)
}
 0xa55   :  { %4034 = dma.vmem_to_hbm [thread:$0]  %s4029_s12, 512, %s5830_s13, [#allocation4], %s5650_s1, %s5650_s1, %s5651_s23  }
 0xa56   :  { %5643 = dma.done.wait [#allocation4], 512  }
 0xa57   :  { %5644 = vsyncadd [#allocation4], 4294966784 }
 0xa58   :  { %4038 = vsyncpa [#allocation3], 1 }
 0xa59   :  { %4039 = vsyncpa [#allocation6], 1 }
 0xa5a   :  { %4040 = vsyncpa [#allocation9], 1 }
 0xa5b   :  { %4041 = vsyncpa [#allocation12], 1 }
 0xa5c   :  { %4042 = vsyncpa [#allocation15], 1 }
 0xa5d   :  { %4043 = vsyncpa [#allocation18], 1 }
 0xa5e   :  { %4044 = vsyncpa [#allocation21], 1 }
 0xa5f   :  { %4045 = vsyncpa [#allocation4], 1 }

// kernel: tpu_custom_call.1
= control target key start
LH: loop header
LB: loop body
LE: loop exit
PB: predicated region body
PF: predicated region fallthrough
CT: control target
= control target key end

     0   :  { %18 = vsyncpa [#allocation3], 0  ;;  %s5817_s0 = inlined_call_operand.hbm [shape: bf16[16,256], index: 0, kind: input, shape index: {}]   ;;  %s5818_s1 = inlined_call_operand.hbm [shape: bf16[256,256], index: 1, kind: input, shape index: {}]   ;;  %s5819_s2 = inlined_call_operand.hbm [shape: bf16[256,256], index: 2, kind: input, shape index: {}]   ;;  %s5820_s3 = inlined_call_operand.hbm [shape: bf16[256,256], index: 3, kind: input, shape index: {}]   ;;  %s5821_s4 = inlined_call_operand.hbm [shape: bf16[256,256], index: 4, kind: input, shape index: {}]   ;;  %s5822_s5 = inlined_call_operand.hbm [shape: bf16[256,512], index: 5, kind: input, shape index: {}]   ;;  %s5823_s6 = inlined_call_operand.hbm [shape: bf16[512,256], index: 6, kind: input, shape index: {}]   ;;  %s5824_s7 = inlined_call_operand.hbm [shape: bf16[256,256], index: 7, kind: input, shape index: {}]   ;;  %s5825_s8 = inlined_call_operand.hbm [shape: bf16[256,256], index: 8, kind: input, shape index: {}]   ;;  %s5826_s9 = inlined_call_operand.hbm [shape: bf16[256,256], index: 9, kind: input, shape index: {}]   ;;  %s5827_s10 = inlined_call_operand.hbm [shape: bf16[256,256], index: 10, kind: input, shape index: {}]   ;;  %s5828_s11 = inlined_call_operand.hbm [shape: bf16[256,512], index: 11, kind: input, shape index: {}]   ;;  %s5829_s12 = inlined_call_operand.hbm [shape: bf16[512,256], index: 12, kind: input, shape index: {}]   ;;  %s5830_s13 = inlined_call_operand.hbm [shape: f32[16,256], index: 13, kind: output, shape index: {}]  }
   0x1   :  { %19 = vsyncpa [#allocation6], 0 }
   0x2   :  { %20 = vsyncpa [#allocation9], 0 }
   0x3   :  { %21 = vsyncpa [#allocation12], 0 }
   0x4   :  { %22 = vsyncpa [#allocation15], 0 }
   0x5   :  { %23 = vsyncpa [#allocation18], 0 }
   0x6   :  { %24 = vsyncpa [#allocation21], 0 }
   0x7   :  { %25 = vsyncpa [#allocation4], 0  ;;  %s5645_s25 = smov [#allocation5]   ;;  %s5646_s27 = smov [#allocation8]  }
   0x8   :  { %s43_s26 = sshll.u32 %s5645_s25, 4  ;;  %s67_s28 = sshll.u32 %s5646_s27, 4  ;;  %s44_s26 = int_to_ptr.vmem [resolvable:$true] %s43_s26  ;;  %s68_s28 = int_to_ptr.vmem [resolvable:$true] %s67_s28 }
   0x9   :  { %s5357_s29 = scalar_lea.vmem %s44_s26, 4096  ;;  %p5362_p1 = scmp.lt.s32.totalorder %s44_s26, %s44_s26 }
   0xa   :  { %p5358_p0 = scmp.ne.s32.totalorder %s44_s26, %s5357_s29  ;;  %p5363_p2 = scmp.lt.s32.totalorder %s5357_s29, %s5357_s29 }
   0xc   :  { %p5364_p3 = por %p5363_p2, %p5362_p1 }
   0xe   :  { %p5365_p4 = pnand %p5364_p3, %p5358_p0 }
  0x10   :  { %5368 = shalt.err (!%p5365_p4)
}
  0x11   :  { %s5647_s30 = smov 128   ;;  %s5648_s14 = smov 8  }
  0x12   :  { %49 = dma.hbm_to_vmem [thread:$0]  %s5818_s1, 4096, %s44_s26, [#allocation6], %s5647_s30, %s5647_s30, %s5648_s14  }
  0x13   :  { %s5377_s17 = scalar_lea.vmem %s68_s28, 4096  ;;  %p5382_p6 = scmp.lt.s32.totalorder %s68_s28, %s68_s28 }
  0x14   :  { %p5378_p5 = scmp.ne.s32.totalorder %s68_s28, %s5377_s17  ;;  %p5383_p7 = scmp.lt.s32.totalorder %s5377_s17, %s5377_s17 }
  0x16   :  { %p5384_p8 = por %p5383_p7, %p5382_p6 }
  0x18   :  { %p5385_p9 = pnand %p5384_p8, %p5378_p5 }
  0x1a   :  { %5388 = shalt.err (!%p5385_p9)
}
  0x1b   :  { %73 = dma.hbm_to_vmem [thread:$0]  %s5820_s3, 4096, %s68_s28, [#allocation9], %s5647_s30, %s5647_s30, %s5648_s14  }
  0x1c   :  { %s5649_s20 = smov [#allocation11]  }
  0x1d   :  { %s91_s21 = sshll.u32 %s5649_s20, 4  ;;  %s92_s21 = int_to_ptr.vmem [resolvable:$true] %s91_s21 }
  0x1e   :  { %s5397_s22 = scalar_lea.vmem %s92_s21, 8192  ;;  %p5402_p11 = scmp.lt.s32.totalorder %s92_s21, %s92_s21 }
  0x1f   :  { %p5398_p10 = scmp.ne.s32.totalorder %s92_s21, %s5397_s22  ;;  %p5403_p12 = scmp.lt.s32.totalorder %s5397_s22, %s5397_s22 }
  0x21   :  { %p5404_p13 = por %p5403_p12, %p5402_p11 }
  0x23   :  { %p5405_p0 = pnand %p5404_p13, %p5398_p10 }
  0x25   :  { %5408 = shalt.err (!%p5405_p0)
}
  0x26   :  { %s5650_s1 = smov 256   ;;  %s5651_s23 = smov 16  }
  0x27   :  { %97 = dma.hbm_to_vmem [thread:$0]  %s5822_s5, 8192, %s92_s21, [#allocation12], %s5650_s1, %s5650_s1, %s5651_s23  }
  0x28   :  { %s5652_s3 = smov [#allocation14]   ;;  %s5653_s27 = smov [#allocation17]  }
  0x29   :  { %s115_s26 = sshll.u32 %s5652_s3, 4  ;;  %s139_s28 = sshll.u32 %s5653_s27, 4  ;;  %s116_s26 = int_to_ptr.vmem [resolvable:$true] %s115_s26  ;;  %s140_s28 = int_to_ptr.vmem [resolvable:$true] %s139_s28 }
  0x2a   :  { %s5417_s29 = scalar_lea.vmem %s116_s26, 4096  ;;  %p5422_p2 = scmp.lt.s32.totalorder %s116_s26, %s116_s26 }
  0x2b   :  { %p5418_p1 = scmp.ne.s32.totalorder %s116_s26, %s5417_s29  ;;  %p5423_p3 = scmp.lt.s32.totalorder %s5417_s29, %s5417_s29 }
  0x2d   :  { %p5424_p4 = por %p5423_p3, %p5422_p2 }
  0x2f   :  { %p5425_p5 = pnand %p5424_p4, %p5418_p1 }
  0x31   :  { %5428 = shalt.err (!%p5425_p5)
}
  0x32   :  { %121 = dma.hbm_to_vmem [thread:$0]  %s5824_s7, 4096, %s116_s26, [#allocation15], %s5647_s30, %s5647_s30, %s5648_s14  }
  0x33   :  { %s5437_s5 = scalar_lea.vmem %s140_s28, 4096  ;;  %p5442_p7 = scmp.lt.s32.totalorder %s140_s28, %s140_s28 }
  0x34   :  { %p5438_p6 = scmp.ne.s32.totalorder %s140_s28, %s5437_s5  ;;  %p5443_p8 = scmp.lt.s32.totalorder %s5437_s5, %s5437_s5 }
  0x36   :  { %p5444_p9 = por %p5443_p8, %p5442_p7 }
  0x38   :  { %p5445_p10 = pnand %p5444_p9, %p5438_p6 }
  0x3a   :  { %5448 = shalt.err (!%p5445_p10)
}
  0x3b   :  { %145 = dma.hbm_to_vmem [thread:$0]  %s5826_s9, 4096, %s140_s28, [#allocation18], %s5647_s30, %s5647_s30, %s5648_s14  }
  0x3c   :  { %s5654_s19 = smov [#allocation20]   ;;  %s5655_s21 = smov [#allocation2]  }
  0x3d   :  { %s163_s20 = sshll.u32 %s5654_s19, 4  ;;  %s31_s7 = sshll.u32 %s5655_s21, 4  ;;  %s164_s20 = int_to_ptr.vmem [resolvable:$true] %s163_s20  ;;  %s32_s7 = int_to_ptr.vmem [resolvable:$true] %s31_s7 }
  0x3e   :  { %s5457_s22 = scalar_lea.vmem %s164_s20, 8192  ;;  %p5462_p12 = scmp.lt.s32.totalorder %s164_s20, %s164_s20 }
  0x3f   :  { %p5458_p11 = scmp.ne.s32.totalorder %s164_s20, %s5457_s22  ;;  %p5463_p13 = scmp.lt.s32.totalorder %s5457_s22, %s5457_s22 }
  0x41   :  { %p5464_p0 = por %p5463_p13, %p5462_p12 }
  0x43   :  { %p5465_p1 = pnand %p5464_p0, %p5458_p11 }
  0x45   :  { %5468 = shalt.err (!%p5465_p1)
}
  0x46   :  { %169 = dma.hbm_to_vmem [thread:$0]  %s5828_s11, 8192, %s164_s20, [#allocation21], %s5650_s1, %s5650_s1, %s5651_s23  }
  0x47   :  { %s5477_s9 = scalar_lea.vmem %s32_s7, 256  ;;  %p5482_p3 = scmp.lt.s32.totalorder %s32_s7, %s32_s7 }
  0x48   :  { %p5478_p2 = scmp.ne.s32.totalorder %s32_s7, %s5477_s9  ;;  %p5483_p4 = scmp.lt.s32.totalorder %s5477_s9, %s5477_s9 }
  0x4a   :  { %p5484_p5 = por %p5483_p4, %p5482_p3 }
  0x4c   :  { %p5485_p6 = pnand %p5484_p5, %p5478_p2 }
  0x4e   :  { %5488 = shalt.err (!%p5485_p6)
}
  0x4f   :  { %37 = dma.hbm_to_vmem [thread:$0]  %s5817_s0, 256, %s32_s7, [#allocation3], %s5647_s30, %s5647_s30, %s5648_s14  }
  0x50   :  { %s5656_s27 = smov [#allocation7]   ;;  %s5657_s29 = smov [#allocation10]  }
  0x51   :  { %s55_s28 = sshll.u32 %s5656_s27, 4  ;;  %s79_s11 = sshll.u32 %s5657_s29, 4  ;;  %s56_s28 = int_to_ptr.vmem [resolvable:$true] %s55_s28  ;;  %s80_s11 = int_to_ptr.vmem [resolvable:$true] %s79_s11 }
  0x52   :  { %s5497_s15 = scalar_lea.vmem %s56_s28, 4096  ;;  %p5502_p8 = scmp.lt.s32.totalorder %s56_s28, %s56_s28 }
  0x53   :  { %p5498_p7 = scmp.ne.s32.totalorder %s56_s28, %s5497_s15  ;;  %p5503_p9 = scmp.lt.s32.totalorder %s5497_s15, %s5497_s15 }
  0x55   :  { %p5504_p10 = por %p5503_p9, %p5502_p8 }
  0x57   :  { %p5505_p11 = pnand %p5504_p10, %p5498_p7 }
  0x59   :  { %5508 = shalt.err (!%p5505_p11)
}
  0x5a   :  { %61 = dma.hbm_to_vmem [thread:$0]  %s5819_s2, 4096, %s56_s28, [#allocation6], %s5647_s30, %s5647_s30, %s5648_s14  }
  0x5b   :  { %s5517_s0 = scalar_lea.vmem %s80_s11, 4096  ;;  %p5522_p13 = scmp.lt.s32.totalorder %s80_s11, %s80_s11 }
  0x5c   :  { %p5518_p12 = scmp.ne.s32.totalorder %s80_s11, %s5517_s0  ;;  %p5523_p0 = scmp.lt.s32.totalorder %s5517_s0, %s5517_s0 }
  0x5e   :  { %p5524_p1 = por %p5523_p0, %p5522_p13 }
  0x60   :  { %p5525_p2 = pnand %p5524_p1, %p5518_p12 }
  0x62   :  { %5528 = shalt.err (!%p5525_p2)
}
  0x63   :  { %85 = dma.hbm_to_vmem [thread:$0]  %s5821_s4, 4096, %s80_s11, [#allocation9], %s5647_s30, %s5647_s30, %s5648_s14  }
  0x64   :  { %s5658_s19 = smov [#allocation13]   ;;  %s5659_s21 = smov [#allocation16]  }
  0x65   :  { %s103_s20 = sshll.u32 %s5658_s19, 4  ;;  %s127_s2 = sshll.u32 %s5659_s21, 4  ;;  %s104_s20 = int_to_ptr.vmem [resolvable:$true] %s103_s20  ;;  %s128_s2 = int_to_ptr.vmem [resolvable:$true] %s127_s2 }
  0x66   :  { %s5537_s7 = scalar_lea.vmem %s104_s20, 8192  ;;  %p5542_p4 = scmp.lt.s32.totalorder %s104_s20, %s104_s20 }
  0x67   :  { %p5538_p3 = scmp.ne.s32.totalorder %s104_s20, %s5537_s7  ;;  %p5543_p5 = scmp.lt.s32.totalorder %s5537_s7, %s5537_s7 }
  0x69   :  { %p5544_p6 = por %p5543_p5, %p5542_p4 }
  0x6b   :  { %p5545_p7 = pnand %p5544_p6, %p5538_p3 }
  0x6d   :  { %5548 = shalt.err (!%p5545_p7)
}
  0x6e   :  { %109 = dma.hbm_to_vmem [thread:$0]  %s5823_s6, 8192, %s104_s20, [#allocation12], %s5647_s30, %s5647_s30, %s5648_s14  }
  0x6f   :  { %s5557_s4 = scalar_lea.vmem %s128_s2, 4096  ;;  %p5562_p9 = scmp.lt.s32.totalorder %s128_s2, %s128_s2 }
  0x70   :  { %p5558_p8 = scmp.ne.s32.totalorder %s128_s2, %s5557_s4  ;;  %p5563_p10 = scmp.lt.s32.totalorder %s5557_s4, %s5557_s4 }
  0x72   :  { %p5564_p11 = por %p5563_p10, %p5562_p9 }
  0x74   :  { %p5565_p12 = pnand %p5564_p11, %p5558_p8 }
  0x76   :  { %5568 = shalt.err (!%p5565_p12)
}
  0x77   :  { %133 = dma.hbm_to_vmem [thread:$0]  %s5825_s8, 4096, %s128_s2, [#allocation15], %s5647_s30, %s5647_s30, %s5648_s14  }
  0x78   :  { %s5660_s3 = smov [#allocation19]   ;;  %s5661_s27 = smov [#allocation22]  }
  0x79   :  { %s151_s26 = sshll.u32 %s5660_s3, 4  ;;  %s175_s6 = sshll.u32 %s5661_s27, 4  ;;  %s152_s26 = int_to_ptr.vmem [resolvable:$true] %s151_s26  ;;  %s176_s6 = int_to_ptr.vmem [resolvable:$true] %s175_s6 }
  0x7a   :  { %s5577_s28 = scalar_lea.vmem %s152_s26, 4096  ;;  %p5582_p0 = scmp.lt.s32.totalorder %s152_s26, %s152_s26 }
  0x7b   :  { %p5578_p13 = scmp.ne.s32.totalorder %s152_s26, %s5577_s28  ;;  %p5583_p1 = scmp.lt.s32.totalorder %s5577_s28, %s5577_s28 }
  0x7d   :  { %p5584_p2 = por %p5583_p1, %p5582_p0 }
  0x7f   :  { %p5585_p3 = pnand %p5584_p2, %p5578_p13 }
  0x81   :  { %5588 = shalt.err (!%p5585_p3)
}
  0x82   :  { %157 = dma.hbm_to_vmem [thread:$0]  %s5827_s10, 4096, %s152_s26, [#allocation18], %s5647_s30, %s5647_s30, %s5648_s14  }
  0x83   :  { %s5597_s8 = scalar_lea.vmem %s176_s6, 8192  ;;  %p5602_p5 = scmp.lt.s32.totalorder %s176_s6, %s176_s6 }
  0x84   :  { %p5598_p4 = scmp.ne.s32.totalorder %s176_s6, %s5597_s8  ;;  %p5603_p6 = scmp.lt.s32.totalorder %s5597_s8, %s5597_s8 }
  0x86   :  { %p5604_p7 = por %p5603_p6, %p5602_p5 }
  0x88   :  { %p5605_p8 = pnand %p5604_p7, %p5598_p4 }
  0x8a   :  { %5608 = shalt.err (!%p5605_p8)
}
  0x8b   :  { %181 = dma.hbm_to_vmem [thread:$0]  %s5829_s12, 8192, %s176_s6, [#allocation21], %s5647_s30, %s5647_s30, %s5648_s14  }
  0x8c   :  { %5629 = dma.done.wait [#allocation3], 256  }
  0x8d   :  { %5630 = vsyncadd [#allocation3], 4294967040 }
  0x8e   :  { %5631 = dma.done.wait [#allocation6], 8192  }
  0x8f   :  { %5632 = vsyncadd [#allocation6], 4294959104 }
  0x90   :  { %5633 = dma.done.wait [#allocation9], 8192  }
  0x91   :  { %5634 = vsyncadd [#allocation9], 4294959104 }
  0x92   :  { %5635 = dma.done.wait [#allocation12], 16384  }
  0x93   :  { %5636 = vsyncadd [#allocation12], 4294950912 }
  0x94   :  { %5637 = dma.done.wait [#allocation15], 8192  }
  0x95   :  { %5638 = vsyncadd [#allocation15], 4294959104 }
  0x96   :  { %5639 = dma.done.wait [#allocation18], 8192  }
  0x97   :  { %5640 = vsyncadd [#allocation18], 4294959104 }
  0x98   :  { %5641 = dma.done.wait [#allocation21], 16384  }
  0x99   :  { %5642 = vsyncadd [#allocation21], 4294950912  ;;  %v4578_v0 = vld [vmem:[#allocation5 + $0x74] ss:$8 sps:$4 sm:$0xff]   ;;  %v4580_v1 = vld [vmem:[#allocation5 + $0x70] ss:$8 sps:$4 sm:$0xff]  }
  0x9a   :  { %425 = vmatprep.subr.bf16.mxu0 %v4578_v0  ;;  %v4581_v2 = vld [vmem:[#allocation5 + $0x64] ss:$8 sps:$4 sm:$0xff]   ;;  %v4583_v3 = vld [vmem:[#allocation5 + $0x60] ss:$8 sps:$4 sm:$0xff]   ;;  %v4584_v4 = vld [vmem:[#allocation5 + $0x54] ss:$8 sps:$4 sm:$0xff]  }
  0x9b   :  { %426 = vmatpush1.bf16.msra.mxu0 %v4580_v1  ;;  %v4586_v5 = vld [vmem:[#allocation5 + $0x50] ss:$8 sps:$4 sm:$0xff]   ;;  %v4587_v6 = vld [vmem:[#allocation5 + $0x44] ss:$8 sps:$4 sm:$0xff]   ;;  %v4589_v7 = vld [vmem:[#allocation5 + $0x40] ss:$8 sps:$4 sm:$0xff]  }
  0x9c   :  { %427 = vmatprep.subr.bf16.mxu0 %v4581_v2  ;;  %v4590_v8 = vld [vmem:[#allocation5 + $0x34] ss:$8 sps:$4 sm:$0xff]   ;;  %v4592_v9 = vld [vmem:[#allocation5 + $0x30] ss:$8 sps:$4 sm:$0xff]   ;;  %v4593_v10 = vld [vmem:[#allocation5 + $0x24] ss:$8 sps:$4 sm:$0xff]  }
  0x9d   :  { %v4595_v11 = vld [vmem:[#allocation5 + $0x20] ss:$8 sps:$4 sm:$0xff]   ;;  %v4596_v12 = vld [vmem:[#allocation5 + $0x14] ss:$8 sps:$4 sm:$0xff]   ;;  %v4598_v13 = vld [vmem:[#allocation5 + $0x10] ss:$8 sps:$4 sm:$0xff]  }
  0x9e   :  { %v4599_v14 = vld [vmem:[#allocation5 + $0x4] ss:$8 sps:$4 sm:$0xff]   ;;  %v4628_v15 = vld [vmem:[#allocation2 + $0x4] ss:$8 sps:$4 sm:$0xff]   ;;  %v4631_v17 = vld [vmem:[#allocation7 + $0x70] ss:$8 sps:$4 sm:$0xff]  }
  0x9f   :  { %428 = vmatpush1.bf16.msra.mxu0 %v4583_v3  ;;  %v4629_v16 = vld [vmem:[#allocation7 + $0x74] ss:$8 sps:$4 sm:$0xff]   ;;  %457 = vmatprep.mubr.bf16.mxu0 %v4628_v15  ;;  %v4632_v18 = vld [vmem:[#allocation7 + $0x64] ss:$8 sps:$4 sm:$0xff]   ;;  %v4634_v19 = vld [vmem:[#allocation7 + $0x60] ss:$8 sps:$4 sm:$0xff]  }
  0xa0   :  { %429 = vmatprep.subr.bf16.mxu0 %v4584_v4  ;;  %662 = vmatprep.subr.bf16.mxu1 %v4629_v16  ;;  %v4601_v20 = vld [vmem:[#allocation5] ss:$8 sps:$4 sm:$0xff]   ;;  %v4635_v21 = vld [vmem:[#allocation7 + $0x54] ss:$8 sps:$4 sm:$0xff]   ;;  %v4637_v23 = vld [vmem:[#allocation7 + $0x50] ss:$8 sps:$4 sm:$0xff]  }
  0xa1   :  { %663 = vmatpush1.bf16.msra.mxu1 %v4631_v17  ;;  %v4602_v22 = vld [vmem:[#allocation5 + $0xf4] ss:$8 sps:$4 sm:$0xff]   ;;  %v4604_v24 = vld [vmem:[#allocation5 + $0xf0] ss:$8 sps:$4 sm:$0xff]   ;;  %v4638_v25 = vld [vmem:[#allocation7 + $0x44] ss:$8 sps:$4 sm:$0xff]  }
  0xa2   :  { %664 = vmatprep.subr.bf16.mxu1 %v4632_v18  ;;  %v4605_v26 = vld [vmem:[#allocation5 + $0xe4] ss:$8 sps:$4 sm:$0xff]   ;;  %v4640_v27 = vld [vmem:[#allocation7 + $0x40] ss:$8 sps:$4 sm:$0xff]   ;;  %v4641_v29 = vld [vmem:[#allocation7 + $0x34] ss:$8 sps:$4 sm:$0xff]  }
  0xa3   :  { %430 = vmatpush1.bf16.msra.mxu0 %v4586_v5  ;;  %v4607_v28 = vld [vmem:[#allocation5 + $0xe0] ss:$8 sps:$4 sm:$0xff]   ;;  %v4608_v30 = vld [vmem:[#allocation5 + $0xd4] ss:$8 sps:$4 sm:$0xff]   ;;  %v4610_v31 = vld [vmem:[#allocation5 + $0xd0] ss:$8 sps:$4 sm:$0xff]  }
  0xa4   :  { %431 = vmatprep.subr.bf16.mxu0 %v4587_v6  ;;  %v4643_v32 = vld [vmem:[#allocation7 + $0x30] ss:$8 sps:$4 sm:$0xff]   ;;  %v4611_v33 = vld [vmem:[#allocation5 + $0xc4] ss:$8 sps:$4 sm:$0xff]   ;;  %v4646_v35 = vld [vmem:[#allocation7 + $0x20] ss:$8 sps:$4 sm:$0xff]  }
  0xa5   :  { %665 = vmatpush1.bf16.msra.mxu1 %v4634_v19  ;;  %v4644_v34 = vld [vmem:[#allocation7 + $0x24] ss:$8 sps:$4 sm:$0xff]   ;;  %v4613_v36 = vld [vmem:[#allocation5 + $0xc0] ss:$8 sps:$4 sm:$0xff]   ;;  %v4647_v37 = vld [vmem:[#allocation7 + $0x14] ss:$8 sps:$4 sm:$0xff]  }
  0xa6   :  { %666 = vmatprep.subr.bf16.mxu1 %v4635_v21  ;;  %v4614_v38 = vld [vmem:[#allocation5 + $0xb4] ss:$8 sps:$4 sm:$0xff]   ;;  %v4649_v39 = vld [vmem:[#allocation7 + $0x10] ss:$8 sps:$4 sm:$0xff]   ;;  %v4650_v41 = vld [vmem:[#allocation7 + $0x4] ss:$8 sps:$4 sm:$0xff]  }
  0xa7   :  { %432 = vmatpush1.bf16.msra.mxu0 %v4589_v7  ;;  %v4616_v40 = vld [vmem:[#allocation5 + $0xb0] ss:$8 sps:$4 sm:$0xff]   ;;  %v4617_v42 = vld [vmem:[#allocation5 + $0xa4] ss:$8 sps:$4 sm:$0xff]   ;;  %v4652_v43 = vld [vmem:[#allocation7] ss:$8 sps:$4 sm:$0xff]  }
  0xa8   :  { %433 = vmatprep.subr.bf16.mxu0 %v4590_v8  ;;  %v4619_v44 = vld [vmem:[#allocation5 + $0xa0] ss:$8 sps:$4 sm:$0xff]   ;;  %v4653_v45 = vld [vmem:[#allocation7 + $0xf4] ss:$8 sps:$4 sm:$0xff]   ;;  %v4655_v47 = vld [vmem:[#allocation7 + $0xf0] ss:$8 sps:$4 sm:$0xff]  }
  0xa9   :  { %667 = vmatpush1.bf16.msra.mxu1 %v4637_v23  ;;  %v4620_v46 = vld [vmem:[#allocation5 + $0x94] ss:$8 sps:$4 sm:$0xff]   ;;  %v4622_v48 = vld [vmem:[#allocation5 + $0x90] ss:$8 sps:$4 sm:$0xff]   ;;  %v4656_v49 = vld [vmem:[#allocation7 + $0xe4] ss:$8 sps:$4 sm:$0xff]  }
  0xaa   :  { %668 = vmatprep.subr.bf16.mxu1 %v4638_v25  ;;  %v4623_v50 = vld [vmem:[#allocation5 + $0x84] ss:$8 sps:$4 sm:$0xff]   ;;  %v4658_v51 = vld [vmem:[#allocation7 + $0xe0] ss:$8 sps:$4 sm:$0xff]   ;;  %v4659_v53 = vld [vmem:[#allocation7 + $0xd4] ss:$8 sps:$4 sm:$0xff]  }
  0xab   :  { %434 = vmatpush1.bf16.msra.mxu0 %v4592_v9  ;;  %v4625_v52 = vld [vmem:[#allocation5 + $0x80] ss:$8 sps:$4 sm:$0xff]   ;;  %v4626_v54 = vld [vmem:[#allocation2] ss:$8 sps:$4 sm:$0xff]   ;;  %v4662_v56 = vld [vmem:[#allocation7 + $0xc4] ss:$8 sps:$4 sm:$0xff]  }
  0xac   :  { %435 = vmatprep.subr.bf16.mxu0 %v4593_v10  ;;  %v4661_v55 = vld [vmem:[#allocation7 + $0xd0] ss:$8 sps:$4 sm:$0xff]   ;;  %v4664_v57 = vld [vmem:[#allocation7 + $0xc0] ss:$8 sps:$4 sm:$0xff]   ;;  %v4665_v58 = vld [vmem:[#allocation7 + $0xb4] ss:$8 sps:$4 sm:$0xff]  }
  0xad   :  { %669 = vmatpush1.bf16.msra.mxu1 %v4640_v27  ;;  %v4667_v59 = vld [vmem:[#allocation7 + $0xb0] ss:$8 sps:$4 sm:$0xff]   ;;  %v4668_v60 = vld [vmem:[#allocation7 + $0xa4] ss:$8 sps:$4 sm:$0xff]   ;;  %v4670_v61 = vld [vmem:[#allocation7 + $0xa0] ss:$8 sps:$4 sm:$0xff]  }
  0xae   :  { %670 = vmatprep.subr.bf16.mxu1 %v4641_v29  ;;  %v4671_v62 = vld [vmem:[#allocation7 + $0x94] ss:$8 sps:$4 sm:$0xff]   ;;  %v4673_v63 = vld [vmem:[#allocation7 + $0x90] ss:$8 sps:$4 sm:$0xff]   ;;  %v4674_v0 = vld [vmem:[#allocation7 + $0x84] ss:$8 sps:$4 sm:$0xff]  }
  0xaf   :  { %436 = vmatpush1.bf16.msra.mxu0 %v4595_v11  ;;  %v4676_v1 = vld [vmem:[#allocation7 + $0x80] ss:$8 sps:$4 sm:$0xff]   ;;  %v4677_v2 = vld [vmem:[#allocation8 + $0x70] ss:$8 sps:$4 sm:$0xff]   ;;  %v4679_v3 = vld [vmem:[#allocation8 + $0x74] ss:$8 sps:$4 sm:$0xff]  }
  0xb0   :  { %437 = vmatprep.subr.bf16.mxu0 %v4596_v12  ;;  %v4682_v4 = vld [vmem:[#allocation8 + $0x64] ss:$8 sps:$4 sm:$0xff]   ;;  %v4680_v5 = vld [vmem:[#allocation8 + $0x60] ss:$8 sps:$4 sm:$0xff]   ;;  %v4685_v6 = vld [vmem:[#allocation8 + $0x54] ss:$8 sps:$4 sm:$0xff]  }
  0xb1   :  { %671 = vmatpush1.bf16.msra.mxu1 %v4643_v32  ;;  %v4683_v7 = vld [vmem:[#allocation8 + $0x50] ss:$8 sps:$4 sm:$0xff]   ;;  %v4688_v8 = vld [vmem:[#allocation8 + $0x44] ss:$8 sps:$4 sm:$0xff]   ;;  %v4686_v9 = vld [vmem:[#allocation8 + $0x40] ss:$8 sps:$4 sm:$0xff]  }
  0xb2   :  { %672 = vmatprep.subr.bf16.mxu1 %v4644_v34  ;;  %v4691_v10 = vld [vmem:[#allocation8 + $0x34] ss:$8 sps:$4 sm:$0xff]   ;;  %v4689_v11 = vld [vmem:[#allocation8 + $0x30] ss:$8 sps:$4 sm:$0xff]   ;;  %v4694_v12 = vld [vmem:[#allocation8 + $0x24] ss:$8 sps:$4 sm:$0xff]  }
  0xb3   :  { %438 = vmatpush1.bf16.msra.mxu0 %v4598_v13  ;;  %v4692_v13 = vld [vmem:[#allocation8 + $0x20] ss:$8 sps:$4 sm:$0xff]   ;;  %v4695_v15 = vld [vmem:[#allocation8 + $0x10] ss:$8 sps:$4 sm:$0xff]   ;;  %v4700_v16 = vld [vmem:[#allocation8 + $0x4] ss:$8 sps:$4 sm:$0xff]  }
  0xb4   :  { %439 = vmatprep.subr.bf16.mxu0 %v4599_v14  ;;  %v4697_v14 = vld [vmem:[#allocation8 + $0x14] ss:$8 sps:$4 sm:$0xff]   ;;  %v4698_v17 = vld [vmem:[#allocation8] ss:$8 sps:$4 sm:$0xff]   ;;  %v4701_v19 = vld [vmem:[#allocation8 + $0xf0] ss:$8 sps:$4 sm:$0xff]  }
  0xb5   :  { %673 = vmatpush1.bf16.msra.mxu1 %v4646_v35  ;;  %v4703_v18 = vld [vmem:[#allocation8 + $0xf4] ss:$8 sps:$4 sm:$0xff]   ;;  %v4704_v21 = vld [vmem:[#allocation8 + $0xe0] ss:$8 sps:$4 sm:$0xff]   ;;  %v4707_v23 = vld [vmem:[#allocation8 + $0xd0] ss:$8 sps:$4 sm:$0xff]  }
  0xb6   :  { %674 = vmatprep.subr.bf16.mxu1 %v4647_v37  ;;  %v4710_v25 = vld [vmem:[#allocation8 + $0xc0] ss:$8 sps:$4 sm:$0xff]   ;;  %v4713_v27 = vld [vmem:[#allocation8 + $0xb0] ss:$8 sps:$4 sm:$0xff]   ;;  %s5662_s10 = smov [#allocation23]  }
  0xb7   :  { %440 = vmatpush1.bf16.msra.mxu0 %v4601_v20  ;;  %v4706_v20 = vld [vmem:[#allocation8 + $0xe4] ss:$8 sps:$4 sm:$0xff]   ;;  %v4716_v29 = vld [vmem:[#allocation8 + $0xa0] ss:$8 sps:$4 sm:$0xff]   ;;  %v4719_v37 = vld [vmem:[#allocation8 + $0x90] ss:$8 sps:$4 sm:$0xff]  }
  0xb8   :  { %441 = vmatprep.subr.bf16.mxu0 %v4602_v22  ;;  %v4709_v22 = vld [vmem:[#allocation8 + $0xd4] ss:$8 sps:$4 sm:$0xff]   ;;  %s4028_s12 = sshll.u32 %s5662_s10, 4  ;;  %s4029_s12 = int_to_ptr.vmem [resolvable:$true] %s4028_s12 }
  0xb9   :  { %675 = vmatpush1.bf16.msra.mxu1 %v4649_v39  ;;  %v4722_v39 = vld [vmem:[#allocation8 + $0x80] ss:$8 sps:$4 sm:$0xff]   ;;  %s5609_s30 = scalar_lea.vmem %s4029_s12, 512  ;;  %p5614_p10 = scmp.lt.s32.totalorder %s4029_s12, %s4029_s12 }
  0xba   :  { %676 = vmatprep.subr.bf16.mxu1 %v4650_v41  ;;  %v4727_v41 = vld [vmem:[#allocation10 + $0x74] ss:$8 sps:$4 sm:$0xff]   ;;  %p5610_p9 = scmp.ne.s32.totalorder %s4029_s12, %s5609_s30  ;;  %p5615_p11 = scmp.lt.s32.totalorder %s5609_s30, %s5609_s30 }
  0xbb   :  { %442 = vmatpush2.bf16.msra.mxu0 %v4604_v24  ;;  %v4712_v24 = vld [vmem:[#allocation8 + $0xc4] ss:$8 sps:$4 sm:$0xff]  }
  0xbc   :  { %443 = vmatprep.subr.bf16.mxu0 %v4605_v26  ;;  %v4715_v26 = vld [vmem:[#allocation8 + $0xb4] ss:$8 sps:$4 sm:$0xff]   ;;  %p5616_p12 = por %p5615_p11, %p5614_p10 }
  0xbd   :  { %677 = vmatpush1.bf16.msra.mxu1 %v4652_v43  ;;  %v4728_v43 = vld [vmem:[#allocation10 + $0x60] ss:$8 sps:$4 sm:$0xff]  }
  0xbe   :  { %678 = vmatprep.subr.bf16.mxu1 %v4653_v45  ;;  %v4731_v45 = vld [vmem:[#allocation10 + $0x50] ss:$8 sps:$4 sm:$0xff]   ;;  %p5617_p13 = pnand %p5616_p12, %p5610_p9 }
  0xbf   :  { %444 = vmatpush2.bf16.msra.mxu0 %v4607_v28  ;;  %v4718_v28 = vld [vmem:[#allocation8 + $0xa4] ss:$8 sps:$4 sm:$0xff]  }
  0xc0   :  { %445 = vmatprep.subr.bf16.mxu0 %v4608_v30 }
  0xc1   :  { %679 = vmatpush2.bf16.msra.mxu1 %v4655_v47  ;;  %v4734_v47 = vld [vmem:[#allocation10 + $0x40] ss:$8 sps:$4 sm:$0xff]  }
  0xc2   :  { %680 = vmatprep.subr.bf16.mxu1 %v4656_v49  ;;  %v4737_v49 = vld [vmem:[#allocation10 + $0x30] ss:$8 sps:$4 sm:$0xff]  }
  0xc3   :  { %446 = vmatpush2.bf16.msra.mxu0 %v4610_v31 }
  0xc4   :  { %447 = vmatprep.subr.bf16.mxu0 %v4611_v33 }
  0xc5   :  { %681 = vmatpush2.bf16.msra.mxu1 %v4658_v51  ;;  %v4740_v51 = vld [vmem:[#allocation10 + $0x20] ss:$8 sps:$4 sm:$0xff]  }
  0xc6   :  { %682 = vmatprep.subr.bf16.mxu1 %v4659_v53  ;;  %v4743_v53 = vld [vmem:[#allocation10 + $0x10] ss:$8 sps:$4 sm:$0xff]  }
  0xc7   :  { %448 = vmatpush2.bf16.msra.mxu0 %v4613_v36  ;;  %v4721_v36 = vld [vmem:[#allocation8 + $0x94] ss:$8 sps:$4 sm:$0xff]  }
  0xc8   :  { %449 = vmatprep.subr.bf16.mxu0 %v4614_v38  ;;  %v4724_v38 = vld [vmem:[#allocation8 + $0x84] ss:$8 sps:$4 sm:$0xff]  }
  0xc9   :  { %683 = vmatpush2.bf16.msra.mxu1 %v4661_v55  ;;  %v4746_v55 = vld [vmem:[#allocation10] ss:$8 sps:$4 sm:$0xff]  }
  0xca   :  { %684 = vmatprep.subr.bf16.mxu1 %v4662_v56  ;;  %v4751_v56 = vld [vmem:[#allocation10 + $0xf4] ss:$8 sps:$4 sm:$0xff]  }
  0xcb   :  { %450 = vmatpush2.bf16.msra.mxu0 %v4616_v40  ;;  %v4725_v40 = vld [vmem:[#allocation10 + $0x70] ss:$8 sps:$4 sm:$0xff]  }
  0xcc   :  { %451 = vmatprep.subr.bf16.mxu0 %v4617_v42  ;;  %v4730_v42 = vld [vmem:[#allocation10 + $0x64] ss:$8 sps:$4 sm:$0xff]  }
  0xcd   :  { %685 = vmatpush2.bf16.msra.mxu1 %v4664_v57  ;;  %v4749_v57 = vld [vmem:[#allocation10 + $0xf0] ss:$8 sps:$4 sm:$0xff]  }
  0xce   :  { %686 = vmatprep.subr.bf16.mxu1 %v4665_v58  ;;  %v4754_v58 = vld [vmem:[#allocation10 + $0xe4] ss:$8 sps:$4 sm:$0xff]  }
  0xcf   :  { %452 = vmatpush2.bf16.msra.mxu0 %v4619_v44  ;;  %v4733_v44 = vld [vmem:[#allocation10 + $0x54] ss:$8 sps:$4 sm:$0xff]  }
  0xd0   :  { %453 = vmatprep.subr.bf16.mxu0 %v4620_v46  ;;  %v4736_v46 = vld [vmem:[#allocation10 + $0x44] ss:$8 sps:$4 sm:$0xff]  }
  0xd1   :  { %687 = vmatpush2.bf16.msra.mxu1 %v4667_v59  ;;  %v4752_v59 = vld [vmem:[#allocation10 + $0xe0] ss:$8 sps:$4 sm:$0xff]  }
  0xd2   :  { %688 = vmatprep.subr.bf16.mxu1 %v4668_v60  ;;  %v4757_v60 = vld [vmem:[#allocation10 + $0xd4] ss:$8 sps:$4 sm:$0xff]  }
  0xd3   :  { %454 = vmatpush2.bf16.msra.mxu0 %v4622_v48  ;;  %v4739_v48 = vld [vmem:[#allocation10 + $0x34] ss:$8 sps:$4 sm:$0xff]  }
  0xd4   :  { %455 = vmatprep.subr.bf16.mxu0 %v4623_v50  ;;  %v4742_v50 = vld [vmem:[#allocation10 + $0x24] ss:$8 sps:$4 sm:$0xff]  }
  0xd5   :  { %689 = vmatpush2.bf16.msra.mxu1 %v4670_v61  ;;  %v4755_v61 = vld [vmem:[#allocation10 + $0xd0] ss:$8 sps:$4 sm:$0xff]  }
  0xd6   :  { %690 = vmatprep.subr.bf16.mxu1 %v4671_v62  ;;  %v4760_v62 = vld [vmem:[#allocation10 + $0xc4] ss:$8 sps:$4 sm:$0xff]  }
  0xd7   :  { %456 = vmatpush2.bf16.msra.mxu0 %v4625_v52  ;;  %v4745_v52 = vld [vmem:[#allocation10 + $0x14] ss:$8 sps:$4 sm:$0xff]  }
  0xd8   :  { %899 = vmatprep.subr.bf16.mxu0 %v4679_v3  ;;  %v4764_v3 = vld [vmem:[#allocation10 + $0xa0] ss:$8 sps:$4 sm:$0xff]  }
  0xd9   :  { %691 = vmatpush2.bf16.msra.mxu1 %v4673_v63  ;;  %v4758_v63 = vld [vmem:[#allocation10 + $0xc0] ss:$8 sps:$4 sm:$0xff]  }
  0xda   :  { %458 = vmatmul.mubr.bf16.vlgmr.msra.gmra.mxu0 %v4626_v54  ;;  %692 = vmatprep.subr.bf16.mxu1 %v4674_v0  ;;  %v4748_v54 = vld [vmem:[#allocation10 + $0x4] ss:$8 sps:$4 sm:$0xff]   ;;  %v4763_v0 = vld [vmem:[#allocation10 + $0xb4] ss:$8 sps:$4 sm:$0xff]  }
  0xdb   :  { %900 = vmatpush1.bf16.msra.mxu0 %v4677_v2  ;;  %v4766_v2 = vld [vmem:[#allocation10 + $0xa4] ss:$8 sps:$4 sm:$0xff]  }
  0xdc   :  { %901 = vmatprep.subr.bf16.mxu0 %v4682_v4 }
  0xdd   :  { %693 = vmatpush2.bf16.msra.mxu1 %v4676_v1  ;;  %v4761_v1 = vld [vmem:[#allocation10 + $0xb0] ss:$8 sps:$4 sm:$0xff]  }
  0xde   :  { %1136 = vmatprep.subr.bf16.mxu1 %v4727_v41  ;;  %v4853_v41 = vld [vmem:[#allocation11 + $0x144] ss:$16 sps:$4 sm:$0xff]  }
  0xdf   :  { %902 = vmatpush1.bf16.msra.mxu0 %v4680_v5 }
  0xe0   :  { %903 = vmatprep.subr.bf16.mxu0 %v4685_v6 }
  0xe3   :  { %904 = vmatpush1.bf16.msra.mxu0 %v4683_v7 }
  0xe4   :  { %905 = vmatprep.subr.bf16.mxu0 %v4688_v8 }
  0xe7   :  { %906 = vmatpush1.bf16.msra.mxu0 %v4686_v9 }
  0xe8   :  { %907 = vmatprep.subr.bf16.mxu0 %v4691_v10  ;;  %v4769_v10 = vld [vmem:[#allocation10 + $0x94] ss:$8 sps:$4 sm:$0xff]  }
  0xeb   :  { %908 = vmatpush1.bf16.msra.mxu0 %v4689_v11  ;;  %v4767_v11 = vld [vmem:[#allocation10 + $0x90] ss:$8 sps:$4 sm:$0xff]  }
  0xec   :  { %909 = vmatprep.subr.bf16.mxu0 %v4694_v12  ;;  %v4772_v12 = vld [vmem:[#allocation10 + $0x84] ss:$8 sps:$4 sm:$0xff]  }
  0xef   :  { %910 = vmatpush1.bf16.msra.mxu0 %v4692_v13  ;;  %v4770_v13 = vld [vmem:[#allocation10 + $0x80] ss:$8 sps:$4 sm:$0xff]  }
  0xf0   :  { %911 = vmatprep.subr.bf16.mxu0 %v4697_v14  ;;  %v4773_v14 = vld [vmem:[#allocation11 + $0xe0] ss:$16 sps:$4 sm:$0xff]  }
  0xf3   :  { %912 = vmatpush1.bf16.msra.mxu0 %v4695_v15  ;;  %v4775_v15 = vld [vmem:[#allocation11 + $0xe4] ss:$16 sps:$4 sm:$0xff]  }
  0xf4   :  { %913 = vmatprep.subr.bf16.mxu0 %v4700_v16  ;;  %v4778_v16 = vld [vmem:[#allocation11 + $0xec] ss:$16 sps:$4 sm:$0xff]  }
  0xf7   :  { %914 = vmatpush1.bf16.msra.mxu0 %v4698_v17  ;;  %v4781_v17 = vld [vmem:[#allocation11 + $0xc4] ss:$16 sps:$4 sm:$0xff]  }
  0xf8   :  { %915 = vmatprep.subr.bf16.mxu0 %v4703_v18  ;;  %v4779_v18 = vld [vmem:[#allocation11 + $0xc0] ss:$16 sps:$4 sm:$0xff]  }
  0xfb   :  { %916 = vmatpush2.bf16.msra.mxu0 %v4701_v19  ;;  %v4787_v19 = vld [vmem:[#allocation11 + $0xa4] ss:$16 sps:$4 sm:$0xff]  }
  0xfc   :  { %917 = vmatprep.subr.bf16.mxu0 %v4706_v20  ;;  %v4785_v20 = vld [vmem:[#allocation11 + $0xa0] ss:$16 sps:$4 sm:$0xff]  }
  0xff   :  { %918 = vmatpush2.bf16.msra.mxu0 %v4704_v21  ;;  %v4793_v21 = vld [vmem:[#allocation11 + $0x84] ss:$16 sps:$4 sm:$0xff]  }
 0x100   :  { %919 = vmatprep.subr.bf16.mxu0 %v4709_v22  ;;  %v4791_v22 = vld [vmem:[#allocation11 + $0x80] ss:$16 sps:$4 sm:$0xff]  }
 0x103   :  { %920 = vmatpush2.bf16.msra.mxu0 %v4707_v23  ;;  %v4799_v23 = vld [vmem:[#allocation11 + $0x64] ss:$16 sps:$4 sm:$0xff]  }
 0x104   :  { %921 = vmatprep.subr.bf16.mxu0 %v4712_v24  ;;  %v4797_v24 = vld [vmem:[#allocation11 + $0x60] ss:$16 sps:$4 sm:$0xff]  }
 0x107   :  { %922 = vmatpush2.bf16.msra.mxu0 %v4710_v25  ;;  %v4805_v25 = vld [vmem:[#allocation11 + $0x44] ss:$16 sps:$4 sm:$0xff]  }
 0x108   :  { %923 = vmatprep.subr.bf16.mxu0 %v4715_v26  ;;  %v4803_v26 = vld [vmem:[#allocation11 + $0x40] ss:$16 sps:$4 sm:$0xff]  }
 0x10b   :  { %924 = vmatpush2.bf16.msra.mxu0 %v4713_v27  ;;  %v4811_v27 = vld [vmem:[#allocation11 + $0x24] ss:$16 sps:$4 sm:$0xff]  }
 0x10c   :  { %925 = vmatprep.subr.bf16.mxu0 %v4718_v28  ;;  %v4809_v28 = vld [vmem:[#allocation11 + $0x20] ss:$16 sps:$4 sm:$0xff]  }
 0x10f   :  { %926 = vmatpush2.bf16.msra.mxu0 %v4716_v29  ;;  %v4817_v29 = vld [vmem:[#allocation11 + $0x4] ss:$16 sps:$4 sm:$0xff]  }
 0x110   :  { %927 = vmatprep.subr.bf16.mxu0 %v4721_v36  ;;  %v4833_v36 = vld [vmem:[#allocation11 + $0x1a0] ss:$16 sps:$4 sm:$0xff]  }
 0x113   :  { %928 = vmatpush2.bf16.msra.mxu0 %v4719_v37  ;;  %v4841_v37 = vld [vmem:[#allocation11 + $0x184] ss:$16 sps:$4 sm:$0xff]  }
 0x114   :  { %929 = vmatprep.subr.bf16.mxu0 %v4724_v38  ;;  %v4839_v38 = vld [vmem:[#allocation11 + $0x180] ss:$16 sps:$4 sm:$0xff]  }
 0x117   :  { %930 = vmatpush2.bf16.msra.mxu0 %v4722_v39  ;;  %v4847_v39 = vld [vmem:[#allocation11 + $0x164] ss:$16 sps:$4 sm:$0xff]  }
 0x118   :  { %1565 = vmatprep.subr.bf16.mxu0 %v4775_v15  ;;  %v4860_v15 = vld [vmem:[#allocation11 + $0x128] ss:$16 sps:$4 sm:$0xff]  }
 0x19a   :  { %v459_v30 = vpop.f32.mrf.mxu0 }
 0x19c   :  { %v461_v31 = vpop.f32.mrf.mxu0 }
 0x19e   :  { %v463_v32 = vpop.f32.mrf.mxu0 }
 0x19f   :  { %v468_v35 = vpack.c.bf16 %v463_v32, %v459_v30  ;;  %v4815_v30 = vld [vmem:[#allocation11] ss:$16 sps:$4 sm:$0xff]  }
 0x1a0   :  { %v465_v33 = vpop.f32.mrf.mxu0  ;;  %v4821_v32 = vld [vmem:[#allocation11 + $0x1e0] ss:$16 sps:$4 sm:$0xff]  }
 0x1a1   :  { %v469_v34 = vpack.c.bf16 %v465_v33, %v461_v31  ;;  %v4823_v31 = vld [vmem:[#allocation11 + $0x1e4] ss:$16 sps:$4 sm:$0xff]  }
 0x1a2   :  { %v4829_v33 = vld [vmem:[#allocation11 + $0x1c4] ss:$16 sps:$4 sm:$0xff]  }
 0x1a3   :  { %694 = vmatprep.mubr.bf16.mxu1 %v469_v34  ;;  %v4827_v34 = vld [vmem:[#allocation11 + $0x1c0] ss:$16 sps:$4 sm:$0xff]  }
 0x1a4   :  { %695 = vmatmul.mubr.bf16.vlgmr.msra.gmra.mxu1 %v468_v35  ;;  %v4835_v35 = vld [vmem:[#allocation11 + $0x1a4] ss:$16 sps:$4 sm:$0xff]  }
 0x1a5   :  { %1137 = vmatpush1.bf16.msra.mxu1 %v4725_v40  ;;  %v4845_v40 = vld [vmem:[#allocation11 + $0x160] ss:$16 sps:$4 sm:$0xff]  }
 0x1a6   :  { %1138 = vmatprep.subr.bf16.mxu1 %v4730_v42  ;;  %v4851_v42 = vld [vmem:[#allocation11 + $0x140] ss:$16 sps:$4 sm:$0xff]  }
 0x1a9   :  { %1139 = vmatpush1.bf16.msra.mxu1 %v4728_v43 }
 0x1aa   :  { %1140 = vmatprep.subr.bf16.mxu1 %v4733_v44 }
 0x1ad   :  { %1141 = vmatpush1.bf16.msra.mxu1 %v4731_v45 }
 0x1ae   :  { %1142 = vmatprep.subr.bf16.mxu1 %v4736_v46 }
 0x1b1   :  { %1143 = vmatpush1.bf16.msra.mxu1 %v4734_v47 }
 0x1b2   :  { %1144 = vmatprep.subr.bf16.mxu1 %v4739_v48  ;;  %v4776_v48 = vld [vmem:[#allocation11 + $0xe8] ss:$16 sps:$4 sm:$0xff]  }
 0x1b5   :  { %1145 = vmatpush1.bf16.msra.mxu1 %v4737_v49 }
 0x1b6   :  { %1146 = vmatprep.subr.bf16.mxu1 %v4742_v50  ;;  %v4784_v50 = vld [vmem:[#allocation11 + $0xcc] ss:$16 sps:$4 sm:$0xff]  }
 0x1b9   :  { %1147 = vmatpush1.bf16.msra.mxu1 %v4740_v51  ;;  %v4782_v51 = vld [vmem:[#allocation11 + $0xc8] ss:$16 sps:$4 sm:$0xff]  }
 0x1ba   :  { %1148 = vmatprep.subr.bf16.mxu1 %v4745_v52  ;;  %v4790_v52 = vld [vmem:[#allocation11 + $0xac] ss:$16 sps:$4 sm:$0xff]  }
 0x1bd   :  { %1149 = vmatpush1.bf16.msra.mxu1 %v4743_v53  ;;  %v4788_v53 = vld [vmem:[#allocation11 + $0xa8] ss:$16 sps:$4 sm:$0xff]  }
 0x1be   :  { %1150 = vmatprep.subr.bf16.mxu1 %v4748_v54  ;;  %v4796_v54 = vld [vmem:[#allocation11 + $0x8c] ss:$16 sps:$4 sm:$0xff]  }
 0x1c1   :  { %1151 = vmatpush1.bf16.msra.mxu1 %v4746_v55  ;;  %v4794_v55 = vld [vmem:[#allocation11 + $0x88] ss:$16 sps:$4 sm:$0xff]  }
 0x1c2   :  { %1152 = vmatprep.subr.bf16.mxu1 %v4751_v56  ;;  %v4802_v56 = vld [vmem:[#allocation11 + $0x6c] ss:$16 sps:$4 sm:$0xff]  }
 0x1c5   :  { %1153 = vmatpush2.bf16.msra.mxu1 %v4749_v57  ;;  %v4800_v57 = vld [vmem:[#allocation11 + $0x68] ss:$16 sps:$4 sm:$0xff]  }
 0x1c6   :  { %1154 = vmatprep.subr.bf16.mxu1 %v4754_v58  ;;  %v4808_v58 = vld [vmem:[#allocation11 + $0x4c] ss:$16 sps:$4 sm:$0xff]  }
 0x1c9   :  { %1155 = vmatpush2.bf16.msra.mxu1 %v4752_v59  ;;  %v4806_v59 = vld [vmem:[#allocation11 + $0x48] ss:$16 sps:$4 sm:$0xff]  }
 0x1ca   :  { %1156 = vmatprep.subr.bf16.mxu1 %v4757_v60  ;;  %v4814_v60 = vld [vmem:[#allocation11 + $0x2c] ss:$16 sps:$4 sm:$0xff]  }
 0x1cd   :  { %1157 = vmatpush2.bf16.msra.mxu1 %v4755_v61  ;;  %v4812_v61 = vld [vmem:[#allocation11 + $0x28] ss:$16 sps:$4 sm:$0xff]  }
 0x1ce   :  { %1158 = vmatprep.subr.bf16.mxu1 %v4760_v62  ;;  %v4820_v62 = vld [vmem:[#allocation11 + $0xc] ss:$16 sps:$4 sm:$0xff]  }
 0x1d1   :  { %1159 = vmatpush2.bf16.msra.mxu1 %v4758_v63  ;;  %v4818_v63 = vld [vmem:[#allocation11 + $0x8] ss:$16 sps:$4 sm:$0xff]  }
 0x1d2   :  { %1160 = vmatprep.subr.bf16.mxu1 %v4763_v0  ;;  %v4826_v0 = vld [vmem:[#allocation11 + $0x1ec] ss:$16 sps:$4 sm:$0xff]  }
 0x1d5   :  { %1161 = vmatpush2.bf16.msra.mxu1 %v4761_v1  ;;  %v4824_v1 = vld [vmem:[#allocation11 + $0x1e8] ss:$16 sps:$4 sm:$0xff]  }
 0x1d6   :  { %1162 = vmatprep.subr.bf16.mxu1 %v4766_v2  ;;  %v4832_v2 = vld [vmem:[#allocation11 + $0x1cc] ss:$16 sps:$4 sm:$0xff]  }
 0x1d9   :  { %1163 = vmatpush2.bf16.msra.mxu1 %v4764_v3  ;;  %v4830_v3 = vld [vmem:[#allocation11 + $0x1c8] ss:$16 sps:$4 sm:$0xff]  }
 0x1da   :  { %1164 = vmatprep.subr.bf16.mxu1 %v4769_v10  ;;  %v4856_v10 = vld [vmem:[#allocation11 + $0x14c] ss:$16 sps:$4 sm:$0xff]  }
 0x1dd   :  { %1165 = vmatpush2.bf16.msra.mxu1 %v4767_v11  ;;  %v4854_v11 = vld [vmem:[#allocation11 + $0x148] ss:$16 sps:$4 sm:$0xff]  }
 0x1de   :  { %1166 = vmatprep.subr.bf16.mxu1 %v4772_v12  ;;  %v4859_v12 = vld [vmem:[#allocation11 + $0x124] ss:$16 sps:$4 sm:$0xff]  }
 0x1e1   :  { %1167 = vmatpush2.bf16.msra.mxu1 %v4770_v13  ;;  %v4862_v13 = vld [vmem:[#allocation11 + $0x12c] ss:$16 sps:$4 sm:$0xff]  }
 0x1e2   :  { %1608 = vmatprep.subr.bf16.mxu1 %v4778_v16  ;;  %v4865_v16 = vld [vmem:[#allocation11 + $0x104] ss:$16 sps:$4 sm:$0xff]  }
 0x264   :  { %v696_v4 = vpop.f32.mrf.mxu1 }
 0x266   :  { %v698_v5 = vpop.f32.mrf.mxu1 }
 0x268   :  { %v700_v6 = vpop.f32.mrf.mxu1 }
 0x269   :  { %v705_v9 = vpack.c.bf16 %v700_v6, %v696_v4  ;;  %v4838_v4 = vld [vmem:[#allocation11 + $0x1ac] ss:$16 sps:$4 sm:$0xff]  }
 0x26a   :  { %v702_v7 = vpop.f32.mrf.mxu1  ;;  %v4844_v6 = vld [vmem:[#allocation11 + $0x18c] ss:$16 sps:$4 sm:$0xff]  }
 0x26b   :  { %v706_v8 = vpack.c.bf16 %v702_v7, %v698_v5  ;;  %v4836_v5 = vld [vmem:[#allocation11 + $0x1a8] ss:$16 sps:$4 sm:$0xff]  }
 0x26c   :  { %v4842_v7 = vld [vmem:[#allocation11 + $0x188] ss:$16 sps:$4 sm:$0xff]  }
 0x26d   :  { %931 = vmatprep.mubr.bf16.mxu0 %v706_v8  ;;  %v4850_v8 = vld [vmem:[#allocation11 + $0x16c] ss:$16 sps:$4 sm:$0xff]  }
 0x26e   :  { %932 = vmatmul.mubr.bf16.vlgmr.msra.gmra.mxu0 %v705_v9  ;;  %v4848_v9 = vld [vmem:[#allocation11 + $0x168] ss:$16 sps:$4 sm:$0xff]  }
 0x26f   :  { %1566 = vmatpush1.bf16.msra.mxu0 %v4773_v14  ;;  %v4857_v14 = vld [vmem:[#allocation11 + $0x120] ss:$16 sps:$4 sm:$0xff]  }
 0x270   :  { %1567 = vmatprep.subr.bf16.mxu0 %v4781_v17  ;;  %v4868_v17 = vld [vmem:[#allocation11 + $0x10c] ss:$16 sps:$4 sm:$0xff]  }
 0x273   :  { %1568 = vmatpush1.bf16.msra.mxu0 %v4779_v18  ;;  %v4863_v18 = vld [vmem:[#allocation11 + $0x100] ss:$16 sps:$4 sm:$0xff]  }
 0x274   :  { %1569 = vmatprep.subr.bf16.mxu0 %v4787_v19  ;;  %v4866_v19 = vld [vmem:[#allocation11 + $0x108] ss:$16 sps:$4 sm:$0xff]  }
 0x277   :  { %1570 = vmatpush1.bf16.msra.mxu0 %v4785_v20  ;;  %v4871_v20 = vld [vmem:[#allocation13 + $0x74] ss:$8 sps:$4 sm:$0xff]  }
 0x278   :  { %1571 = vmatprep.subr.bf16.mxu0 %v4793_v21  ;;  %v4874_v21 = vld [vmem:[#allocation13 + $0x174] ss:$8 sps:$4 sm:$0xff]  }
 0x27b   :  { %1572 = vmatpush1.bf16.msra.mxu0 %v4791_v22 }
 0x27c   :  { %1573 = vmatprep.subr.bf16.mxu0 %v4799_v23 }
 0x27f   :  { %1574 = vmatpush1.bf16.msra.mxu0 %v4797_v24 }
 0x280   :  { %1575 = vmatprep.subr.bf16.mxu0 %v4805_v25 }
 0x283   :  { %1576 = vmatpush1.bf16.msra.mxu0 %v4803_v26 }
 0x284   :  { %1577 = vmatprep.subr.bf16.mxu0 %v4811_v27  ;;  %v4869_v27 = vld [vmem:[#allocation13 + $0x70] ss:$8 sps:$4 sm:$0xff]  }
 0x287   :  { %1578 = vmatpush1.bf16.msra.mxu0 %v4809_v28  ;;  %v4872_v28 = vld [vmem:[#allocation13 + $0x170] ss:$8 sps:$4 sm:$0xff]  }
 0x288   :  { %1579 = vmatprep.subr.bf16.mxu0 %v4817_v29 }
 0x28b   :  { %1580 = vmatpush1.bf16.msra.mxu0 %v4815_v30  ;;  %v4877_v30 = vld [vmem:[#allocation13 + $0x64] ss:$8 sps:$4 sm:$0xff]  }
 0x28c   :  { %1581 = vmatprep.subr.bf16.mxu0 %v4823_v31  ;;  %v4880_v31 = vld [vmem:[#allocation13 + $0x164] ss:$8 sps:$4 sm:$0xff]  }
 0x28f   :  { %1582 = vmatpush2.bf16.msra.mxu0 %v4821_v32  ;;  %v4875_v32 = vld [vmem:[#allocation13 + $0x60] ss:$8 sps:$4 sm:$0xff]  }
 0x290   :  { %1583 = vmatprep.subr.bf16.mxu0 %v4829_v33  ;;  %v4878_v33 = vld [vmem:[#allocation13 + $0x160] ss:$8 sps:$4 sm:$0xff]  }
 0x293   :  { %1584 = vmatpush2.bf16.msra.mxu0 %v4827_v34  ;;  %v4883_v34 = vld [vmem:[#allocation13 + $0x54] ss:$8 sps:$4 sm:$0xff]  }
 0x294   :  { %1585 = vmatprep.subr.bf16.mxu0 %v4835_v35  ;;  %v4886_v35 = vld [vmem:[#allocation13 + $0x154] ss:$8 sps:$4 sm:$0xff]  }
 0x297   :  { %1586 = vmatpush2.bf16.msra.mxu0 %v4833_v36  ;;  %v4881_v36 = vld [vmem:[#allocation13 + $0x50] ss:$8 sps:$4 sm:$0xff]  }
 0x298   :  { %1587 = vmatprep.subr.bf16.mxu0 %v4841_v37  ;;  %v4884_v37 = vld [vmem:[#allocation13 + $0x150] ss:$8 sps:$4 sm:$0xff]  }
 0x29b   :  { %1588 = vmatpush2.bf16.msra.mxu0 %v4839_v38  ;;  %v4889_v38 = vld [vmem:[#allocation13 + $0x44] ss:$8 sps:$4 sm:$0xff]  }
 0x29c   :  { %1589 = vmatprep.subr.bf16.mxu0 %v4847_v39  ;;  %v4892_v39 = vld [vmem:[#allocation13 + $0x144] ss:$8 sps:$4 sm:$0xff]  }
 0x29f   :  { %1590 = vmatpush2.bf16.msra.mxu0 %v4845_v40  ;;  %v4887_v40 = vld [vmem:[#allocation13 + $0x40] ss:$8 sps:$4 sm:$0xff]  }
 0x2a0   :  { %1591 = vmatprep.subr.bf16.mxu0 %v4853_v41  ;;  %v4890_v41 = vld [vmem:[#allocation13 + $0x140] ss:$8 sps:$4 sm:$0xff]  }
 0x2a3   :  { %1592 = vmatpush2.bf16.msra.mxu0 %v4851_v42  ;;  %v4895_v42 = vld [vmem:[#allocation13 + $0x34] ss:$8 sps:$4 sm:$0xff]  }
 0x2a4   :  { %1593 = vmatprep.subr.bf16.mxu0 %v4859_v12  ;;  %v4941_v12 = vld [vmem:[#allocation13 + $0xb0] ss:$8 sps:$4 sm:$0xff]  }
 0x2a7   :  { %1594 = vmatpush2.bf16.msra.mxu0 %v4857_v14  ;;  %v4949_v14 = vld [vmem:[#allocation13 + $0xa4] ss:$8 sps:$4 sm:$0xff]  }
 0x2a8   :  { %1595 = vmatprep.subr.bf16.mxu0 %v4865_v16  ;;  %v4947_v16 = vld [vmem:[#allocation13 + $0xa0] ss:$8 sps:$4 sm:$0xff]  }
 0x2ab   :  { %1596 = vmatpush2.bf16.msra.mxu0 %v4863_v18  ;;  %v4955_v18 = vld [vmem:[#allocation13 + $0x94] ss:$8 sps:$4 sm:$0xff]  }
 0x2ac   :  { %2039 = vmatprep.subr.bf16.mxu0 %v4871_v20  ;;  %v4953_v20 = vld [vmem:[#allocation13 + $0x90] ss:$8 sps:$4 sm:$0xff]  }
 0x32e   :  { %v933_v43 = vpop.f32.mrf.mxu0 }
 0x330   :  { %v935_v44 = vpop.f32.mrf.mxu0 }
 0x332   :  { %v937_v45 = vpop.f32.mrf.mxu0 }
 0x333   :  { %v942_v49 = vpack.c.bf16 %v937_v45, %v933_v43  ;;  %v4898_v43 = vld [vmem:[#allocation13 + $0x134] ss:$8 sps:$4 sm:$0xff]   ;;  %v4896_v45 = vld [vmem:[#allocation13 + $0x130] ss:$8 sps:$4 sm:$0xff]  }
 0x334   :  { %v939_v46 = vpop.f32.mrf.mxu0 }
 0x335   :  { %v943_v47 = vpack.c.bf16 %v939_v46, %v935_v44  ;;  %v4893_v44 = vld [vmem:[#allocation13 + $0x30] ss:$8 sps:$4 sm:$0xff]   ;;  %v4901_v46 = vld [vmem:[#allocation13 + $0x24] ss:$8 sps:$4 sm:$0xff]  }
 0x337   :  { %1168 = vmatprep.mubr.bf16.mxu1 %v943_v47  ;;  %v4904_v47 = vld [vmem:[#allocation13 + $0x124] ss:$8 sps:$4 sm:$0xff]  }
 0x338   :  { %1169 = vmatmul.mubr.bf16.vlgmr.msra.gmra.mxu1 %v942_v49  ;;  %v4902_v49 = vld [vmem:[#allocation13 + $0x120] ss:$8 sps:$4 sm:$0xff]  }
 0x339   :  { %1609 = vmatpush1.bf16.msra.mxu1 %v4776_v48  ;;  %v4899_v48 = vld [vmem:[#allocation13 + $0x20] ss:$8 sps:$4 sm:$0xff]  }
 0x33a   :  { %1610 = vmatprep.subr.bf16.mxu1 %v4784_v50  ;;  %v4907_v50 = vld [vmem:[#allocation13 + $0x14] ss:$8 sps:$4 sm:$0xff]  }
 0x33d   :  { %1611 = vmatpush1.bf16.msra.mxu1 %v4782_v51  ;;  %v4910_v51 = vld [vmem:[#allocation13 + $0x114] ss:$8 sps:$4 sm:$0xff]  }
 0x33e   :  { %1612 = vmatprep.subr.bf16.mxu1 %v4790_v52  ;;  %v4905_v52 = vld [vmem:[#allocation13 + $0x10] ss:$8 sps:$4 sm:$0xff]  }
 0x341   :  { %1613 = vmatpush1.bf16.msra.mxu1 %v4788_v53  ;;  %v4908_v53 = vld [vmem:[#allocation13 + $0x110] ss:$8 sps:$4 sm:$0xff]  }
 0x342   :  { %1614 = vmatprep.subr.bf16.mxu1 %v4796_v54  ;;  %v4913_v54 = vld [vmem:[#allocation13 + $0x4] ss:$8 sps:$4 sm:$0xff]  }
 0x345   :  { %1615 = vmatpush1.bf16.msra.mxu1 %v4794_v55  ;;  %v4916_v55 = vld [vmem:[#allocation13 + $0x104] ss:$8 sps:$4 sm:$0xff]  }
 0x346   :  { %1616 = vmatprep.subr.bf16.mxu1 %v4802_v56  ;;  %v4911_v56 = vld [vmem:[#allocation13] ss:$8 sps:$4 sm:$0xff]  }
 0x349   :  { %1617 = vmatpush1.bf16.msra.mxu1 %v4800_v57  ;;  %v4914_v57 = vld [vmem:[#allocation13 + $0x100] ss:$8 sps:$4 sm:$0xff]  }
 0x34a   :  { %1618 = vmatprep.subr.bf16.mxu1 %v4808_v58  ;;  %v4919_v58 = vld [vmem:[#allocation13 + $0xf4] ss:$8 sps:$4 sm:$0xff]  }
 0x34d   :  { %1619 = vmatpush1.bf16.msra.mxu1 %v4806_v59  ;;  %v4922_v59 = vld [vmem:[#allocation13 + $0x1f4] ss:$8 sps:$4 sm:$0xff]  }
 0x34e   :  { %1620 = vmatprep.subr.bf16.mxu1 %v4814_v60  ;;  %v4917_v60 = vld [vmem:[#allocation13 + $0xf0] ss:$8 sps:$4 sm:$0xff]  }
 0x351   :  { %1621 = vmatpush1.bf16.msra.mxu1 %v4812_v61  ;;  %v4920_v61 = vld [vmem:[#allocation13 + $0x1f0] ss:$8 sps:$4 sm:$0xff]  }
 0x352   :  { %1622 = vmatprep.subr.bf16.mxu1 %v4820_v62  ;;  %v4925_v62 = vld [vmem:[#allocation13 + $0xe4] ss:$8 sps:$4 sm:$0xff]  }
 0x355   :  { %1623 = vmatpush1.bf16.msra.mxu1 %v4818_v63  ;;  %v4928_v63 = vld [vmem:[#allocation13 + $0x1e4] ss:$8 sps:$4 sm:$0xff]  }
 0x356   :  { %1624 = vmatprep.subr.bf16.mxu1 %v4826_v0  ;;  %v4923_v0 = vld [vmem:[#allocation13 + $0xe0] ss:$8 sps:$4 sm:$0xff]  }
 0x359   :  { %1625 = vmatpush2.bf16.msra.mxu1 %v4824_v1  ;;  %v4926_v1 = vld [vmem:[#allocation13 + $0x1e0] ss:$8 sps:$4 sm:$0xff]  }
 0x35a   :  { %1626 = vmatprep.subr.bf16.mxu1 %v4832_v2  ;;  %v4931_v2 = vld [vmem:[#allocation13 + $0xd4] ss:$8 sps:$4 sm:$0xff]  }
 0x35d   :  { %1627 = vmatpush2.bf16.msra.mxu1 %v4830_v3  ;;  %v4934_v3 = vld [vmem:[#allocation13 + $0x1d4] ss:$8 sps:$4 sm:$0xff]  }
 0x35e   :  { %1628 = vmatprep.subr.bf16.mxu1 %v4838_v4  ;;  %v4929_v4 = vld [vmem:[#allocation13 + $0xd0] ss:$8 sps:$4 sm:$0xff]  }
 0x361   :  { %1629 = vmatpush2.bf16.msra.mxu1 %v4836_v5  ;;  %v4932_v5 = vld [vmem:[#allocation13 + $0x1d0] ss:$8 sps:$4 sm:$0xff]  }
 0x362   :  { %1630 = vmatprep.subr.bf16.mxu1 %v4844_v6  ;;  %v4937_v6 = vld [vmem:[#allocation13 + $0xc4] ss:$8 sps:$4 sm:$0xff]  }
 0x365   :  { %1631 = vmatpush2.bf16.msra.mxu1 %v4842_v7  ;;  %v4940_v7 = vld [vmem:[#allocation13 + $0x1c4] ss:$8 sps:$4 sm:$0xff]  }
 0x366   :  { %1632 = vmatprep.subr.bf16.mxu1 %v4850_v8  ;;  %v4935_v8 = vld [vmem:[#allocation13 + $0xc0] ss:$8 sps:$4 sm:$0xff]  }
 0x369   :  { %1633 = vmatpush2.bf16.msra.mxu1 %v4848_v9  ;;  %v4938_v9 = vld [vmem:[#allocation13 + $0x1c0] ss:$8 sps:$4 sm:$0xff]  }
 0x36a   :  { %1634 = vmatprep.subr.bf16.mxu1 %v4856_v10  ;;  %v4943_v10 = vld [vmem:[#allocation13 + $0xb4] ss:$8 sps:$4 sm:$0xff]  }
 0x36d   :  { %1635 = vmatpush2.bf16.msra.mxu1 %v4854_v11  ;;  %v4946_v11 = vld [vmem:[#allocation13 + $0x1b4] ss:$8 sps:$4 sm:$0xff]  }
 0x36e   :  { %1636 = vmatprep.subr.bf16.mxu1 %v4862_v13  ;;  %v4944_v13 = vld [vmem:[#allocation13 + $0x1b0] ss:$8 sps:$4 sm:$0xff]  }
 0x371   :  { %1637 = vmatpush2.bf16.msra.mxu1 %v4860_v15  ;;  %v4952_v15 = vld [vmem:[#allocation13 + $0x1a4] ss:$8 sps:$4 sm:$0xff]  }
 0x372   :  { %1638 = vmatprep.subr.bf16.mxu1 %v4868_v17  ;;  %v4950_v17 = vld [vmem:[#allocation13 + $0x1a0] ss:$8 sps:$4 sm:$0xff]  }
 0x375   :  { %1639 = vmatpush2.bf16.msra.mxu1 %v4866_v19  ;;  %v4958_v19 = vld [vmem:[#allocation13 + $0x194] ss:$8 sps:$4 sm:$0xff]  }
 0x376   :  { %2082 = vmatprep.subr.bf16.mxu1 %v4874_v21  ;;  %v4956_v21 = vld [vmem:[#allocation13 + $0x190] ss:$8 sps:$4 sm:$0xff]  }
 0x3f8   :  { %v1170_v22 = vpop.f32.mrf.mxu1 }
 0x3fa   :  { %v1172_v23 = vpop.f32.mrf.mxu1 }
 0x3fc   :  { %v1174_v24 = vpop.f32.mrf.mxu1 }
 0x3fd   :  { %v1179_v29 = vpack.c.bf16 %v1174_v24, %v1170_v22  ;;  %v4961_v22 = vld [vmem:[#allocation13 + $0x84] ss:$8 sps:$4 sm:$0xff]   ;;  %v4959_v24 = vld [vmem:[#allocation13 + $0x80] ss:$8 sps:$4 sm:$0xff]  }
 0x3fe   :  { %v1176_v25 = vpop.f32.mrf.mxu1 }
 0x3ff   :  { %v1180_v26 = vpack.c.bf16 %v1176_v25, %v1172_v23  ;;  %v4964_v23 = vld [vmem:[#allocation13 + $0x184] ss:$8 sps:$4 sm:$0xff]   ;;  %v4962_v25 = vld [vmem:[#allocation13 + $0x180] ss:$8 sps:$4 sm:$0xff]  }
 0x401   :  { %1597 = vmatprep.mubr.bf16.mxu0 %v1180_v26  ;;  %1640 = vmatprep.mubr.bf16.mxu1 %v1180_v26  ;;  %v4967_v26 = vld [vmem:[#allocation14 + $0x74] ss:$8 sps:$4 sm:$0xff]  }
 0x402   :  { %1598 = vmatmul.mubr.bf16.vlgmr.msra.gmra.mxu0 %v1179_v29  ;;  %1641 = vmatmul.mubr.bf16.vlgmr.msra.gmra.mxu1 %v1179_v29 }
 0x403   :  { %2040 = vmatpush1.bf16.msra.mxu0 %v4869_v27  ;;  %2083 = vmatpush1.bf16.msra.mxu1 %v4872_v28 }
 0x404   :  { %2041 = vmatprep.subr.bf16.mxu0 %v4877_v30  ;;  %2084 = vmatprep.subr.bf16.mxu1 %v4880_v31 }
 0x407   :  { %2042 = vmatpush1.bf16.msra.mxu0 %v4875_v32  ;;  %2085 = vmatpush1.bf16.msra.mxu1 %v4878_v33 }
 0x408   :  { %2043 = vmatprep.subr.bf16.mxu0 %v4883_v34  ;;  %2086 = vmatprep.subr.bf16.mxu1 %v4886_v35 }
 0x40b   :  { %2044 = vmatpush1.bf16.msra.mxu0 %v4881_v36  ;;  %2087 = vmatpush1.bf16.msra.mxu1 %v4884_v37  ;;  %v4965_v37 = vld [vmem:[#allocation14 + $0x70] ss:$8 sps:$4 sm:$0xff]  }
 0x40c   :  { %2045 = vmatprep.subr.bf16.mxu0 %v4889_v38  ;;  %2088 = vmatprep.subr.bf16.mxu1 %v4892_v39 }
 0x40f   :  { %2046 = vmatpush1.bf16.msra.mxu0 %v4887_v40  ;;  %2089 = vmatpush1.bf16.msra.mxu1 %v4890_v41  ;;  %v4970_v40 = vld [vmem:[#allocation14 + $0x64] ss:$8 sps:$4 sm:$0xff]   ;;  %v4968_v41 = vld [vmem:[#allocation14 + $0x60] ss:$8 sps:$4 sm:$0xff]  }
 0x410   :  { %2047 = vmatprep.subr.bf16.mxu0 %v4895_v42  ;;  %2090 = vmatprep.subr.bf16.mxu1 %v4898_v43  ;;  %v4973_v42 = vld [vmem:[#allocation14 + $0x54] ss:$8 sps:$4 sm:$0xff]   ;;  %v4971_v43 = vld [vmem:[#allocation14 + $0x50] ss:$8 sps:$4 sm:$0xff]  }
 0x413   :  { %2048 = vmatpush1.bf16.msra.mxu0 %v4893_v44  ;;  %2091 = vmatpush1.bf16.msra.mxu1 %v4896_v45  ;;  %v4976_v44 = vld [vmem:[#allocation14 + $0x44] ss:$8 sps:$4 sm:$0xff]   ;;  %v4974_v45 = vld [vmem:[#allocation14 + $0x40] ss:$8 sps:$4 sm:$0xff]  }
 0x414   :  { %2049 = vmatprep.subr.bf16.mxu0 %v4901_v46  ;;  %2092 = vmatprep.subr.bf16.mxu1 %v4904_v47  ;;  %v4979_v46 = vld [vmem:[#allocation14 + $0x34] ss:$8 sps:$4 sm:$0xff]   ;;  %v4977_v47 = vld [vmem:[#allocation14 + $0x30] ss:$8 sps:$4 sm:$0xff]  }
 0x417   :  { %2050 = vmatpush1.bf16.msra.mxu0 %v4899_v48  ;;  %2093 = vmatpush1.bf16.msra.mxu1 %v4902_v49  ;;  %v4982_v48 = vld [vmem:[#allocation14 + $0x24] ss:$8 sps:$4 sm:$0xff]   ;;  %v4980_v49 = vld [vmem:[#allocation14 + $0x20] ss:$8 sps:$4 sm:$0xff]  }
 0x418   :  { %2051 = vmatprep.subr.bf16.mxu0 %v4907_v50  ;;  %2094 = vmatprep.subr.bf16.mxu1 %v4910_v51  ;;  %v4985_v50 = vld [vmem:[#allocation14 + $0x14] ss:$8 sps:$4 sm:$0xff]   ;;  %v4983_v51 = vld [vmem:[#allocation14 + $0x10] ss:$8 sps:$4 sm:$0xff]  }
 0x41b   :  { %2052 = vmatpush1.bf16.msra.mxu0 %v4905_v52  ;;  %2095 = vmatpush1.bf16.msra.mxu1 %v4908_v53  ;;  %v4988_v52 = vld [vmem:[#allocation14 + $0x4] ss:$8 sps:$4 sm:$0xff]   ;;  %v4986_v53 = vld [vmem:[#allocation14] ss:$8 sps:$4 sm:$0xff]  }
 0x41c   :  { %2053 = vmatprep.subr.bf16.mxu0 %v4913_v54  ;;  %2096 = vmatprep.subr.bf16.mxu1 %v4916_v55  ;;  %v4991_v54 = vld [vmem:[#allocation14 + $0xf4] ss:$8 sps:$4 sm:$0xff]   ;;  %v4989_v55 = vld [vmem:[#allocation14 + $0xf0] ss:$8 sps:$4 sm:$0xff]  }
 0x41f   :  { %2054 = vmatpush1.bf16.msra.mxu0 %v4911_v56  ;;  %2097 = vmatpush1.bf16.msra.mxu1 %v4914_v57  ;;  %v4994_v56 = vld [vmem:[#allocation14 + $0xe4] ss:$8 sps:$4 sm:$0xff]   ;;  %v4992_v57 = vld [vmem:[#allocation14 + $0xe0] ss:$8 sps:$4 sm:$0xff]  }
 0x420   :  { %2055 = vmatprep.subr.bf16.mxu0 %v4919_v58  ;;  %2098 = vmatprep.subr.bf16.mxu1 %v4922_v59  ;;  %v4997_v58 = vld [vmem:[#allocation14 + $0xd4] ss:$8 sps:$4 sm:$0xff]   ;;  %v4995_v59 = vld [vmem:[#allocation14 + $0xd0] ss:$8 sps:$4 sm:$0xff]  }
 0x423   :  { %2056 = vmatpush2.bf16.msra.mxu0 %v4917_v60  ;;  %2099 = vmatpush2.bf16.msra.mxu1 %v4920_v61  ;;  %v5000_v60 = vld [vmem:[#allocation14 + $0xc4] ss:$8 sps:$4 sm:$0xff]   ;;  %v4998_v61 = vld [vmem:[#allocation14 + $0xc0] ss:$8 sps:$4 sm:$0xff]  }
 0x424   :  { %2057 = vmatprep.subr.bf16.mxu0 %v4925_v62  ;;  %2100 = vmatprep.subr.bf16.mxu1 %v4928_v63  ;;  %v5003_v62 = vld [vmem:[#allocation14 + $0xb4] ss:$8 sps:$4 sm:$0xff]   ;;  %v5001_v63 = vld [vmem:[#allocation14 + $0xb0] ss:$8 sps:$4 sm:$0xff]  }
 0x427   :  { %2058 = vmatpush2.bf16.msra.mxu0 %v4923_v0  ;;  %2101 = vmatpush2.bf16.msra.mxu1 %v4926_v1  ;;  %v5006_v0 = vld [vmem:[#allocation14 + $0xa4] ss:$8 sps:$4 sm:$0xff]   ;;  %v5004_v1 = vld [vmem:[#allocation14 + $0xa0] ss:$8 sps:$4 sm:$0xff]  }
 0x428   :  { %2059 = vmatprep.subr.bf16.mxu0 %v4931_v2  ;;  %2102 = vmatprep.subr.bf16.mxu1 %v4934_v3  ;;  %v5009_v2 = vld [vmem:[#allocation14 + $0x94] ss:$8 sps:$4 sm:$0xff]   ;;  %v5007_v3 = vld [vmem:[#allocation14 + $0x90] ss:$8 sps:$4 sm:$0xff]  }
 0x42b   :  { %2060 = vmatpush2.bf16.msra.mxu0 %v4929_v4  ;;  %2103 = vmatpush2.bf16.msra.mxu1 %v4932_v5  ;;  %v5012_v4 = vld [vmem:[#allocation14 + $0x84] ss:$8 sps:$4 sm:$0xff]   ;;  %v5010_v5 = vld [vmem:[#allocation14 + $0x80] ss:$8 sps:$4 sm:$0xff]  }
 0x42c   :  { %2061 = vmatprep.subr.bf16.mxu0 %v4937_v6  ;;  %2104 = vmatprep.subr.bf16.mxu1 %v4940_v7  ;;  %v5013_v6 = vld [vmem:[#allocation16 + $0x70] ss:$8 sps:$4 sm:$0xff]   ;;  %v5015_v7 = vld [vmem:[#allocation16 + $0x74] ss:$8 sps:$4 sm:$0xff]  }
 0x42f   :  { %2062 = vmatpush2.bf16.msra.mxu0 %v4935_v8  ;;  %2105 = vmatpush2.bf16.msra.mxu1 %v4938_v9  ;;  %v5018_v8 = vld [vmem:[#allocation16 + $0x64] ss:$8 sps:$4 sm:$0xff]   ;;  %v5016_v9 = vld [vmem:[#allocation16 + $0x60] ss:$8 sps:$4 sm:$0xff]  }
 0x430   :  { %2063 = vmatprep.subr.bf16.mxu0 %v4943_v10  ;;  %2106 = vmatprep.subr.bf16.mxu1 %v4946_v11  ;;  %v5021_v10 = vld [vmem:[#allocation16 + $0x54] ss:$8 sps:$4 sm:$0xff]   ;;  %v5019_v11 = vld [vmem:[#allocation16 + $0x50] ss:$8 sps:$4 sm:$0xff]  }
 0x433   :  { %2064 = vmatpush2.bf16.msra.mxu0 %v4941_v12  ;;  %2107 = vmatpush2.bf16.msra.mxu1 %v4944_v13  ;;  %v5024_v12 = vld [vmem:[#allocation16 + $0x44] ss:$8 sps:$4 sm:$0xff]   ;;  %v5022_v13 = vld [vmem:[#allocation16 + $0x40] ss:$8 sps:$4 sm:$0xff]  }
 0x434   :  { %2065 = vmatprep.subr.bf16.mxu0 %v4949_v14  ;;  %2108 = vmatprep.subr.bf16.mxu1 %v4952_v15  ;;  %v5027_v14 = vld [vmem:[#allocation16 + $0x34] ss:$8 sps:$4 sm:$0xff]   ;;  %v5025_v15 = vld [vmem:[#allocation16 + $0x30] ss:$8 sps:$4 sm:$0xff]  }
 0x437   :  { %2066 = vmatpush2.bf16.msra.mxu0 %v4947_v16  ;;  %2109 = vmatpush2.bf16.msra.mxu1 %v4950_v17  ;;  %v5030_v16 = vld [vmem:[#allocation16 + $0x24] ss:$8 sps:$4 sm:$0xff]   ;;  %v5028_v17 = vld [vmem:[#allocation16 + $0x20] ss:$8 sps:$4 sm:$0xff]  }
 0x438   :  { %2067 = vmatprep.subr.bf16.mxu0 %v4955_v18  ;;  %2110 = vmatprep.subr.bf16.mxu1 %v4958_v19  ;;  %v5033_v18 = vld [vmem:[#allocation16 + $0x14] ss:$8 sps:$4 sm:$0xff]   ;;  %v5031_v19 = vld [vmem:[#allocation16 + $0x10] ss:$8 sps:$4 sm:$0xff]  }
 0x43b   :  { %2068 = vmatpush2.bf16.msra.mxu0 %v4953_v20  ;;  %2111 = vmatpush2.bf16.msra.mxu1 %v4956_v21  ;;  %v5036_v20 = vld [vmem:[#allocation16 + $0x4] ss:$8 sps:$4 sm:$0xff]   ;;  %v5034_v21 = vld [vmem:[#allocation16] ss:$8 sps:$4 sm:$0xff]  }
 0x43c   :  { %2069 = vmatprep.subr.bf16.mxu0 %v4961_v22  ;;  %2112 = vmatprep.subr.bf16.mxu1 %v4964_v23  ;;  %v5039_v22 = vld [vmem:[#allocation16 + $0xf4] ss:$8 sps:$4 sm:$0xff]   ;;  %v5037_v23 = vld [vmem:[#allocation16 + $0xf0] ss:$8 sps:$4 sm:$0xff]  }
 0x43f   :  { %2070 = vmatpush2.bf16.msra.mxu0 %v4959_v24  ;;  %2113 = vmatpush2.bf16.msra.mxu1 %v4962_v25  ;;  %v5042_v24 = vld [vmem:[#allocation16 + $0xe4] ss:$8 sps:$4 sm:$0xff]   ;;  %v5040_v25 = vld [vmem:[#allocation16 + $0xe0] ss:$8 sps:$4 sm:$0xff]  }
 0x440   :  { %2319 = vmatprep.subr.bf16.mxu0 %v4967_v26  ;;  %2556 = vmatprep.subr.bf16.mxu1 %v5015_v7  ;;  %v5045_v26 = vld [vmem:[#allocation16 + $0xd4] ss:$8 sps:$4 sm:$0xff]   ;;  %v5088_v7 = vld [vmem:[#allocation17 + $0xe0] ss:$8 sps:$4 sm:$0xff]  }
 0x4c2   :  { %v1599_v27 = vpop.f32.mrf.mxu0  ;;  %v1642_v28 = vpop.f32.mrf.mxu1 }
 0x4c4   :  { %v1601_v29 = vpop.f32.mrf.mxu0  ;;  %v1644_v30 = vpop.f32.mrf.mxu1 }
 0x4c6   :  { %v1603_v31 = vpop.f32.mrf.mxu0  ;;  %v1646_v32 = vpop.f32.mrf.mxu1 }
 0x4c7   :  { %v1651_v38 = vpack.c.bf16 %v1603_v31, %v1599_v27  ;;  %v1653_v39 = vpack.c.bf16 %v1646_v32, %v1642_v28  ;;  %v5043_v27 = vld [vmem:[#allocation16 + $0xd0] ss:$8 sps:$4 sm:$0xff]   ;;  %v5048_v28 = vld [vmem:[#allocation16 + $0xc4] ss:$8 sps:$4 sm:$0xff]  }
 0x4c8   :  { %v1605_v33 = vpop.f32.mrf.mxu0  ;;  %v1648_v34 = vpop.f32.mrf.mxu1  ;;  %v5049_v31 = vld [vmem:[#allocation16 + $0xb0] ss:$8 sps:$4 sm:$0xff]   ;;  %v5054_v32 = vld [vmem:[#allocation16 + $0xa4] ss:$8 sps:$4 sm:$0xff]  }
 0x4c9   :  { %v1652_v35 = vpack.c.bf16 %v1605_v33, %v1601_v29  ;;  %v1654_v36 = vpack.c.bf16 %v1648_v34, %v1644_v30  ;;  %v5046_v29 = vld [vmem:[#allocation16 + $0xc0] ss:$8 sps:$4 sm:$0xff]   ;;  %v5051_v30 = vld [vmem:[#allocation16 + $0xb4] ss:$8 sps:$4 sm:$0xff]  }
 0x4ca   :  { %v5052_v33 = vld [vmem:[#allocation16 + $0xa0] ss:$8 sps:$4 sm:$0xff]  }
 0x4cb   :  { %2071 = vmatprep.mubr.bf16.mxu0 %v1652_v35  ;;  %2114 = vmatprep.mubr.bf16.mxu1 %v1654_v36 }
 0x4cc   :  { %2072 = vmatmul.mubr.bf16.vlgmr.msra.gmra.mxu0 %v1651_v38  ;;  %2115 = vmatmul.mubr.bf16.vlgmr.msra.gmra.mxu1 %v1653_v39 }
 0x4cd   :  { %2320 = vmatpush1.bf16.msra.mxu0 %v4965_v37  ;;  %2557 = vmatpush1.bf16.msra.mxu1 %v5013_v6  ;;  %v5090_v6 = vld [vmem:[#allocation17 + $0xe4] ss:$8 sps:$4 sm:$0xff]  }
 0x4ce   :  { %2321 = vmatprep.subr.bf16.mxu0 %v4970_v40  ;;  %2558 = vmatprep.subr.bf16.mxu1 %v5018_v8  ;;  %v5093_v8 = vld [vmem:[#allocation17 + $0xd4] ss:$8 sps:$4 sm:$0xff]  }
 0x4d1   :  { %2322 = vmatpush1.bf16.msra.mxu0 %v4968_v41  ;;  %2559 = vmatpush1.bf16.msra.mxu1 %v5016_v9  ;;  %v5091_v9 = vld [vmem:[#allocation17 + $0xd0] ss:$8 sps:$4 sm:$0xff]  }
 0x4d2   :  { %2323 = vmatprep.subr.bf16.mxu0 %v4973_v42  ;;  %2560 = vmatprep.subr.bf16.mxu1 %v5021_v10  ;;  %v5096_v10 = vld [vmem:[#allocation17 + $0xc4] ss:$8 sps:$4 sm:$0xff]  }
 0x4d5   :  { %2324 = vmatpush1.bf16.msra.mxu0 %v4971_v43  ;;  %2561 = vmatpush1.bf16.msra.mxu1 %v5019_v11  ;;  %v5094_v11 = vld [vmem:[#allocation17 + $0xc0] ss:$8 sps:$4 sm:$0xff]  }
 0x4d6   :  { %2325 = vmatprep.subr.bf16.mxu0 %v4976_v44  ;;  %2562 = vmatprep.subr.bf16.mxu1 %v5024_v12  ;;  %v5099_v12 = vld [vmem:[#allocation17 + $0xb4] ss:$8 sps:$4 sm:$0xff]  }
 0x4d9   :  { %2326 = vmatpush1.bf16.msra.mxu0 %v4974_v45  ;;  %2563 = vmatpush1.bf16.msra.mxu1 %v5022_v13  ;;  %v5097_v13 = vld [vmem:[#allocation17 + $0xb0] ss:$8 sps:$4 sm:$0xff]  }
 0x4da   :  { %2327 = vmatprep.subr.bf16.mxu0 %v4979_v46  ;;  %2564 = vmatprep.subr.bf16.mxu1 %v5027_v14  ;;  %v5102_v14 = vld [vmem:[#allocation17 + $0xa4] ss:$8 sps:$4 sm:$0xff]  }
 0x4dd   :  { %2328 = vmatpush1.bf16.msra.mxu0 %v4977_v47  ;;  %2565 = vmatpush1.bf16.msra.mxu1 %v5025_v15  ;;  %v5100_v15 = vld [vmem:[#allocation17 + $0xa0] ss:$8 sps:$4 sm:$0xff]  }
 0x4de   :  { %2329 = vmatprep.subr.bf16.mxu0 %v4982_v48  ;;  %2566 = vmatprep.subr.bf16.mxu1 %v5030_v16  ;;  %v5057_v48 = vld [vmem:[#allocation16 + $0x94] ss:$8 sps:$4 sm:$0xff]  }
 0x4e1   :  { %2330 = vmatpush1.bf16.msra.mxu0 %v4980_v49  ;;  %2567 = vmatpush1.bf16.msra.mxu1 %v5028_v17  ;;  %v5055_v49 = vld [vmem:[#allocation16 + $0x90] ss:$8 sps:$4 sm:$0xff]  }
 0x4e2   :  { %2331 = vmatprep.subr.bf16.mxu0 %v4985_v50  ;;  %2568 = vmatprep.subr.bf16.mxu1 %v5033_v18  ;;  %v5060_v50 = vld [vmem:[#allocation16 + $0x84] ss:$8 sps:$4 sm:$0xff]  }
 0x4e5   :  { %2332 = vmatpush1.bf16.msra.mxu0 %v4983_v51  ;;  %2569 = vmatpush1.bf16.msra.mxu1 %v5031_v19  ;;  %v5058_v51 = vld [vmem:[#allocation16 + $0x80] ss:$8 sps:$4 sm:$0xff]  }
 0x4e6   :  { %2333 = vmatprep.subr.bf16.mxu0 %v4988_v52  ;;  %2570 = vmatprep.subr.bf16.mxu1 %v5036_v20  ;;  %v5061_v52 = vld [vmem:[#allocation17 + $0x70] ss:$8 sps:$4 sm:$0xff]  }
 0x4e9   :  { %2334 = vmatpush1.bf16.msra.mxu0 %v4986_v53  ;;  %2571 = vmatpush1.bf16.msra.mxu1 %v5034_v21  ;;  %v5063_v53 = vld [vmem:[#allocation17 + $0x74] ss:$8 sps:$4 sm:$0xff]  }
 0x4ea   :  { %2335 = vmatprep.subr.bf16.mxu0 %v4991_v54  ;;  %2572 = vmatprep.subr.bf16.mxu1 %v5039_v22  ;;  %v5066_v54 = vld [vmem:[#allocation17 + $0x64] ss:$8 sps:$4 sm:$0xff]   ;;  %v5105_v22 = vld [vmem:[#allocation17 + $0x94] ss:$8 sps:$4 sm:$0xff]  }
 0x4ed   :  { %2336 = vmatpush2.bf16.msra.mxu0 %v4989_v55  ;;  %2573 = vmatpush2.bf16.msra.mxu1 %v5037_v23  ;;  %v5064_v55 = vld [vmem:[#allocation17 + $0x60] ss:$8 sps:$4 sm:$0xff]   ;;  %v5103_v23 = vld [vmem:[#allocation17 + $0x90] ss:$8 sps:$4 sm:$0xff]  }
 0x4ee   :  { %2337 = vmatprep.subr.bf16.mxu0 %v4994_v56  ;;  %2574 = vmatprep.subr.bf16.mxu1 %v5042_v24  ;;  %v5069_v56 = vld [vmem:[#allocation17 + $0x54] ss:$8 sps:$4 sm:$0xff]   ;;  %v5108_v24 = vld [vmem:[#allocation17 + $0x84] ss:$8 sps:$4 sm:$0xff]  }
 0x4f1   :  { %2338 = vmatpush2.bf16.msra.mxu0 %v4992_v57  ;;  %2575 = vmatpush2.bf16.msra.mxu1 %v5040_v25  ;;  %v5067_v57 = vld [vmem:[#allocation17 + $0x50] ss:$8 sps:$4 sm:$0xff]   ;;  %v5106_v25 = vld [vmem:[#allocation17 + $0x80] ss:$8 sps:$4 sm:$0xff]  }
 0x4f2   :  { %2339 = vmatprep.subr.bf16.mxu0 %v4997_v58  ;;  %2576 = vmatprep.subr.bf16.mxu1 %v5045_v26  ;;  %v5072_v58 = vld [vmem:[#allocation17 + $0x44] ss:$8 sps:$4 sm:$0xff]   ;;  %v5109_v26 = vld [vmem:[#allocation19 + $0x70] ss:$8 sps:$4 sm:$0xff]  }
 0x4f5   :  { %2340 = vmatpush2.bf16.msra.mxu0 %v4995_v59  ;;  %2577 = vmatpush2.bf16.msra.mxu1 %v5043_v27  ;;  %v5070_v59 = vld [vmem:[#allocation17 + $0x40] ss:$8 sps:$4 sm:$0xff]   ;;  %v5111_v27 = vld [vmem:[#allocation19 + $0x74] ss:$8 sps:$4 sm:$0xff]  }
 0x4f6   :  { %2341 = vmatprep.subr.bf16.mxu0 %v5000_v60  ;;  %2578 = vmatprep.subr.bf16.mxu1 %v5048_v28  ;;  %v5075_v60 = vld [vmem:[#allocation17 + $0x34] ss:$8 sps:$4 sm:$0xff]   ;;  %v5114_v28 = vld [vmem:[#allocation19 + $0x64] ss:$8 sps:$4 sm:$0xff]  }
 0x4f9   :  { %2342 = vmatpush2.bf16.msra.mxu0 %v4998_v61  ;;  %2579 = vmatpush2.bf16.msra.mxu1 %v5046_v29  ;;  %v5073_v61 = vld [vmem:[#allocation17 + $0x30] ss:$8 sps:$4 sm:$0xff]   ;;  %v5112_v29 = vld [vmem:[#allocation19 + $0x60] ss:$8 sps:$4 sm:$0xff]  }
 0x4fa   :  { %2343 = vmatprep.subr.bf16.mxu0 %v5003_v62  ;;  %2580 = vmatprep.subr.bf16.mxu1 %v5051_v30  ;;  %v5078_v62 = vld [vmem:[#allocation17 + $0x24] ss:$8 sps:$4 sm:$0xff]   ;;  %v5117_v30 = vld [vmem:[#allocation19 + $0x54] ss:$8 sps:$4 sm:$0xff]  }
 0x4fd   :  { %2344 = vmatpush2.bf16.msra.mxu0 %v5001_v63  ;;  %2581 = vmatpush2.bf16.msra.mxu1 %v5049_v31  ;;  %v5076_v63 = vld [vmem:[#allocation17 + $0x20] ss:$8 sps:$4 sm:$0xff]   ;;  %v5115_v31 = vld [vmem:[#allocation19 + $0x50] ss:$8 sps:$4 sm:$0xff]  }
 0x4fe   :  { %2345 = vmatprep.subr.bf16.mxu0 %v5006_v0  ;;  %2582 = vmatprep.subr.bf16.mxu1 %v5054_v32  ;;  %v5081_v0 = vld [vmem:[#allocation17 + $0x14] ss:$8 sps:$4 sm:$0xff]   ;;  %v5120_v32 = vld [vmem:[#allocation19 + $0x44] ss:$8 sps:$4 sm:$0xff]  }
 0x501   :  { %2346 = vmatpush2.bf16.msra.mxu0 %v5004_v1  ;;  %2583 = vmatpush2.bf16.msra.mxu1 %v5052_v33  ;;  %v5079_v1 = vld [vmem:[#allocation17 + $0x10] ss:$8 sps:$4 sm:$0xff]   ;;  %v5118_v33 = vld [vmem:[#allocation19 + $0x40] ss:$8 sps:$4 sm:$0xff]  }
 0x502   :  { %2347 = vmatprep.subr.bf16.mxu0 %v5009_v2  ;;  %2584 = vmatprep.subr.bf16.mxu1 %v5057_v48  ;;  %v5084_v2 = vld [vmem:[#allocation17 + $0x4] ss:$8 sps:$4 sm:$0xff]  }
 0x503   :  { %v5144_v48 = vld [vmem:[#allocation19 + $0xc4] ss:$8 sps:$4 sm:$0xff]  }
 0x505   :  { %2348 = vmatpush2.bf16.msra.mxu0 %v5007_v3  ;;  %2585 = vmatpush2.bf16.msra.mxu1 %v5055_v49  ;;  %v5082_v3 = vld [vmem:[#allocation17] ss:$8 sps:$4 sm:$0xff]  }
 0x506   :  { %2349 = vmatprep.subr.bf16.mxu0 %v5012_v4  ;;  %2586 = vmatprep.subr.bf16.mxu1 %v5060_v50  ;;  %v5087_v4 = vld [vmem:[#allocation17 + $0xf4] ss:$8 sps:$4 sm:$0xff]   ;;  %v5142_v49 = vld [vmem:[#allocation19 + $0xc0] ss:$8 sps:$4 sm:$0xff]  }
 0x507   :  { %v5147_v50 = vld [vmem:[#allocation19 + $0xb4] ss:$8 sps:$4 sm:$0xff]  }
 0x509   :  { %2350 = vmatpush2.bf16.msra.mxu0 %v5010_v5  ;;  %2587 = vmatpush2.bf16.msra.mxu1 %v5058_v51  ;;  %v5085_v5 = vld [vmem:[#allocation17 + $0xf0] ss:$8 sps:$4 sm:$0xff]  }
 0x50a   :  { %2793 = vmatprep.subr.bf16.mxu0 %v5063_v53  ;;  %3030 = vmatprep.subr.bf16.mxu1 %v5111_v27  ;;  %v5145_v51 = vld [vmem:[#allocation19 + $0xb0] ss:$8 sps:$4 sm:$0xff]   ;;  %v5148_v53 = vld [vmem:[#allocation19 + $0xa0] ss:$8 sps:$4 sm:$0xff]   ;;  %v5237_v27 = vld [vmem:[#allocation20 + $0x144] ss:$16 sps:$4 sm:$0xff]  }
 0x58c   :  { %v2073_v34 = vpop.f32.mrf.mxu0  ;;  %v2116_v35 = vpop.f32.mrf.mxu1 }
 0x58d   :  { %v2117_v45 = vadd.f32 %v2116_v35, %v2073_v34  ;;  %v5123_v34 = vld [vmem:[#allocation19 + $0x34] ss:$8 sps:$4 sm:$0xff]   ;;  %v5121_v35 = vld [vmem:[#allocation19 + $0x30] ss:$8 sps:$4 sm:$0xff]  }
 0x58e   :  { %v2075_v36 = vpop.f32.mrf.mxu0  ;;  %v2118_v37 = vpop.f32.mrf.mxu1 }
 0x58f   :  { %v2119_v43 = vadd.f32 %v2118_v37, %v2075_v36  ;;  %v5126_v36 = vld [vmem:[#allocation19 + $0x24] ss:$8 sps:$4 sm:$0xff]   ;;  %v5124_v37 = vld [vmem:[#allocation19 + $0x20] ss:$8 sps:$4 sm:$0xff]  }
 0x590   :  { %v2077_v38 = vpop.f32.mrf.mxu0  ;;  %v2120_v39 = vpop.f32.mrf.mxu1 }
 0x591   :  { %v2121_v40 = vadd.f32 %v2120_v39, %v2077_v38  ;;  %v5129_v38 = vld [vmem:[#allocation19 + $0x14] ss:$8 sps:$4 sm:$0xff]   ;;  %v5127_v39 = vld [vmem:[#allocation19 + $0x10] ss:$8 sps:$4 sm:$0xff]  }
 0x592   :  { %v2079_v41 = vpop.f32.mrf.mxu0  ;;  %v2122_v42 = vpop.f32.mrf.mxu1 }
 0x593   :  { %v2123_v44 = vadd.f32 %v2122_v42, %v2079_v41  ;;  %v2125_v47 = vpack.c.bf16 %v2121_v40, %v2117_v45  ;;  %v5132_v40 = vld [vmem:[#allocation19 + $0x4] ss:$8 sps:$4 sm:$0xff]   ;;  %v5130_v41 = vld [vmem:[#allocation19] ss:$8 sps:$4 sm:$0xff]   ;;  %v5135_v42 = vld [vmem:[#allocation19 + $0xf4] ss:$8 sps:$4 sm:$0xff]  }
 0x594   :  { %v5136_v45 = vld [vmem:[#allocation19 + $0xe0] ss:$8 sps:$4 sm:$0xff]  }
 0x595   :  { %v2126_v46 = vpack.c.bf16 %v2123_v44, %v2119_v43  ;;  %v5133_v43 = vld [vmem:[#allocation19 + $0xf0] ss:$8 sps:$4 sm:$0xff]   ;;  %v5138_v44 = vld [vmem:[#allocation19 + $0xe4] ss:$8 sps:$4 sm:$0xff]  }
 0x597   :  { %2351 = vmatprep.mubr.bf16.mxu0 %v2126_v46  ;;  %v5141_v46 = vld [vmem:[#allocation19 + $0xd4] ss:$8 sps:$4 sm:$0xff]  }
 0x598   :  { %2352 = vmatmul.mubr.bf16.vlgmr.msra.gmra.mxu0 %v2125_v47  ;;  %v5139_v47 = vld [vmem:[#allocation19 + $0xd0] ss:$8 sps:$4 sm:$0xff]  }
 0x599   :  { %2794 = vmatpush1.bf16.msra.mxu0 %v5061_v52  ;;  %v5150_v52 = vld [vmem:[#allocation19 + $0xa4] ss:$8 sps:$4 sm:$0xff]  }
 0x59a   :  { %2795 = vmatprep.subr.bf16.mxu0 %v5066_v54 }
 0x59d   :  { %2796 = vmatpush1.bf16.msra.mxu0 %v5064_v55 }
 0x59e   :  { %2797 = vmatprep.subr.bf16.mxu0 %v5069_v56 }
 0x5a1   :  { %2798 = vmatpush1.bf16.msra.mxu0 %v5067_v57 }
 0x5a2   :  { %2799 = vmatprep.subr.bf16.mxu0 %v5072_v58 }
 0x5a5   :  { %2800 = vmatpush1.bf16.msra.mxu0 %v5070_v59 }
 0x5a6   :  { %2801 = vmatprep.subr.bf16.mxu0 %v5075_v60  ;;  %v5153_v60 = vld [vmem:[#allocation19 + $0x94] ss:$8 sps:$4 sm:$0xff]  }
 0x5a9   :  { %2802 = vmatpush1.bf16.msra.mxu0 %v5073_v61  ;;  %v5151_v61 = vld [vmem:[#allocation19 + $0x90] ss:$8 sps:$4 sm:$0xff]  }
 0x5aa   :  { %2803 = vmatprep.subr.bf16.mxu0 %v5078_v62  ;;  %v5156_v62 = vld [vmem:[#allocation19 + $0x84] ss:$8 sps:$4 sm:$0xff]  }
 0x5ad   :  { %2804 = vmatpush1.bf16.msra.mxu0 %v5076_v63  ;;  %v5154_v63 = vld [vmem:[#allocation19 + $0x80] ss:$8 sps:$4 sm:$0xff]  }
 0x5ae   :  { %2805 = vmatprep.subr.bf16.mxu0 %v5081_v0  ;;  %v5157_v0 = vld [vmem:[#allocation20 + $0xe0] ss:$16 sps:$4 sm:$0xff]  }
 0x5b1   :  { %2806 = vmatpush1.bf16.msra.mxu0 %v5079_v1  ;;  %v5159_v1 = vld [vmem:[#allocation20 + $0xe4] ss:$16 sps:$4 sm:$0xff]  }
 0x5b2   :  { %2807 = vmatprep.subr.bf16.mxu0 %v5084_v2  ;;  %v5162_v2 = vld [vmem:[#allocation20 + $0xec] ss:$16 sps:$4 sm:$0xff]  }
 0x5b5   :  { %2808 = vmatpush1.bf16.msra.mxu0 %v5082_v3  ;;  %v5165_v3 = vld [vmem:[#allocation20 + $0xc4] ss:$16 sps:$4 sm:$0xff]  }
 0x5b6   :  { %2809 = vmatprep.subr.bf16.mxu0 %v5087_v4  ;;  %v5163_v4 = vld [vmem:[#allocation20 + $0xc0] ss:$16 sps:$4 sm:$0xff]  }
 0x5b9   :  { %2810 = vmatpush2.bf16.msra.mxu0 %v5085_v5  ;;  %v5171_v5 = vld [vmem:[#allocation20 + $0xa4] ss:$16 sps:$4 sm:$0xff]  }
 0x5ba   :  { %2811 = vmatprep.subr.bf16.mxu0 %v5090_v6  ;;  %v5169_v6 = vld [vmem:[#allocation20 + $0xa0] ss:$16 sps:$4 sm:$0xff]  }
 0x5bd   :  { %2812 = vmatpush2.bf16.msra.mxu0 %v5088_v7  ;;  %v5177_v7 = vld [vmem:[#allocation20 + $0x84] ss:$16 sps:$4 sm:$0xff]  }
 0x5be   :  { %2813 = vmatprep.subr.bf16.mxu0 %v5093_v8  ;;  %v5175_v8 = vld [vmem:[#allocation20 + $0x80] ss:$16 sps:$4 sm:$0xff]  }
 0x5c1   :  { %2814 = vmatpush2.bf16.msra.mxu0 %v5091_v9  ;;  %v5183_v9 = vld [vmem:[#allocation20 + $0x64] ss:$16 sps:$4 sm:$0xff]  }
 0x5c2   :  { %2815 = vmatprep.subr.bf16.mxu0 %v5096_v10  ;;  %v5181_v10 = vld [vmem:[#allocation20 + $0x60] ss:$16 sps:$4 sm:$0xff]  }
 0x5c5   :  { %2816 = vmatpush2.bf16.msra.mxu0 %v5094_v11  ;;  %v5189_v11 = vld [vmem:[#allocation20 + $0x44] ss:$16 sps:$4 sm:$0xff]  }
 0x5c6   :  { %2817 = vmatprep.subr.bf16.mxu0 %v5099_v12  ;;  %v5187_v12 = vld [vmem:[#allocation20 + $0x40] ss:$16 sps:$4 sm:$0xff]  }
 0x5c9   :  { %2818 = vmatpush2.bf16.msra.mxu0 %v5097_v13  ;;  %v5195_v13 = vld [vmem:[#allocation20 + $0x24] ss:$16 sps:$4 sm:$0xff]  }
 0x5ca   :  { %2819 = vmatprep.subr.bf16.mxu0 %v5102_v14  ;;  %v5193_v14 = vld [vmem:[#allocation20 + $0x20] ss:$16 sps:$4 sm:$0xff]  }
 0x5cd   :  { %2820 = vmatpush2.bf16.msra.mxu0 %v5100_v15  ;;  %v5201_v15 = vld [vmem:[#allocation20 + $0x4] ss:$16 sps:$4 sm:$0xff]  }
 0x5ce   :  { %2821 = vmatprep.subr.bf16.mxu0 %v5105_v22  ;;  %v5217_v22 = vld [vmem:[#allocation20 + $0x1a0] ss:$16 sps:$4 sm:$0xff]  }
 0x5d1   :  { %2822 = vmatpush2.bf16.msra.mxu0 %v5103_v23  ;;  %v5225_v23 = vld [vmem:[#allocation20 + $0x184] ss:$16 sps:$4 sm:$0xff]  }
 0x5d2   :  { %2823 = vmatprep.subr.bf16.mxu0 %v5108_v24  ;;  %v5223_v24 = vld [vmem:[#allocation20 + $0x180] ss:$16 sps:$4 sm:$0xff]  }
 0x5d5   :  { %2824 = vmatpush2.bf16.msra.mxu0 %v5106_v25  ;;  %v5231_v25 = vld [vmem:[#allocation20 + $0x164] ss:$16 sps:$4 sm:$0xff]  }
 0x5d6   :  { %3459 = vmatprep.subr.bf16.mxu0 %v5159_v1  ;;  %v5244_v1 = vld [vmem:[#allocation20 + $0x128] ss:$16 sps:$4 sm:$0xff]  }
 0x658   :  { %v2353_v16 = vpop.f32.mrf.mxu0 }
 0x65a   :  { %v2355_v17 = vpop.f32.mrf.mxu0 }
 0x65c   :  { %v2357_v18 = vpop.f32.mrf.mxu0 }
 0x65d   :  { %v2362_v21 = vpack.c.bf16 %v2357_v18, %v2353_v16  ;;  %v5199_v16 = vld [vmem:[#allocation20] ss:$16 sps:$4 sm:$0xff]  }
 0x65e   :  { %v2359_v19 = vpop.f32.mrf.mxu0  ;;  %v5205_v18 = vld [vmem:[#allocation20 + $0x1e0] ss:$16 sps:$4 sm:$0xff]  }
 0x65f   :  { %v2363_v20 = vpack.c.bf16 %v2359_v19, %v2355_v17  ;;  %v5207_v17 = vld [vmem:[#allocation20 + $0x1e4] ss:$16 sps:$4 sm:$0xff]  }
 0x660   :  { %v5213_v19 = vld [vmem:[#allocation20 + $0x1c4] ss:$16 sps:$4 sm:$0xff]  }
 0x661   :  { %2588 = vmatprep.mubr.bf16.mxu1 %v2363_v20  ;;  %v5211_v20 = vld [vmem:[#allocation20 + $0x1c0] ss:$16 sps:$4 sm:$0xff]  }
 0x662   :  { %2589 = vmatmul.mubr.bf16.vlgmr.msra.gmra.mxu1 %v2362_v21  ;;  %v5219_v21 = vld [vmem:[#allocation20 + $0x1a4] ss:$16 sps:$4 sm:$0xff]  }
 0x663   :  { %3031 = vmatpush1.bf16.msra.mxu1 %v5109_v26  ;;  %v5229_v26 = vld [vmem:[#allocation20 + $0x160] ss:$16 sps:$4 sm:$0xff]  }
 0x664   :  { %3032 = vmatprep.subr.bf16.mxu1 %v5114_v28  ;;  %v5235_v28 = vld [vmem:[#allocation20 + $0x140] ss:$16 sps:$4 sm:$0xff]  }
 0x667   :  { %3033 = vmatpush1.bf16.msra.mxu1 %v5112_v29 }
 0x668   :  { %3034 = vmatprep.subr.bf16.mxu1 %v5117_v30 }
 0x66b   :  { %3035 = vmatpush1.bf16.msra.mxu1 %v5115_v31 }
 0x66c   :  { %3036 = vmatprep.subr.bf16.mxu1 %v5120_v32 }
 0x66f   :  { %3037 = vmatpush1.bf16.msra.mxu1 %v5118_v33 }
 0x670   :  { %3038 = vmatprep.subr.bf16.mxu1 %v5123_v34  ;;  %v5160_v34 = vld [vmem:[#allocation20 + $0xe8] ss:$16 sps:$4 sm:$0xff]  }
 0x673   :  { %3039 = vmatpush1.bf16.msra.mxu1 %v5121_v35 }
 0x674   :  { %3040 = vmatprep.subr.bf16.mxu1 %v5126_v36  ;;  %v5168_v36 = vld [vmem:[#allocation20 + $0xcc] ss:$16 sps:$4 sm:$0xff]  }
 0x677   :  { %3041 = vmatpush1.bf16.msra.mxu1 %v5124_v37  ;;  %v5166_v37 = vld [vmem:[#allocation20 + $0xc8] ss:$16 sps:$4 sm:$0xff]  }
 0x678   :  { %3042 = vmatprep.subr.bf16.mxu1 %v5129_v38  ;;  %v5174_v38 = vld [vmem:[#allocation20 + $0xac] ss:$16 sps:$4 sm:$0xff]  }
 0x67b   :  { %3043 = vmatpush1.bf16.msra.mxu1 %v5127_v39  ;;  %v5172_v39 = vld [vmem:[#allocation20 + $0xa8] ss:$16 sps:$4 sm:$0xff]  }
 0x67c   :  { %3044 = vmatprep.subr.bf16.mxu1 %v5132_v40  ;;  %v5180_v40 = vld [vmem:[#allocation20 + $0x8c] ss:$16 sps:$4 sm:$0xff]  }
 0x67f   :  { %3045 = vmatpush1.bf16.msra.mxu1 %v5130_v41  ;;  %v5178_v41 = vld [vmem:[#allocation20 + $0x88] ss:$16 sps:$4 sm:$0xff]  }
 0x680   :  { %3046 = vmatprep.subr.bf16.mxu1 %v5135_v42  ;;  %v5186_v42 = vld [vmem:[#allocation20 + $0x6c] ss:$16 sps:$4 sm:$0xff]  }
 0x683   :  { %3047 = vmatpush2.bf16.msra.mxu1 %v5133_v43  ;;  %v5184_v43 = vld [vmem:[#allocation20 + $0x68] ss:$16 sps:$4 sm:$0xff]  }
 0x684   :  { %3048 = vmatprep.subr.bf16.mxu1 %v5138_v44  ;;  %v5192_v44 = vld [vmem:[#allocation20 + $0x4c] ss:$16 sps:$4 sm:$0xff]  }
 0x687   :  { %3049 = vmatpush2.bf16.msra.mxu1 %v5136_v45  ;;  %v5190_v45 = vld [vmem:[#allocation20 + $0x48] ss:$16 sps:$4 sm:$0xff]  }
 0x688   :  { %3050 = vmatprep.subr.bf16.mxu1 %v5141_v46  ;;  %v5198_v46 = vld [vmem:[#allocation20 + $0x2c] ss:$16 sps:$4 sm:$0xff]  }
 0x68b   :  { %3051 = vmatpush2.bf16.msra.mxu1 %v5139_v47  ;;  %v5196_v47 = vld [vmem:[#allocation20 + $0x28] ss:$16 sps:$4 sm:$0xff]  }
 0x68c   :  { %3052 = vmatprep.subr.bf16.mxu1 %v5144_v48  ;;  %v5204_v48 = vld [vmem:[#allocation20 + $0xc] ss:$16 sps:$4 sm:$0xff]  }
 0x68f   :  { %3053 = vmatpush2.bf16.msra.mxu1 %v5142_v49  ;;  %v5202_v49 = vld [vmem:[#allocation20 + $0x8] ss:$16 sps:$4 sm:$0xff]  }
 0x690   :  { %3054 = vmatprep.subr.bf16.mxu1 %v5147_v50  ;;  %v5210_v50 = vld [vmem:[#allocation20 + $0x1ec] ss:$16 sps:$4 sm:$0xff]  }
 0x693   :  { %3055 = vmatpush2.bf16.msra.mxu1 %v5145_v51  ;;  %v5208_v51 = vld [vmem:[#allocation20 + $0x1e8] ss:$16 sps:$4 sm:$0xff]  }
 0x694   :  { %3056 = vmatprep.subr.bf16.mxu1 %v5150_v52  ;;  %v5216_v52 = vld [vmem:[#allocation20 + $0x1cc] ss:$16 sps:$4 sm:$0xff]  }
 0x697   :  { %3057 = vmatpush2.bf16.msra.mxu1 %v5148_v53  ;;  %v5214_v53 = vld [vmem:[#allocation20 + $0x1c8] ss:$16 sps:$4 sm:$0xff]  }
 0x698   :  { %3058 = vmatprep.subr.bf16.mxu1 %v5153_v60  ;;  %v5240_v60 = vld [vmem:[#allocation20 + $0x14c] ss:$16 sps:$4 sm:$0xff]  }
 0x69b   :  { %3059 = vmatpush2.bf16.msra.mxu1 %v5151_v61  ;;  %v5238_v61 = vld [vmem:[#allocation20 + $0x148] ss:$16 sps:$4 sm:$0xff]  }
 0x69c   :  { %3060 = vmatprep.subr.bf16.mxu1 %v5156_v62  ;;  %v5243_v62 = vld [vmem:[#allocation20 + $0x124] ss:$16 sps:$4 sm:$0xff]  }
 0x69f   :  { %3061 = vmatpush2.bf16.msra.mxu1 %v5154_v63  ;;  %v5246_v63 = vld [vmem:[#allocation20 + $0x12c] ss:$16 sps:$4 sm:$0xff]  }
 0x6a0   :  { %3502 = vmatprep.subr.bf16.mxu1 %v5162_v2  ;;  %v5249_v2 = vld [vmem:[#allocation20 + $0x104] ss:$16 sps:$4 sm:$0xff]  }
 0x722   :  { %v2590_v54 = vpop.f32.mrf.mxu1 }
 0x724   :  { %v2592_v55 = vpop.f32.mrf.mxu1 }
 0x726   :  { %v2594_v56 = vpop.f32.mrf.mxu1 }
 0x727   :  { %v2599_v59 = vpack.c.bf16 %v2594_v56, %v2590_v54  ;;  %v5222_v54 = vld [vmem:[#allocation20 + $0x1ac] ss:$16 sps:$4 sm:$0xff]  }
 0x728   :  { %v2596_v57 = vpop.f32.mrf.mxu1  ;;  %v5228_v56 = vld [vmem:[#allocation20 + $0x18c] ss:$16 sps:$4 sm:$0xff]  }
 0x729   :  { %v2600_v58 = vpack.c.bf16 %v2596_v57, %v2592_v55  ;;  %v5220_v55 = vld [vmem:[#allocation20 + $0x1a8] ss:$16 sps:$4 sm:$0xff]  }
 0x72a   :  { %v5226_v57 = vld [vmem:[#allocation20 + $0x188] ss:$16 sps:$4 sm:$0xff]  }
 0x72b   :  { %2825 = vmatprep.mubr.bf16.mxu0 %v2600_v58  ;;  %v5234_v58 = vld [vmem:[#allocation20 + $0x16c] ss:$16 sps:$4 sm:$0xff]  }
 0x72c   :  { %2826 = vmatmul.mubr.bf16.vlgmr.msra.gmra.mxu0 %v2599_v59  ;;  %v5232_v59 = vld [vmem:[#allocation20 + $0x168] ss:$16 sps:$4 sm:$0xff]  }
 0x72d   :  { %3460 = vmatpush1.bf16.msra.mxu0 %v5157_v0  ;;  %v5241_v0 = vld [vmem:[#allocation20 + $0x120] ss:$16 sps:$4 sm:$0xff]  }
 0x72e   :  { %3461 = vmatprep.subr.bf16.mxu0 %v5165_v3  ;;  %v5252_v3 = vld [vmem:[#allocation20 + $0x10c] ss:$16 sps:$4 sm:$0xff]  }
 0x731   :  { %3462 = vmatpush1.bf16.msra.mxu0 %v5163_v4  ;;  %v5247_v4 = vld [vmem:[#allocation20 + $0x100] ss:$16 sps:$4 sm:$0xff]  }
 0x732   :  { %3463 = vmatprep.subr.bf16.mxu0 %v5171_v5  ;;  %v5250_v5 = vld [vmem:[#allocation20 + $0x108] ss:$16 sps:$4 sm:$0xff]  }
 0x735   :  { %3464 = vmatpush1.bf16.msra.mxu0 %v5169_v6  ;;  %v5255_v6 = vld [vmem:[#allocation22 + $0x74] ss:$8 sps:$4 sm:$0xff]  }
 0x736   :  { %3465 = vmatprep.subr.bf16.mxu0 %v5177_v7  ;;  %v5258_v7 = vld [vmem:[#allocation22 + $0x174] ss:$8 sps:$4 sm:$0xff]  }
 0x739   :  { %3466 = vmatpush1.bf16.msra.mxu0 %v5175_v8 }
 0x73a   :  { %3467 = vmatprep.subr.bf16.mxu0 %v5183_v9 }
 0x73d   :  { %3468 = vmatpush1.bf16.msra.mxu0 %v5181_v10 }
 0x73e   :  { %3469 = vmatprep.subr.bf16.mxu0 %v5189_v11 }
 0x741   :  { %3470 = vmatpush1.bf16.msra.mxu0 %v5187_v12 }
 0x742   :  { %3471 = vmatprep.subr.bf16.mxu0 %v5195_v13  ;;  %v5253_v13 = vld [vmem:[#allocation22 + $0x70] ss:$8 sps:$4 sm:$0xff]  }
 0x745   :  { %3472 = vmatpush1.bf16.msra.mxu0 %v5193_v14  ;;  %v5256_v14 = vld [vmem:[#allocation22 + $0x170] ss:$8 sps:$4 sm:$0xff]  }
 0x746   :  { %3473 = vmatprep.subr.bf16.mxu0 %v5201_v15 }
 0x749   :  { %3474 = vmatpush1.bf16.msra.mxu0 %v5199_v16  ;;  %v5261_v16 = vld [vmem:[#allocation22 + $0x64] ss:$8 sps:$4 sm:$0xff]  }
 0x74a   :  { %3475 = vmatprep.subr.bf16.mxu0 %v5207_v17  ;;  %v5264_v17 = vld [vmem:[#allocation22 + $0x164] ss:$8 sps:$4 sm:$0xff]  }
 0x74d   :  { %3476 = vmatpush2.bf16.msra.mxu0 %v5205_v18  ;;  %v5259_v18 = vld [vmem:[#allocation22 + $0x60] ss:$8 sps:$4 sm:$0xff]  }
 0x74e   :  { %3477 = vmatprep.subr.bf16.mxu0 %v5213_v19  ;;  %v5262_v19 = vld [vmem:[#allocation22 + $0x160] ss:$8 sps:$4 sm:$0xff]  }
 0x751   :  { %3478 = vmatpush2.bf16.msra.mxu0 %v5211_v20  ;;  %v5267_v20 = vld [vmem:[#allocation22 + $0x54] ss:$8 sps:$4 sm:$0xff]  }
 0x752   :  { %3479 = vmatprep.subr.bf16.mxu0 %v5219_v21  ;;  %v5270_v21 = vld [vmem:[#allocation22 + $0x154] ss:$8 sps:$4 sm:$0xff]  }
 0x755   :  { %3480 = vmatpush2.bf16.msra.mxu0 %v5217_v22  ;;  %v5265_v22 = vld [vmem:[#allocation22 + $0x50] ss:$8 sps:$4 sm:$0xff]  }
 0x756   :  { %3481 = vmatprep.subr.bf16.mxu0 %v5225_v23  ;;  %v5268_v23 = vld [vmem:[#allocation22 + $0x150] ss:$8 sps:$4 sm:$0xff]  }
 0x759   :  { %3482 = vmatpush2.bf16.msra.mxu0 %v5223_v24  ;;  %v5273_v24 = vld [vmem:[#allocation22 + $0x44] ss:$8 sps:$4 sm:$0xff]  }
 0x75a   :  { %3483 = vmatprep.subr.bf16.mxu0 %v5231_v25  ;;  %v5276_v25 = vld [vmem:[#allocation22 + $0x144] ss:$8 sps:$4 sm:$0xff]  }
 0x75d   :  { %3484 = vmatpush2.bf16.msra.mxu0 %v5229_v26  ;;  %v5271_v26 = vld [vmem:[#allocation22 + $0x40] ss:$8 sps:$4 sm:$0xff]  }
 0x75e   :  { %3485 = vmatprep.subr.bf16.mxu0 %v5237_v27  ;;  %v5274_v27 = vld [vmem:[#allocation22 + $0x140] ss:$8 sps:$4 sm:$0xff]  }
 0x761   :  { %3486 = vmatpush2.bf16.msra.mxu0 %v5235_v28  ;;  %v5279_v28 = vld [vmem:[#allocation22 + $0x34] ss:$8 sps:$4 sm:$0xff]  }
 0x762   :  { %3487 = vmatprep.subr.bf16.mxu0 %v5243_v62  ;;  %v5325_v62 = vld [vmem:[#allocation22 + $0xb0] ss:$8 sps:$4 sm:$0xff]  }
 0x765   :  { %3488 = vmatpush2.bf16.msra.mxu0 %v5241_v0  ;;  %v5333_v0 = vld [vmem:[#allocation22 + $0xa4] ss:$8 sps:$4 sm:$0xff]  }
 0x766   :  { %3489 = vmatprep.subr.bf16.mxu0 %v5249_v2  ;;  %v5331_v2 = vld [vmem:[#allocation22 + $0xa0] ss:$8 sps:$4 sm:$0xff]  }
 0x769   :  { %3490 = vmatpush2.bf16.msra.mxu0 %v5247_v4  ;;  %v5339_v4 = vld [vmem:[#allocation22 + $0x94] ss:$8 sps:$4 sm:$0xff]  }
 0x76a   :  { %3933 = vmatprep.subr.bf16.mxu0 %v5255_v6  ;;  %v5337_v6 = vld [vmem:[#allocation22 + $0x90] ss:$8 sps:$4 sm:$0xff]  }
 0x7ec   :  { %v2827_v29 = vpop.f32.mrf.mxu0 }
 0x7ee   :  { %v2829_v30 = vpop.f32.mrf.mxu0 }
 0x7f0   :  { %v2831_v31 = vpop.f32.mrf.mxu0 }
 0x7f1   :  { %v2836_v35 = vpack.c.bf16 %v2831_v31, %v2827_v29  ;;  %v5282_v29 = vld [vmem:[#allocation22 + $0x134] ss:$8 sps:$4 sm:$0xff]   ;;  %v5280_v31 = vld [vmem:[#allocation22 + $0x130] ss:$8 sps:$4 sm:$0xff]  }
 0x7f2   :  { %v2833_v32 = vpop.f32.mrf.mxu0 }
 0x7f3   :  { %v2837_v33 = vpack.c.bf16 %v2833_v32, %v2829_v30  ;;  %v5277_v30 = vld [vmem:[#allocation22 + $0x30] ss:$8 sps:$4 sm:$0xff]   ;;  %v5285_v32 = vld [vmem:[#allocation22 + $0x24] ss:$8 sps:$4 sm:$0xff]  }
 0x7f5   :  { %3062 = vmatprep.mubr.bf16.mxu1 %v2837_v33  ;;  %v5288_v33 = vld [vmem:[#allocation22 + $0x124] ss:$8 sps:$4 sm:$0xff]  }
 0x7f6   :  { %3063 = vmatmul.mubr.bf16.vlgmr.msra.gmra.mxu1 %v2836_v35  ;;  %v5286_v35 = vld [vmem:[#allocation22 + $0x120] ss:$8 sps:$4 sm:$0xff]  }
 0x7f7   :  { %3503 = vmatpush1.bf16.msra.mxu1 %v5160_v34  ;;  %v5283_v34 = vld [vmem:[#allocation22 + $0x20] ss:$8 sps:$4 sm:$0xff]  }
 0x7f8   :  { %3504 = vmatprep.subr.bf16.mxu1 %v5168_v36  ;;  %v5291_v36 = vld [vmem:[#allocation22 + $0x14] ss:$8 sps:$4 sm:$0xff]  }
 0x7fb   :  { %3505 = vmatpush1.bf16.msra.mxu1 %v5166_v37  ;;  %v5294_v37 = vld [vmem:[#allocation22 + $0x114] ss:$8 sps:$4 sm:$0xff]  }
 0x7fc   :  { %3506 = vmatprep.subr.bf16.mxu1 %v5174_v38  ;;  %v5289_v38 = vld [vmem:[#allocation22 + $0x10] ss:$8 sps:$4 sm:$0xff]  }
 0x7ff   :  { %3507 = vmatpush1.bf16.msra.mxu1 %v5172_v39  ;;  %v5292_v39 = vld [vmem:[#allocation22 + $0x110] ss:$8 sps:$4 sm:$0xff]  }
 0x800   :  { %3508 = vmatprep.subr.bf16.mxu1 %v5180_v40  ;;  %v5297_v40 = vld [vmem:[#allocation22 + $0x4] ss:$8 sps:$4 sm:$0xff]  }
 0x803   :  { %3509 = vmatpush1.bf16.msra.mxu1 %v5178_v41  ;;  %v5300_v41 = vld [vmem:[#allocation22 + $0x104] ss:$8 sps:$4 sm:$0xff]  }
 0x804   :  { %3510 = vmatprep.subr.bf16.mxu1 %v5186_v42  ;;  %v5295_v42 = vld [vmem:[#allocation22] ss:$8 sps:$4 sm:$0xff]  }
 0x807   :  { %3511 = vmatpush1.bf16.msra.mxu1 %v5184_v43  ;;  %v5298_v43 = vld [vmem:[#allocation22 + $0x100] ss:$8 sps:$4 sm:$0xff]  }
 0x808   :  { %3512 = vmatprep.subr.bf16.mxu1 %v5192_v44  ;;  %v5303_v44 = vld [vmem:[#allocation22 + $0xf4] ss:$8 sps:$4 sm:$0xff]  }
 0x80b   :  { %3513 = vmatpush1.bf16.msra.mxu1 %v5190_v45  ;;  %v5306_v45 = vld [vmem:[#allocation22 + $0x1f4] ss:$8 sps:$4 sm:$0xff]  }
 0x80c   :  { %3514 = vmatprep.subr.bf16.mxu1 %v5198_v46  ;;  %v5301_v46 = vld [vmem:[#allocation22 + $0xf0] ss:$8 sps:$4 sm:$0xff]  }
 0x80f   :  { %3515 = vmatpush1.bf16.msra.mxu1 %v5196_v47  ;;  %v5304_v47 = vld [vmem:[#allocation22 + $0x1f0] ss:$8 sps:$4 sm:$0xff]  }
 0x810   :  { %3516 = vmatprep.subr.bf16.mxu1 %v5204_v48  ;;  %v5309_v48 = vld [vmem:[#allocation22 + $0xe4] ss:$8 sps:$4 sm:$0xff]  }
 0x813   :  { %3517 = vmatpush1.bf16.msra.mxu1 %v5202_v49  ;;  %v5312_v49 = vld [vmem:[#allocation22 + $0x1e4] ss:$8 sps:$4 sm:$0xff]  }
 0x814   :  { %3518 = vmatprep.subr.bf16.mxu1 %v5210_v50  ;;  %v5307_v50 = vld [vmem:[#allocation22 + $0xe0] ss:$8 sps:$4 sm:$0xff]  }
 0x817   :  { %3519 = vmatpush2.bf16.msra.mxu1 %v5208_v51  ;;  %v5310_v51 = vld [vmem:[#allocation22 + $0x1e0] ss:$8 sps:$4 sm:$0xff]  }
 0x818   :  { %3520 = vmatprep.subr.bf16.mxu1 %v5216_v52  ;;  %v5315_v52 = vld [vmem:[#allocation22 + $0xd4] ss:$8 sps:$4 sm:$0xff]  }
 0x81b   :  { %3521 = vmatpush2.bf16.msra.mxu1 %v5214_v53  ;;  %v5318_v53 = vld [vmem:[#allocation22 + $0x1d4] ss:$8 sps:$4 sm:$0xff]  }
 0x81c   :  { %3522 = vmatprep.subr.bf16.mxu1 %v5222_v54  ;;  %v5313_v54 = vld [vmem:[#allocation22 + $0xd0] ss:$8 sps:$4 sm:$0xff]  }
 0x81f   :  { %3523 = vmatpush2.bf16.msra.mxu1 %v5220_v55  ;;  %v5316_v55 = vld [vmem:[#allocation22 + $0x1d0] ss:$8 sps:$4 sm:$0xff]  }
 0x820   :  { %3524 = vmatprep.subr.bf16.mxu1 %v5228_v56  ;;  %v5321_v56 = vld [vmem:[#allocation22 + $0xc4] ss:$8 sps:$4 sm:$0xff]  }
 0x823   :  { %3525 = vmatpush2.bf16.msra.mxu1 %v5226_v57  ;;  %v5324_v57 = vld [vmem:[#allocation22 + $0x1c4] ss:$8 sps:$4 sm:$0xff]  }
 0x824   :  { %3526 = vmatprep.subr.bf16.mxu1 %v5234_v58  ;;  %v5319_v58 = vld [vmem:[#allocation22 + $0xc0] ss:$8 sps:$4 sm:$0xff]  }
 0x827   :  { %3527 = vmatpush2.bf16.msra.mxu1 %v5232_v59  ;;  %v5322_v59 = vld [vmem:[#allocation22 + $0x1c0] ss:$8 sps:$4 sm:$0xff]  }
 0x828   :  { %3528 = vmatprep.subr.bf16.mxu1 %v5240_v60  ;;  %v5327_v60 = vld [vmem:[#allocation22 + $0xb4] ss:$8 sps:$4 sm:$0xff]  }
 0x82b   :  { %3529 = vmatpush2.bf16.msra.mxu1 %v5238_v61  ;;  %v5330_v61 = vld [vmem:[#allocation22 + $0x1b4] ss:$8 sps:$4 sm:$0xff]  }
 0x82c   :  { %3530 = vmatprep.subr.bf16.mxu1 %v5246_v63  ;;  %v5328_v63 = vld [vmem:[#allocation22 + $0x1b0] ss:$8 sps:$4 sm:$0xff]  }
 0x82f   :  { %3531 = vmatpush2.bf16.msra.mxu1 %v5244_v1  ;;  %v5336_v1 = vld [vmem:[#allocation22 + $0x1a4] ss:$8 sps:$4 sm:$0xff]  }
 0x830   :  { %3532 = vmatprep.subr.bf16.mxu1 %v5252_v3  ;;  %v5334_v3 = vld [vmem:[#allocation22 + $0x1a0] ss:$8 sps:$4 sm:$0xff]  }
 0x833   :  { %3533 = vmatpush2.bf16.msra.mxu1 %v5250_v5  ;;  %v5342_v5 = vld [vmem:[#allocation22 + $0x194] ss:$8 sps:$4 sm:$0xff]  }
 0x834   :  { %3976 = vmatprep.subr.bf16.mxu1 %v5258_v7  ;;  %v5340_v7 = vld [vmem:[#allocation22 + $0x190] ss:$8 sps:$4 sm:$0xff]  }
 0x8b6   :  { %v3064_v8 = vpop.f32.mrf.mxu1 }
 0x8b8   :  { %v3066_v9 = vpop.f32.mrf.mxu1 }
 0x8ba   :  { %v3068_v10 = vpop.f32.mrf.mxu1 }
 0x8bb   :  { %v3073_v15 = vpack.c.bf16 %v3068_v10, %v3064_v8  ;;  %v5345_v8 = vld [vmem:[#allocation22 + $0x84] ss:$8 sps:$4 sm:$0xff]   ;;  %v5343_v10 = vld [vmem:[#allocation22 + $0x80] ss:$8 sps:$4 sm:$0xff]  }
 0x8bc   :  { %v3070_v11 = vpop.f32.mrf.mxu1 }
 0x8bd   :  { %v3074_v12 = vpack.c.bf16 %v3070_v11, %v3066_v9  ;;  %v5348_v9 = vld [vmem:[#allocation22 + $0x184] ss:$8 sps:$4 sm:$0xff]   ;;  %v5346_v11 = vld [vmem:[#allocation22 + $0x180] ss:$8 sps:$4 sm:$0xff]  }
 0x8bf   :  { %3491 = vmatprep.mubr.bf16.mxu0 %v3074_v12  ;;  %3534 = vmatprep.mubr.bf16.mxu1 %v3074_v12 }
 0x8c0   :  { %3492 = vmatmul.mubr.bf16.vlgmr.msra.gmra.mxu0 %v3073_v15  ;;  %3535 = vmatmul.mubr.bf16.vlgmr.msra.gmra.mxu1 %v3073_v15 }
 0x8c1   :  { %3934 = vmatpush1.bf16.msra.mxu0 %v5253_v13  ;;  %3977 = vmatpush1.bf16.msra.mxu1 %v5256_v14 }
 0x8c2   :  { %3935 = vmatprep.subr.bf16.mxu0 %v5261_v16  ;;  %3978 = vmatprep.subr.bf16.mxu1 %v5264_v17 }
 0x8c5   :  { %3936 = vmatpush1.bf16.msra.mxu0 %v5259_v18  ;;  %3979 = vmatpush1.bf16.msra.mxu1 %v5262_v19 }
 0x8c6   :  { %3937 = vmatprep.subr.bf16.mxu0 %v5267_v20  ;;  %3980 = vmatprep.subr.bf16.mxu1 %v5270_v21 }
 0x8c9   :  { %3938 = vmatpush1.bf16.msra.mxu0 %v5265_v22  ;;  %3981 = vmatpush1.bf16.msra.mxu1 %v5268_v23 }
 0x8ca   :  { %3939 = vmatprep.subr.bf16.mxu0 %v5273_v24  ;;  %3982 = vmatprep.subr.bf16.mxu1 %v5276_v25 }
 0x8cd   :  { %3940 = vmatpush1.bf16.msra.mxu0 %v5271_v26  ;;  %3983 = vmatpush1.bf16.msra.mxu1 %v5274_v27 }
 0x8ce   :  { %3941 = vmatprep.subr.bf16.mxu0 %v5279_v28  ;;  %3984 = vmatprep.subr.bf16.mxu1 %v5282_v29 }
 0x8d1   :  { %3942 = vmatpush1.bf16.msra.mxu0 %v5277_v30  ;;  %3985 = vmatpush1.bf16.msra.mxu1 %v5280_v31 }
 0x8d2   :  { %3943 = vmatprep.subr.bf16.mxu0 %v5285_v32  ;;  %3986 = vmatprep.subr.bf16.mxu1 %v5288_v33 }
 0x8d5   :  { %3944 = vmatpush1.bf16.msra.mxu0 %v5283_v34  ;;  %3987 = vmatpush1.bf16.msra.mxu1 %v5286_v35 }
 0x8d6   :  { %3945 = vmatprep.subr.bf16.mxu0 %v5291_v36  ;;  %3988 = vmatprep.subr.bf16.mxu1 %v5294_v37 }
 0x8d9   :  { %3946 = vmatpush1.bf16.msra.mxu0 %v5289_v38  ;;  %3989 = vmatpush1.bf16.msra.mxu1 %v5292_v39 }
 0x8da   :  { %3947 = vmatprep.subr.bf16.mxu0 %v5297_v40  ;;  %3990 = vmatprep.subr.bf16.mxu1 %v5300_v41 }
 0x8dd   :  { %3948 = vmatpush1.bf16.msra.mxu0 %v5295_v42  ;;  %3991 = vmatpush1.bf16.msra.mxu1 %v5298_v43 }
 0x8de   :  { %3949 = vmatprep.subr.bf16.mxu0 %v5303_v44  ;;  %3992 = vmatprep.subr.bf16.mxu1 %v5306_v45 }
 0x8e1   :  { %3950 = vmatpush2.bf16.msra.mxu0 %v5301_v46  ;;  %3993 = vmatpush2.bf16.msra.mxu1 %v5304_v47 }
 0x8e2   :  { %3951 = vmatprep.subr.bf16.mxu0 %v5309_v48  ;;  %3994 = vmatprep.subr.bf16.mxu1 %v5312_v49 }
 0x8e5   :  { %3952 = vmatpush2.bf16.msra.mxu0 %v5307_v50  ;;  %3995 = vmatpush2.bf16.msra.mxu1 %v5310_v51 }
 0x8e6   :  { %3953 = vmatprep.subr.bf16.mxu0 %v5315_v52  ;;  %3996 = vmatprep.subr.bf16.mxu1 %v5318_v53 }
 0x8e9   :  { %3954 = vmatpush2.bf16.msra.mxu0 %v5313_v54  ;;  %3997 = vmatpush2.bf16.msra.mxu1 %v5316_v55 }
 0x8ea   :  { %3955 = vmatprep.subr.bf16.mxu0 %v5321_v56  ;;  %3998 = vmatprep.subr.bf16.mxu1 %v5324_v57 }
 0x8ed   :  { %3956 = vmatpush2.bf16.msra.mxu0 %v5319_v58  ;;  %3999 = vmatpush2.bf16.msra.mxu1 %v5322_v59 }
 0x8ee   :  { %3957 = vmatprep.subr.bf16.mxu0 %v5327_v60  ;;  %4000 = vmatprep.subr.bf16.mxu1 %v5330_v61 }
 0x8f1   :  { %3958 = vmatpush2.bf16.msra.mxu0 %v5325_v62  ;;  %4001 = vmatpush2.bf16.msra.mxu1 %v5328_v63 }
 0x8f2   :  { %3959 = vmatprep.subr.bf16.mxu0 %v5333_v0  ;;  %4002 = vmatprep.subr.bf16.mxu1 %v5336_v1 }
 0x8f5   :  { %3960 = vmatpush2.bf16.msra.mxu0 %v5331_v2  ;;  %4003 = vmatpush2.bf16.msra.mxu1 %v5334_v3 }
 0x8f6   :  { %3961 = vmatprep.subr.bf16.mxu0 %v5339_v4  ;;  %4004 = vmatprep.subr.bf16.mxu1 %v5342_v5 }
 0x8f9   :  { %3962 = vmatpush2.bf16.msra.mxu0 %v5337_v6  ;;  %4005 = vmatpush2.bf16.msra.mxu1 %v5340_v7 }
 0x8fa   :  { %3963 = vmatprep.subr.bf16.mxu0 %v5345_v8  ;;  %4006 = vmatprep.subr.bf16.mxu1 %v5348_v9 }
 0x8fd   :  { %3964 = vmatpush2.bf16.msra.mxu0 %v5343_v10  ;;  %4007 = vmatpush2.bf16.msra.mxu1 %v5346_v11 }
 0x980   :  { %v3493_v12 = vpop.f32.mrf.mxu0  ;;  %v3536_v13 = vpop.f32.mrf.mxu1 }
 0x982   :  { %v3495_v14 = vpop.f32.mrf.mxu0  ;;  %v3538_v15 = vpop.f32.mrf.mxu1 }
 0x984   :  { %v3497_v16 = vpop.f32.mrf.mxu0  ;;  %v3540_v17 = vpop.f32.mrf.mxu1 }
 0x985   :  { %v3545_v22 = vpack.c.bf16 %v3497_v16, %v3493_v12  ;;  %v3547_v23 = vpack.c.bf16 %v3540_v17, %v3536_v13 }
 0x986   :  { %v3499_v18 = vpop.f32.mrf.mxu0  ;;  %v3542_v19 = vpop.f32.mrf.mxu1 }
 0x987   :  { %v3546_v20 = vpack.c.bf16 %v3499_v18, %v3495_v14  ;;  %v3548_v21 = vpack.c.bf16 %v3542_v19, %v3538_v15 }
 0x989   :  { %3965 = vmatprep.mubr.bf16.mxu0 %v3546_v20  ;;  %4008 = vmatprep.mubr.bf16.mxu1 %v3548_v21 }
 0x98a   :  { %3966 = vmatmul.mubr.bf16.vlgmr.msra.gmra.mxu0 %v3545_v22  ;;  %4009 = vmatmul.mubr.bf16.vlgmr.msra.gmra.mxu1 %v3547_v23 }
 0xa4a   :  { %v3967_v24 = vpop.f32.mrf.mxu0  ;;  %v4010_v25 = vpop.f32.mrf.mxu1 }
 0xa4b   :  { %v4011_v26 = vadd.f32 %v4010_v25, %v3967_v24 }
 0xa4c   :  { %v3969_v27 = vpop.f32.mrf.mxu0  ;;  %v4012_v28 = vpop.f32.mrf.mxu1 }
 0xa4d   :  { %4019 = vst [vmem:[#allocation23] sm:$0xff] %v4011_v26  ;;  %v4013_v29 = vadd.f32 %v4012_v28, %v3969_v27 }
 0xa4e   :  { %v3971_v30 = vpop.f32.mrf.mxu0  ;;  %v4014_v31 = vpop.f32.mrf.mxu1 }
 0xa4f   :  { %4020 = vst [vmem:[#allocation23 + $0x8] sm:$0xff] %v4013_v29  ;;  %v4015_v32 = vadd.f32 %v4014_v31, %v3971_v30 }
 0xa50   :  { %v3973_v33 = vpop.f32.mrf.mxu0  ;;  %v4016_v34 = vpop.f32.mrf.mxu1 }
 0xa51   :  { %4021 = vst [vmem:[#allocation23 + $0x10] sm:$0xff] %v4015_v32  ;;  %v4017_v35 = vadd.f32 %v4016_v34, %v3973_v33 }
 0xa53   :  { %4022 = vst [vmem:[#allocation23 + $0x18] sm:$0xff] %v4017_v35 }
 0xa54   :  { %5620 = shalt.err (!%p5617_p13)
}
 0xa55   :  { %4034 = dma.vmem_to_hbm [thread:$0]  %s4029_s12, 512, %s5830_s13, [#allocation4], %s5650_s1, %s5650_s1, %s5651_s23  }
 0xa56   :  { %5643 = dma.done.wait [#allocation4], 512  }
 0xa57   :  { %5644 = vsyncadd [#allocation4], 4294966784 }
 0xa58   :  { %4038 = vsyncpa [#allocation3], 1 }
 0xa59   :  { %4039 = vsyncpa [#allocation6], 1 }
 0xa5a   :  { %4040 = vsyncpa [#allocation9], 1 }
 0xa5b   :  { %4041 = vsyncpa [#allocation12], 1 }
 0xa5c   :  { %4042 = vsyncpa [#allocation15], 1 }
 0xa5d   :  { %4043 = vsyncpa [#allocation18], 1 }
 0xa5e   :  { %4044 = vsyncpa [#allocation21], 1 }
 0xa5f   :  { %4045 = vsyncpa [#allocation4], 1 }

</bundles_post_ra>
